<compile_context>
chip_gen: v7x
topology: tpu7x:2x2x1
jax: 0.10.0
libtpu: 0.0.40
codegen_flags: <defaults>
</compile_context>

<pallas_src>
import jax
import jax.numpy as jnp
from jax.experimental import pallas as pl
from jax.experimental.pallas import tpu as pltpu

# ----------------------------- configuration -------------------------------
B, T, N = 2, 8, 8            # batch, input_window, num_nodes
INPUT_DIM, OUTPUT_DIM = 3, 1
D_MODEL = 32
CHEB_K = 2                    # args.max_diffusion_step
NUM_SUPPORTS = 2              # the (2*cheb_k+1) MLP width implies 2 supports


# ------------------------------ small helpers ------------------------------
def _gelu(x):
    # tanh-form GELU (== torch.nn.GELU(approximate='tanh')); the tanh runs on
    # the EUP slot so it overlaps with MXU/VPU work.  Differs from the exact
    # erf-form nn.GELU() by <~1e-3 absolute.
    c = 0.7978845608028654  # sqrt(2/pi)
    return 0.5 * x * (1.0 + jnp.tanh(c * (x + 0.044715 * x * x * x)))


# --------------------------- the fused forward kernel -----------------------
def _fused_forward_kernel(emb_ref, kprop_ref, kshift_ref,
                          total_w_ref, total_b_ref,
                          agcn_w_ref, agcn_b_ref,
                          single_w_ref, single_b_ref,
                          loadexp_w_ref, loadexp_b_ref,
                          thermexp_w_ref, thermexp_b_ref,
                          gas_w_ref, gas_b_ref,
                          r1_w_ref, r1_b_ref, r2_w_ref, r2_b_ref,
                          cp1_w_ref, cp1_b_ref, cp2_wt_ref, cp2_b_ref,
                          o_ref):
    f32 = jnp.float32
    M = emb_ref.shape[0]                       # flattened (node, batch, time) rows
    n_mats = kprop_ref.shape[0] // M           # non-identity Chebyshev matrices

    emb = emb_ref[...]                         # (M, input_dim)
    kprop = kprop_ref[...]                     # (n_mats*M, M)  graph operator
    kshift = kshift_ref[...]                   # (2*M, M)       [t-1 ; t+1] shifts

    def mm(a, b):
        return jnp.dot(a, b, preferred_element_type=f32)

    def agcn(x, w_ref, b_ref):
        # x: (M, d).  One stacked matmul propagates x through every Chebyshev
        # matrix at once; the identity terms are already folded into the first
        # d rows of the concatenated MLP weight.
        props = mm(kprop, x)                                        # (n_mats*M, d)
        xg = jnp.concatenate(
            [x] + [props[m * M:(m + 1) * M] for m in range(n_mats)],
            axis=-1)                                                # (M, (1+n_mats)*d)
        return mm(xg, w_ref[...]) + b_ref[...]                      # (M, d)

    # ---- shared branch: total Linear + AGCN ----
    cur = mm(emb, total_w_ref[...]) + total_b_ref[...]              # (M, d)
    shared = agcn(cur, agcn_w_ref, agcn_b_ref)                      # (M, d)

    # ---- per-energy single-channel embeddings (the 3 Linear(1,d) merged) ----
    sw = single_w_ref[...]                                          # (3, d)
    sb = single_b_ref[...]                                          # (3, d)
    load_emb = emb[:, 0:1] * sw[0:1, :] + sb[0:1, :]
    gas_emb = emb[:, 1:2] * sw[1:2, :] + sb[1:2, :]
    thermal_emb = emb[:, 2:3] * sw[2:3, :] + sb[2:3, :]

    # ---- experts (stand-ins; see TODO at init_params) ----
    load_out = agcn(load_emb, loadexp_w_ref, loadexp_b_ref)
    thermal_out = agcn(thermal_emb, thermexp_w_ref, thermexp_b_ref)
    gas_out = mm(gas_emb, gas_w_ref[...]) + gas_b_ref[...]

    # ---- router: Conv2d(d,32,(1,3),pad=(0,1)) == one K=3d matmul over taps ----
    shifts = mm(kshift, shared)                                     # (2M, d)
    cat3 = jnp.concatenate([shifts[0:M], shared, shifts[M:2 * M]], axis=-1)  # (M,3d)
    h = _gelu(mm(cat3, r1_w_ref[...]) + r1_b_ref[...])              # (M, 32)
    logits = mm(h, r2_w_ref[...]) + r2_b_ref[...]                   # (M, 3)
    mx = jnp.max(logits, axis=-1, keepdims=True)
    e = jnp.exp(logits - mx)
    r = e / jnp.sum(e, axis=-1, keepdims=True)                      # softmax over experts

    # ---- MoE combine + chan_pred head ----
    fused = (r[:, 0:1] * load_out + r[:, 1:2] * gas_out + r[:, 2:3] * thermal_out)
    h2 = _gelu(mm(fused, cp1_w_ref[...]) + cp1_b_ref[...])          # (M, d)
    # Lane-dense output (output_dim, M): contract the feature axis of both
    # operands (the canonical "A @ B^T" dot_general, as in attention q@k^T).
    out = jax.lax.dot_general(cp2_wt_ref[...], h2,
                              dimension_numbers=(((1,), (1,)), ((), ())),
                              preferred_element_type=f32)           # (output_dim, M)
    o_ref[...] = out + cp2_b_ref[...]


# ------------------------------- parameters --------------------------------
def init_params(key):
    ks = iter(jax.random.split(key, 32))

    def w(shape, scale=0.1):
        return scale * jax.random.normal(next(ks), shape, jnp.float32)

    kc = (2 * CHEB_K + 1) * D_MODEL
    return dict(
        # TODO(synk): DataEmbedding_SE definition not provided; stand-in params.
        se_scale=1.0 + 0.1 * jax.random.normal(next(ks), (INPUT_DIM,), jnp.float32),
        se_pos=w((T,)),
        total_w=w((INPUT_DIM, D_MODEL)), total_b=w((D_MODEL,)),
        agcn=dict(w=w((kc, D_MODEL)), b=w((D_MODEL,))),
        sl_w=w((1, D_MODEL)), sl_b=w((D_MODEL,)),
        sg_w=w((1, D_MODEL)), sg_b=w((D_MODEL,)),
        st_w=w((1, D_MODEL)), st_b=w((D_MODEL,)),
        # TODO(synk): LoadExp / ThermalExp / GasExp definitions not provided;
        # graph experts are stood in by AGCN blocks, the gas expert by a Linear.
        loadexp=dict(w=w((kc, D_MODEL)), b=w((D_MODEL,))),
        thermalexp=dict(w=w((kc, D_MODEL)), b=w((D_MODEL,))),
        gasexp_w=w((D_MODEL, D_MODEL)), gasexp_b=w((D_MODEL,)),
        # router: Conv2d(d,32,(1,3)) taps stored as (3, d, 32), then Conv2d(32,3,1)
        r1_w=w((3, D_MODEL, 32)), r1_b=w((32,)),
        r2_w=w((32, INPUT_DIM)), r2_b=w((INPUT_DIM,)),
        # chan_pred
        cp1_w=w((D_MODEL, D_MODEL)), cp1_b=w((D_MODEL,)),
        cp2_w=w((D_MODEL, OUTPUT_DIM)), cp2_b=w((OUTPUT_DIM,)),
        # NOTE: self.layer_norm and AGCN dropout are defined but unused in forward.
    )


# ------------------------------ full forward -------------------------------
def gct_block_enc_forward(x, supports, p):
    assert x.shape[2] == N and x.shape[3] == INPUT_DIM
    Bb, Tt = x.shape[0], x.shape[1]
    f32 = jnp.float32
    d = D_MODEL
    M = N * Bb * Tt
    BT = Bb * Tt

    # --- data embedding (stand-in) -> (B, input_dim, N, T) ---
    # TODO(synk): DataEmbedding_SE not provided; stand-in = permute + per-channel
    # scale + temporal positional embedding (keeps the expected shape/dataflow).
    embed = (x.transpose(0, 3, 2, 1) * p["se_scale"][None, :, None, None]
             + p["se_pos"][None, None, None, :])
    # rows ordered (node, batch, time), channels last
    emb_nbt = embed.transpose(2, 0, 3, 1).reshape(M, INPUT_DIM).astype(f32)

    # --- graph operator: non-identity Chebyshev matrices lifted to row space ---
    eye_bt = jnp.eye(BT, dtype=f32)
    kron_blocks = []
    for s in supports:
        s = s.astype(f32)
        mats = [jnp.eye(N, dtype=f32), s]               # T0=I, T1=S (as in reference)
        for _ in range(2, CHEB_K):
            mats.append(2.0 * s @ mats[-1] - mats[-2])  # Tk = 2*S@Tk-1 - Tk-2
        for m in mats[1:]:                              # drop T0=I (folded into weights)
            kron_blocks.append(jnp.kron(m.T, eye_bt))   # einsum('bntc,nm->bmtc') lifted
    kprop = jnp.concatenate(kron_blocks, axis=0)        # (n_mats*M, M)

    # --- time-shift operators for the router's (1,3) conv taps (zero-padded) ---
    eye_nb = jnp.eye(N * Bb, dtype=f32)
    lp = jnp.eye(Tt, k=-1, dtype=f32)                   # row t reads t-1
    ln = jnp.eye(Tt, k=+1, dtype=f32)                   # row t reads t+1
    kshift = jnp.concatenate([jnp.kron(eye_nb, lp), jnp.kron(eye_nb, ln)], axis=0)

    # --- fold AGCN MLP weights: identity-propagation slices collapse onto x ---
    def fold_agcn_w(wm):  # wm: ((2*cheb_k+1)*d, d) in the reference x_g order
        wx = wm[0:d]
        slabs = []
        for si in range(len(supports)):
            base = (1 + si * CHEB_K) * d
            wx = wx + wm[base:base + d]                 # T0 = I slice
            for k in range(1, CHEB_K):
                slabs.append(wm[base + k * d: base + (k + 1) * d])
        return jnp.concatenate([wx] + slabs, axis=0)    # ((1+n_mats)*d, d)

    agcn_w = fold_agcn_w(p["agcn"]["w"])
    loadexp_w = fold_agcn_w(p["loadexp"]["w"])
    thermexp_w = fold_agcn_w(p["thermalexp"]["w"])

    single_w = jnp.concatenate([p["sl_w"], p["sg_w"], p["st_w"]], axis=0)   # (3, d)
    single_b = jnp.stack([p["sl_b"], p["sg_b"], p["st_b"]], axis=0)         # (3, d)

    args = (
        emb_nbt, kprop, kshift,
        p["total_w"], p["total_b"].reshape(1, d),
        agcn_w, p["agcn"]["b"].reshape(1, d),
        single_w, single_b,
        loadexp_w, p["loadexp"]["b"].reshape(1, d),
        thermexp_w, p["thermalexp"]["b"].reshape(1, d),
        p["gasexp_w"], p["gasexp_b"].reshape(1, d),
        p["r1_w"].reshape(3 * d, 32), p["r1_b"].reshape(1, 32),
        p["r2_w"], p["r2_b"].reshape(1, INPUT_DIM),
        p["cp1_w"], p["cp1_b"].reshape(1, d),
        p["cp2_w"].T, p["cp2_b"].reshape(OUTPUT_DIM, 1),
    )
    vmem = pl.BlockSpec(memory_space=pltpu.MemorySpace.VMEM)

    out_flat = pl.pallas_call(
        _fused_forward_kernel,
        out_shape=jax.ShapeDtypeStruct((OUTPUT_DIM, M), jnp.float32),
        in_specs=[vmem] * len(args),
        out_specs=vmem,
    )(*[a.astype(f32) for a in args])

    # (output_dim, n*b*t) lane-dense slab -> (B, T, N, output_dim)
    return out_flat.reshape(OUTPUT_DIM, N, Bb, Tt).transpose(2, 3, 1, 0)


# ----------------------------------- main -----------------------------------
if __name__ == "__main__":
    key = jax.random.PRNGKey(0)
    kx, ka, kp = jax.random.split(key, 3)

    x = jax.random.normal(kx, (B, T, N, INPUT_DIM), jnp.float32)
    adj = jax.nn.softmax(jax.random.normal(ka, (N, N), jnp.float32), axis=1)
    supports = [adj, adj.T]                 # two diffusion supports

    params = init_params(kp)
    fwd = jax.jit(gct_block_enc_forward)
    out = fwd(x, supports, params)
    out = jax.block_until_ready(out)
    assert out.shape == (B, T, N, OUTPUT_DIM)
    assert bool(jnp.all(jnp.isfinite(out)))
    print("KERNEL_OK")
</pallas_src>

<mosaic_0001>
module attributes {stable_mosaic.version = 11 : i64} {
  func.func @_fused_forward_kernel(%arg0: memref<128x3xf32, #tpu.memory_space<vmem>>, %arg1: memref<256x128xf32, #tpu.memory_space<vmem>>, %arg2: memref<256x128xf32, #tpu.memory_space<vmem>>, %arg3: memref<3x32xf32, #tpu.memory_space<vmem>>, %arg4: memref<1x32xf32, #tpu.memory_space<vmem>>, %arg5: memref<96x32xf32, #tpu.memory_space<vmem>>, %arg6: memref<1x32xf32, #tpu.memory_space<vmem>>, %arg7: memref<3x32xf32, #tpu.memory_space<vmem>>, %arg8: memref<3x32xf32, #tpu.memory_space<vmem>>, %arg9: memref<96x32xf32, #tpu.memory_space<vmem>>, %arg10: memref<1x32xf32, #tpu.memory_space<vmem>>, %arg11: memref<96x32xf32, #tpu.memory_space<vmem>>, %arg12: memref<1x32xf32, #tpu.memory_space<vmem>>, %arg13: memref<32x32xf32, #tpu.memory_space<vmem>>, %arg14: memref<1x32xf32, #tpu.memory_space<vmem>>, %arg15: memref<96x32xf32, #tpu.memory_space<vmem>>, %arg16: memref<1x32xf32, #tpu.memory_space<vmem>>, %arg17: memref<32x3xf32, #tpu.memory_space<vmem>>, %arg18: memref<1x3xf32, #tpu.memory_space<vmem>>, %arg19: memref<32x32xf32, #tpu.memory_space<vmem>>, %arg20: memref<1x32xf32, #tpu.memory_space<vmem>>, %arg21: memref<1x32xf32, #tpu.memory_space<vmem>>, %arg22: memref<1x1xf32, #tpu.memory_space<vmem>>, %arg23: memref<1x128xf32, #tpu.memory_space<vmem>>) attributes {dimension_semantics = [], scalar_prefetch = 0 : i64, scratch_operands = 0 : i64, tpu.core_type = #tpu.core_type<tc>} {
    %c0 = arith.constant 0 : index
    %c0_0 = arith.constant 0 : index
    %0 = vector.load %arg0[%c0, %c0_0] : memref<128x3xf32, #tpu.memory_space<vmem>>, vector<128x3xf32>
    %c0_1 = arith.constant 0 : index
    %c0_2 = arith.constant 0 : index
    %1 = vector.load %arg1[%c0_1, %c0_2] : memref<256x128xf32, #tpu.memory_space<vmem>>, vector<256x128xf32>
    %c0_3 = arith.constant 0 : index
    %c0_4 = arith.constant 0 : index
    %2 = vector.load %arg2[%c0_3, %c0_4] : memref<256x128xf32, #tpu.memory_space<vmem>>, vector<256x128xf32>
    %c0_5 = arith.constant 0 : index
    %c0_6 = arith.constant 0 : index
    %3 = vector.load %arg3[%c0_5, %c0_6] : memref<3x32xf32, #tpu.memory_space<vmem>>, vector<3x32xf32>
    %cst = arith.constant dense<0.000000e+00> : vector<128x32xf32>
    %4 = tpu.matmul %0, %3, %cst {dimension_numbers = #tpu.dot_dimension_numbers<[1], [0], [0], [1], [0, 0, 1, 1], [], []>} : vector<128x3xf32>, vector<3x32xf32>, vector<128x32xf32> -> vector<128x32xf32>
    %c0_7 = arith.constant 0 : index
    %c0_8 = arith.constant 0 : index
    %5 = vector.load %arg4[%c0_7, %c0_8] : memref<1x32xf32, #tpu.memory_space<vmem>>, vector<1x32xf32>
    %6 = vector.broadcast %5 : vector<1x32xf32> to vector<128x32xf32>
    %7 = arith.addf %4, %6 : vector<128x32xf32>
    %cst_9 = arith.constant dense<0.000000e+00> : vector<256x32xf32>
    %8 = tpu.matmul %1, %7, %cst_9 {dimension_numbers = #tpu.dot_dimension_numbers<[1], [0], [0], [1], [0, 0, 1, 1], [], []>} : vector<256x128xf32>, vector<128x32xf32>, vector<256x32xf32> -> vector<256x32xf32>
    %9 = vector.extract_strided_slice %8 {offsets = [0, 0], sizes = [128, 32], strides = [1, 1]} : vector<256x32xf32> to vector<128x32xf32>
    %10 = vector.extract_strided_slice %8 {offsets = [128, 0], sizes = [128, 32], strides = [1, 1]} : vector<256x32xf32> to vector<128x32xf32>
    %11 = tpu.concatenate %7, %9, %10 in 1 : vector<128x32xf32>, vector<128x32xf32>, vector<128x32xf32> -> vector<128x96xf32>
    %c0_10 = arith.constant 0 : index
    %c0_11 = arith.constant 0 : index
    %12 = vector.load %arg5[%c0_10, %c0_11] : memref<96x32xf32, #tpu.memory_space<vmem>>, vector<96x32xf32>
    %cst_12 = arith.constant dense<0.000000e+00> : vector<128x32xf32>
    %13 = tpu.matmul %11, %12, %cst_12 {dimension_numbers = #tpu.dot_dimension_numbers<[1], [0], [0], [1], [0, 0, 1, 1], [], []>} : vector<128x96xf32>, vector<96x32xf32>, vector<128x32xf32> -> vector<128x32xf32>
    %c0_13 = arith.constant 0 : index
    %c0_14 = arith.constant 0 : index
    %14 = vector.load %arg6[%c0_13, %c0_14] : memref<1x32xf32, #tpu.memory_space<vmem>>, vector<1x32xf32>
    %15 = vector.broadcast %14 : vector<1x32xf32> to vector<128x32xf32>
    %16 = arith.addf %13, %15 : vector<128x32xf32>
    %c0_15 = arith.constant 0 : index
    %c0_16 = arith.constant 0 : index
    %17 = vector.load %arg7[%c0_15, %c0_16] : memref<3x32xf32, #tpu.memory_space<vmem>>, vector<3x32xf32>
    %c0_17 = arith.constant 0 : index
    %c0_18 = arith.constant 0 : index
    %18 = vector.load %arg8[%c0_17, %c0_18] : memref<3x32xf32, #tpu.memory_space<vmem>>, vector<3x32xf32>
    %19 = vector.extract_strided_slice %0 {offsets = [0, 0], sizes = [128, 1], strides = [1, 1]} : vector<128x3xf32> to vector<128x1xf32>
    %20 = vector.extract_strided_slice %17 {offsets = [0, 0], sizes = [1, 32], strides = [1, 1]} : vector<3x32xf32> to vector<1x32xf32>
    %21 = vector.broadcast %19 : vector<128x1xf32> to vector<128x32xf32>
    %22 = vector.broadcast %20 : vector<1x32xf32> to vector<128x32xf32>
    %23 = arith.mulf %21, %22 : vector<128x32xf32>
    %24 = vector.extract_strided_slice %18 {offsets = [0, 0], sizes = [1, 32], strides = [1, 1]} : vector<3x32xf32> to vector<1x32xf32>
    %25 = vector.broadcast %24 : vector<1x32xf32> to vector<128x32xf32>
    %26 = arith.addf %23, %25 : vector<128x32xf32>
    %27 = vector.extract_strided_slice %0 {offsets = [0, 1], sizes = [128, 1], strides = [1, 1]} : vector<128x3xf32> to vector<128x1xf32>
    %28 = vector.extract_strided_slice %17 {offsets = [1, 0], sizes = [1, 32], strides = [1, 1]} : vector<3x32xf32> to vector<1x32xf32>
    %29 = vector.broadcast %27 : vector<128x1xf32> to vector<128x32xf32>
    %30 = vector.broadcast %28 : vector<1x32xf32> to vector<128x32xf32>
    %31 = arith.mulf %29, %30 : vector<128x32xf32>
    %32 = vector.extract_strided_slice %18 {offsets = [1, 0], sizes = [1, 32], strides = [1, 1]} : vector<3x32xf32> to vector<1x32xf32>
    %33 = vector.broadcast %32 : vector<1x32xf32> to vector<128x32xf32>
    %34 = arith.addf %31, %33 : vector<128x32xf32>
    %35 = vector.extract_strided_slice %0 {offsets = [0, 2], sizes = [128, 1], strides = [1, 1]} : vector<128x3xf32> to vector<128x1xf32>
    %36 = vector.extract_strided_slice %17 {offsets = [2, 0], sizes = [1, 32], strides = [1, 1]} : vector<3x32xf32> to vector<1x32xf32>
    %37 = vector.broadcast %35 : vector<128x1xf32> to vector<128x32xf32>
    %38 = vector.broadcast %36 : vector<1x32xf32> to vector<128x32xf32>
    %39 = arith.mulf %37, %38 : vector<128x32xf32>
    %40 = vector.extract_strided_slice %18 {offsets = [2, 0], sizes = [1, 32], strides = [1, 1]} : vector<3x32xf32> to vector<1x32xf32>
    %41 = vector.broadcast %40 : vector<1x32xf32> to vector<128x32xf32>
    %42 = arith.addf %39, %41 : vector<128x32xf32>
    %cst_19 = arith.constant dense<0.000000e+00> : vector<256x32xf32>
    %43 = tpu.matmul %1, %26, %cst_19 {dimension_numbers = #tpu.dot_dimension_numbers<[1], [0], [0], [1], [0, 0, 1, 1], [], []>} : vector<256x128xf32>, vector<128x32xf32>, vector<256x32xf32> -> vector<256x32xf32>
    %44 = vector.extract_strided_slice %43 {offsets = [0, 0], sizes = [128, 32], strides = [1, 1]} : vector<256x32xf32> to vector<128x32xf32>
    %45 = vector.extract_strided_slice %43 {offsets = [128, 0], sizes = [128, 32], strides = [1, 1]} : vector<256x32xf32> to vector<128x32xf32>
    %46 = tpu.concatenate %26, %44, %45 in 1 : vector<128x32xf32>, vector<128x32xf32>, vector<128x32xf32> -> vector<128x96xf32>
    %c0_20 = arith.constant 0 : index
    %c0_21 = arith.constant 0 : index
    %47 = vector.load %arg9[%c0_20, %c0_21] : memref<96x32xf32, #tpu.memory_space<vmem>>, vector<96x32xf32>
    %cst_22 = arith.constant dense<0.000000e+00> : vector<128x32xf32>
    %48 = tpu.matmul %46, %47, %cst_22 {dimension_numbers = #tpu.dot_dimension_numbers<[1], [0], [0], [1], [0, 0, 1, 1], [], []>} : vector<128x96xf32>, vector<96x32xf32>, vector<128x32xf32> -> vector<128x32xf32>
    %c0_23 = arith.constant 0 : index
    %c0_24 = arith.constant 0 : index
    %49 = vector.load %arg10[%c0_23, %c0_24] : memref<1x32xf32, #tpu.memory_space<vmem>>, vector<1x32xf32>
    %50 = vector.broadcast %49 : vector<1x32xf32> to vector<128x32xf32>
    %51 = arith.addf %48, %50 : vector<128x32xf32>
    %cst_25 = arith.constant dense<0.000000e+00> : vector<256x32xf32>
    %52 = tpu.matmul %1, %42, %cst_25 {dimension_numbers = #tpu.dot_dimension_numbers<[1], [0], [0], [1], [0, 0, 1, 1], [], []>} : vector<256x128xf32>, vector<128x32xf32>, vector<256x32xf32> -> vector<256x32xf32>
    %53 = vector.extract_strided_slice %52 {offsets = [0, 0], sizes = [128, 32], strides = [1, 1]} : vector<256x32xf32> to vector<128x32xf32>
    %54 = vector.extract_strided_slice %52 {offsets = [128, 0], sizes = [128, 32], strides = [1, 1]} : vector<256x32xf32> to vector<128x32xf32>
    %55 = tpu.concatenate %42, %53, %54 in 1 : vector<128x32xf32>, vector<128x32xf32>, vector<128x32xf32> -> vector<128x96xf32>
    %c0_26 = arith.constant 0 : index
    %c0_27 = arith.constant 0 : index
    %56 = vector.load %arg11[%c0_26, %c0_27] : memref<96x32xf32, #tpu.memory_space<vmem>>, vector<96x32xf32>
    %cst_28 = arith.constant dense<0.000000e+00> : vector<128x32xf32>
    %57 = tpu.matmul %55, %56, %cst_28 {dimension_numbers = #tpu.dot_dimension_numbers<[1], [0], [0], [1], [0, 0, 1, 1], [], []>} : vector<128x96xf32>, vector<96x32xf32>, vector<128x32xf32> -> vector<128x32xf32>
    %c0_29 = arith.constant 0 : index
    %c0_30 = arith.constant 0 : index
    %58 = vector.load %arg12[%c0_29, %c0_30] : memref<1x32xf32, #tpu.memory_space<vmem>>, vector<1x32xf32>
    %59 = vector.broadcast %58 : vector<1x32xf32> to vector<128x32xf32>
    %60 = arith.addf %57, %59 : vector<128x32xf32>
    %c0_31 = arith.constant 0 : index
    %c0_32 = arith.constant 0 : index
    %61 = vector.load %arg13[%c0_31, %c0_32] : memref<32x32xf32, #tpu.memory_space<vmem>>, vector<32x32xf32>
    %cst_33 = arith.constant dense<0.000000e+00> : vector<128x32xf32>
    %62 = tpu.matmul %34, %61, %cst_33 {dimension_numbers = #tpu.dot_dimension_numbers<[1], [0], [0], [1], [0, 0, 1, 1], [], []>} : vector<128x32xf32>, vector<32x32xf32>, vector<128x32xf32> -> vector<128x32xf32>
    %c0_34 = arith.constant 0 : index
    %c0_35 = arith.constant 0 : index
    %63 = vector.load %arg14[%c0_34, %c0_35] : memref<1x32xf32, #tpu.memory_space<vmem>>, vector<1x32xf32>
    %64 = vector.broadcast %63 : vector<1x32xf32> to vector<128x32xf32>
    %65 = arith.addf %62, %64 : vector<128x32xf32>
    %cst_36 = arith.constant dense<0.000000e+00> : vector<256x32xf32>
    %66 = tpu.matmul %2, %16, %cst_36 {dimension_numbers = #tpu.dot_dimension_numbers<[1], [0], [0], [1], [0, 0, 1, 1], [], []>} : vector<256x128xf32>, vector<128x32xf32>, vector<256x32xf32> -> vector<256x32xf32>
    %67 = vector.extract_strided_slice %66 {offsets = [0, 0], sizes = [128, 32], strides = [1, 1]} : vector<256x32xf32> to vector<128x32xf32>
    %68 = vector.extract_strided_slice %66 {offsets = [128, 0], sizes = [128, 32], strides = [1, 1]} : vector<256x32xf32> to vector<128x32xf32>
    %69 = tpu.concatenate %67, %16, %68 in 1 : vector<128x32xf32>, vector<128x32xf32>, vector<128x32xf32> -> vector<128x96xf32>
    %c0_37 = arith.constant 0 : index
    %c0_38 = arith.constant 0 : index
    %70 = vector.load %arg15[%c0_37, %c0_38] : memref<96x32xf32, #tpu.memory_space<vmem>>, vector<96x32xf32>
    %cst_39 = arith.constant dense<0.000000e+00> : vector<128x32xf32>
    %71 = tpu.matmul %69, %70, %cst_39 {dimension_numbers = #tpu.dot_dimension_numbers<[1], [0], [0], [1], [0, 0, 1, 1], [], []>} : vector<128x96xf32>, vector<96x32xf32>, vector<128x32xf32> -> vector<128x32xf32>
    %c0_40 = arith.constant 0 : index
    %c0_41 = arith.constant 0 : index
    %72 = vector.load %arg16[%c0_40, %c0_41] : memref<1x32xf32, #tpu.memory_space<vmem>>, vector<1x32xf32>
    %73 = vector.broadcast %72 : vector<1x32xf32> to vector<128x32xf32>
    %74 = arith.addf %71, %73 : vector<128x32xf32>
    %cst_42 = arith.constant 5.000000e-01 : f32
    %75 = vector.broadcast %cst_42 : f32 to vector<128x32xf32>
    %76 = arith.mulf %75, %74 : vector<128x32xf32>
    %cst_43 = arith.constant 4.471500e-02 : f32
    %77 = vector.broadcast %cst_43 : f32 to vector<128x32xf32>
    %78 = arith.mulf %77, %74 : vector<128x32xf32>
    %79 = arith.mulf %78, %74 : vector<128x32xf32>
    %80 = arith.mulf %79, %74 : vector<128x32xf32>
    %81 = arith.addf %74, %80 : vector<128x32xf32>
    %cst_44 = arith.constant 0.797884583 : f32
    %82 = vector.broadcast %cst_44 : f32 to vector<128x32xf32>
    %83 = arith.mulf %82, %81 : vector<128x32xf32>
    %84 = math.tanh %83 : vector<128x32xf32>
    %cst_45 = arith.constant 1.000000e+00 : f32
    %85 = vector.broadcast %cst_45 : f32 to vector<128x32xf32>
    %86 = arith.addf %85, %84 : vector<128x32xf32>
    %87 = arith.mulf %76, %86 : vector<128x32xf32>
    %c0_46 = arith.constant 0 : index
    %c0_47 = arith.constant 0 : index
    %88 = vector.load %arg17[%c0_46, %c0_47] : memref<32x3xf32, #tpu.memory_space<vmem>>, vector<32x3xf32>
    %cst_48 = arith.constant dense<0.000000e+00> : vector<128x3xf32>
    %89 = tpu.matmul %87, %88, %cst_48 {dimension_numbers = #tpu.dot_dimension_numbers<[1], [0], [0], [1], [0, 0, 1, 1], [], []>} : vector<128x32xf32>, vector<32x3xf32>, vector<128x3xf32> -> vector<128x3xf32>
    %c0_49 = arith.constant 0 : index
    %c0_50 = arith.constant 0 : index
    %90 = vector.load %arg18[%c0_49, %c0_50] : memref<1x3xf32, #tpu.memory_space<vmem>>, vector<1x3xf32>
    %91 = vector.broadcast %90 : vector<1x3xf32> to vector<128x3xf32>
    %92 = arith.addf %89, %91 : vector<128x3xf32>
    %cst_51 = arith.constant dense<0xFF800000> : vector<128xf32>
    %93 = vector.multi_reduction <maximumf>, %92, %cst_51 [1] : vector<128x3xf32> to vector<128xf32>
    %94 = vector.shape_cast %93 : vector<128xf32> to vector<128x1xf32>
    %95 = vector.broadcast %94 : vector<128x1xf32> to vector<128x3xf32>
    %96 = arith.subf %92, %95 : vector<128x3xf32>
    %97 = math.exp %96 : vector<128x3xf32>
    %cst_52 = arith.constant dense<0.000000e+00> : vector<128xf32>
    %98 = vector.multi_reduction <add>, %97, %cst_52 [1] : vector<128x3xf32> to vector<128xf32>
    %99 = vector.shape_cast %98 : vector<128xf32> to vector<128x1xf32>
    %100 = vector.broadcast %99 : vector<128x1xf32> to vector<128x3xf32>
    %101 = arith.divf %97, %100 : vector<128x3xf32>
    %102 = vector.extract_strided_slice %101 {offsets = [0, 0], sizes = [128, 1], strides = [1, 1]} : vector<128x3xf32> to vector<128x1xf32>
    %103 = vector.broadcast %102 : vector<128x1xf32> to vector<128x32xf32>
    %104 = arith.mulf %103, %51 : vector<128x32xf32>
    %105 = vector.extract_strided_slice %101 {offsets = [0, 1], sizes = [128, 1], strides = [1, 1]} : vector<128x3xf32> to vector<128x1xf32>
    %106 = vector.broadcast %105 : vector<128x1xf32> to vector<128x32xf32>
    %107 = arith.mulf %106, %65 : vector<128x32xf32>
    %108 = arith.addf %104, %107 : vector<128x32xf32>
    %109 = vector.extract_strided_slice %101 {offsets = [0, 2], sizes = [128, 1], strides = [1, 1]} : vector<128x3xf32> to vector<128x1xf32>
    %110 = vector.broadcast %109 : vector<128x1xf32> to vector<128x32xf32>
    %111 = arith.mulf %110, %60 : vector<128x32xf32>
    %112 = arith.addf %108, %111 : vector<128x32xf32>
    %c0_53 = arith.constant 0 : index
    %c0_54 = arith.constant 0 : index
    %113 = vector.load %arg19[%c0_53, %c0_54] : memref<32x32xf32, #tpu.memory_space<vmem>>, vector<32x32xf32>
    %cst_55 = arith.constant dense<0.000000e+00> : vector<128x32xf32>
    %114 = tpu.matmul %112, %113, %cst_55 {dimension_numbers = #tpu.dot_dimension_numbers<[1], [0], [0], [1], [0, 0, 1, 1], [], []>} : vector<128x32xf32>, vector<32x32xf32>, vector<128x32xf32> -> vector<128x32xf32>
    %c0_56 = arith.constant 0 : index
    %c0_57 = arith.constant 0 : index
    %115 = vector.load %arg20[%c0_56, %c0_57] : memref<1x32xf32, #tpu.memory_space<vmem>>, vector<1x32xf32>
    %116 = vector.broadcast %115 : vector<1x32xf32> to vector<128x32xf32>
    %117 = arith.addf %114, %116 : vector<128x32xf32>
    %cst_58 = arith.constant 5.000000e-01 : f32
    %118 = vector.broadcast %cst_58 : f32 to vector<128x32xf32>
    %119 = arith.mulf %118, %117 : vector<128x32xf32>
    %cst_59 = arith.constant 4.471500e-02 : f32
    %120 = vector.broadcast %cst_59 : f32 to vector<128x32xf32>
    %121 = arith.mulf %120, %117 : vector<128x32xf32>
    %122 = arith.mulf %121, %117 : vector<128x32xf32>
    %123 = arith.mulf %122, %117 : vector<128x32xf32>
    %124 = arith.addf %117, %123 : vector<128x32xf32>
    %cst_60 = arith.constant 0.797884583 : f32
    %125 = vector.broadcast %cst_60 : f32 to vector<128x32xf32>
    %126 = arith.mulf %125, %124 : vector<128x32xf32>
    %127 = math.tanh %126 : vector<128x32xf32>
    %cst_61 = arith.constant 1.000000e+00 : f32
    %128 = vector.broadcast %cst_61 : f32 to vector<128x32xf32>
    %129 = arith.addf %128, %127 : vector<128x32xf32>
    %130 = arith.mulf %119, %129 : vector<128x32xf32>
    %c0_62 = arith.constant 0 : index
    %c0_63 = arith.constant 0 : index
    %131 = vector.load %arg21[%c0_62, %c0_63] : memref<1x32xf32, #tpu.memory_space<vmem>>, vector<1x32xf32>
    %cst_64 = arith.constant dense<0.000000e+00> : vector<1x128xf32>
    %132 = tpu.matmul %131, %130, %cst_64 {dimension_numbers = #tpu.dot_dimension_numbers<[1], [1], [0], [0], [0, 0, 1, 0], [], []>} : vector<1x32xf32>, vector<128x32xf32>, vector<1x128xf32> -> vector<1x128xf32>
    %c0_65 = arith.constant 0 : index
    %c0_66 = arith.constant 0 : index
    %133 = vector.load %arg22[%c0_65, %c0_66] : memref<1x1xf32, #tpu.memory_space<vmem>>, vector<1x1xf32>
    %134 = vector.broadcast %133 : vector<1x1xf32> to vector<1x128xf32>
    %135 = arith.addf %132, %134 : vector<1x128xf32>
    %c0_67 = arith.constant 0 : index
    %c0_68 = arith.constant 0 : index
    %136 = vector.load %arg23[%c0_67, %c0_68] : memref<1x128xf32, #tpu.memory_space<vmem>>, vector<1x128xf32>
    tpu.vector_store %arg23[%c0_67, %c0_68], %135 {strides = array<i32>} : memref<1x128xf32, #tpu.memory_space<vmem>>, vector<1x128xf32>,
    return
  }
}

</mosaic_0001>

<bundles_post_ra>
// kernel: gct_block_enc_forward.1
= control target key start
LH: loop header
LB: loop body
LE: loop exit
PB: predicated region body
PF: predicated region fallthrough
CT: control target
= control target key end

     0   :  { %vm213_vm0 = vcmask 1042432   ;;  %vm164_vm1 = vcmask 23552   ;;  %v8788_v18 = vmov 0   ;;  %vm715_vm2 = vcmask 261120   ;;  %s8758_s3 = inlined_call_operand.vmem [shape: f32[3,32], index: 3, kind: input, shape index: {}]   ;;  %s8759_s0 = inlined_call_operand.vmem [shape: f32[128,3], index: 0, kind: input, shape index: {}]   ;;  %s8760_s1 = inlined_call_operand.vmem [shape: f32[256,128], index: 1, kind: input, shape index: {}]   ;;  %s8761_s4 = inlined_call_operand.vmem [shape: f32[1,32], index: 4, kind: input, shape index: {}]   ;;  %s8762_s7 = inlined_call_operand.vmem [shape: f32[3,32], index: 7, kind: input, shape index: {}]   ;;  %s8763_s8 = inlined_call_operand.vmem [shape: f32[3,32], index: 8, kind: input, shape index: {}]   ;;  %s8764_s5 = inlined_call_operand.vmem [shape: f32[96,32], index: 5, kind: input, shape index: {}]   ;;  %s8765_s9 = inlined_call_operand.vmem [shape: f32[96,32], index: 9, kind: input, shape index: {}]   ;;  %s8766_s6 = inlined_call_operand.vmem [shape: f32[1,32], index: 6, kind: input, shape index: {}]   ;;  %s8767_s2 = inlined_call_operand.vmem [shape: f32[256,128], index: 2, kind: input, shape index: {}]   ;;  %s8768_s11 = inlined_call_operand.vmem [shape: f32[96,32], index: 11, kind: input, shape index: {}]   ;;  %s8769_s10 = inlined_call_operand.vmem [shape: f32[1,32], index: 10, kind: input, shape index: {}]   ;;  %s8770_s13 = inlined_call_operand.vmem [shape: f32[32,32], index: 13, kind: input, shape index: {}]   ;;  %s8771_s15 = inlined_call_operand.vmem [shape: f32[96,32], index: 15, kind: input, shape index: {}]   ;;  %s8772_s17 = inlined_call_operand.vmem [shape: f32[32,3], index: 17, kind: input, shape index: {}]   ;;  %s8773_s12 = inlined_call_operand.vmem [shape: f32[1,32], index: 12, kind: input, shape index: {}]   ;;  %s8774_s14 = inlined_call_operand.vmem [shape: f32[1,32], index: 14, kind: input, shape index: {}]   ;;  %s8775_s16 = inlined_call_operand.vmem [shape: f32[1,32], index: 16, kind: input, shape index: {}]   ;;  %s8776_s18 = inlined_call_operand.vmem [shape: f32[1,3], index: 18, kind: input, shape index: {}]   ;;  %s8777_s19 = inlined_call_operand.vmem [shape: f32[32,32], index: 19, kind: input, shape index: {}]   ;;  %s8778_s20 = inlined_call_operand.vmem [shape: f32[1,32], index: 20, kind: input, shape index: {}]   ;;  %s8779_s22 = inlined_call_operand.<no memory space> [shape: f32[1,1], index: 22, kind: input, shape index: {}]   ;;  %s8780_s21 = inlined_call_operand.vmem [shape: f32[1,32], index: 21, kind: input, shape index: {}]   ;;  %s8781_s23 = inlined_call_operand.vmem [shape: f32[1,128], index: 23, kind: output, shape index: {}]  }
   0x1   :  { %8829 = sst [smem:[#allocation35_spill]] %s8758_s3  ;;  %6078 = vset.pattern.permute.xlu1 %v8788_v18  ;;  %6077 = vset.pattern.permute.xlu0 %v8788_v18  ;;  %vm732_vm3 = vcmask 523264   ;;  %vm768_vm4 = vcmask 785408   ;;  %vm8708_vm5 = vmpackc.low %vm715_vm2, %vm715_vm2  ;;  %vm6312_vm6 = vmmov 0  }
   0x2   :  { %8830 = sst [smem:[#allocation36_spill]] %s8759_s0  ;;  %s8837_s24 = sld [smem:[#allocation35_spill]] }
   0x3   :  { %8831 = sst [smem:[#allocation37_spill]] %s8760_s1  ;;  %s8838_s0 = sld [smem:[#allocation36_spill]] }
   0x4   :  { %8832 = sst [smem:[#allocation38_spill]] %s8761_s4 }
   0x5   :  { %8833 = sst [smem:[#allocation39_spill]] %s8762_s7  ;;  %s8840_s4 = sld [smem:[#allocation38_spill]] }
   0x6   :  { %8834 = sst [smem:[#allocation40_spill]] %s8763_s8 }
   0x7   :  { %8835 = sst [smem:[#allocation41_spill]] %s8764_s5  ;;  %s8872_s30 = sld [smem:[#allocation40_spill]] }
   0x8   :  { %8836 = sst [smem:[#allocation42_spill]] %s8765_s9  ;;  %v156_v0 = vld [vmem:[%s8837_s24] sm:$0x7]  ;;  %s8839_s9 = sld [smem:[#allocation37_spill]] }
   0x9   :  { %v6440_v1 = vld [vmem:[%s8838_s0] sm:$0xff]  ;;  %v6445_v2 = vld [vmem:[%s8838_s0 + $0x8] sm:$0xff]  ;;  %5120 = vmatprep.subr.msk.mxu1 %vm213_vm0, %v156_v0  ;;  %v6452_v3 = vld [vmem:[%s8838_s0 + $0x10] sm:$0xff]  ;;  %s8875_s8 = sld [smem:[#allocation41_spill]]  ;;  %s6308_s5 = smov 64  }
   0xa   :  { %5122 = vmatprep.mubr.msk.f32.mxu1 %vm164_vm1, %v6440_v1  ;;  %5121 = vmatpush3.msk.msra.mxu1 %vm213_vm0, %v156_v0  ;;  %v6461_v4 = vld [vmem:[%s8838_s0 + $0x18] sm:$0xff]  ;;  %v6466_v5 = vld [vmem:[%s8838_s0 + $0x20] sm:$0xff]  ;;  %v6475_v6 = vld [vmem:[%s8838_s0 + $0x28] sm:$0xff]  ;;  %s8907_s29 = sld [smem:[#allocation42_spill]] }
   0xb   :  { %5123 = vmatmul.mubr.msk.f32.vlgmr.msra.gmra.mrb[0].mxu1 %vm164_vm1, %v6445_v2  ;;  %v6480_v7 = vld [vmem:[%s8838_s0 + $0x30] sm:$0xff]  ;;  %v6489_v8 = vld [vmem:[%s8838_s0 + $0x38] sm:$0xff]  ;;  %v6494_v9 = vld [vmem:[%s8838_s0 + $0x40] sm:$0xff]  ;;  %973 = vperm.xlu1 %6078, %v6452_v3  }
   0xc   :  { %5125 = vmatprep.mubr.msk.f32.mxu1 %vm164_vm1, %v6452_v3  ;;  %v6503_v10 = vld [vmem:[%s8838_s0 + $0x48] sm:$0xff]  ;;  %v6508_v11 = vld [vmem:[%s8838_s0 + $0x50] sm:$0xff]  ;;  %v6517_v12 = vld [vmem:[%s8838_s0 + $0x58] sm:$0xff]  ;;  %965 = vperm.xlu0 %6077, %v6440_v1  }
   0xd   :  { %v6522_v13 = vld [vmem:[%s8838_s0 + $0x60] sm:$0xff]  ;;  %v6531_v14 = vld [vmem:[%s8838_s0 + $0x68] sm:$0xff]  ;;  %v6536_v15 = vld [vmem:[%s8838_s0 + $0x70] sm:$0xff] }
   0xe   :  { %v6545_v16 = vld [vmem:[%s8838_s0 + $0x78] sm:$0xff]  ;;  %v6552_v17 = vld [vmem:[%s8839_s9] sm:$0xff]  ;;  %v6627_v60 = vld [vmem:[%s8839_s9 + $0x8] sm:$0xff] }
   0xf   :  { %5126 = vmatmul.mubr.msk.f32.gmra.mrb[2].mxu1 %vm164_vm1, %v6461_v4  ;;  %977 = vperm.xlu1 %6078, %v6461_v4   ;;  %v4568_v19 = vld [vmem:[%s8840_s4] ss:$0 sm:$0xff]  ;;  %v6632_v61 = vld [vmem:[%s8839_s9 + $0x10] sm:$0xff]  ;;  %v6639_v62 = vld [vmem:[%s8839_s9 + $0x18] sm:$0xff]  ;;  %s8870_s4 = sld [smem:[#allocation39_spill]] }
  0x10   :  { %5128 = vmatprep.mubr.msk.f32.mxu1 %vm164_vm1, %v6466_v5  ;;  %969 = vperm.xlu0 %6077, %v6445_v2   ;;  %v6644_v63 = vld [vmem:[%s8839_s9 + $0x20] sm:$0xff]  ;;  %v6651_v0 = vld [vmem:[%s8839_s9 + $0x28] sm:$0xff]  ;;  %v6807_v18 = vld [vmem:[%s8839_s9 + $0xf8] sm:$0xff] }
  0x11   :  { %8841 = vst [vmem:[#allocation3_spill] sm:$0xff] %v6644_v63  ;;  %8842 = vst [vmem:[#allocation4_spill] sm:$0xff] %v6651_v0 }
  0x12   :  { %8868 = vst [vmem:[#allocation30_spill] sm:$0xff] %v6807_v18 }
  0x13   :  { %5129 = vmatmul.mubr.msk.f32.gmra.mrb[4].mxu1 %vm164_vm1, %v6475_v6  ;;  %985 = vperm.xlu1 %6078, %v6475_v6  }
  0x14   :  { %5131 = vmatprep.mubr.msk.f32.mxu1 %vm164_vm1, %v6480_v7  ;;  %981 = vperm.xlu0 %6077, %v6466_v5  }
  0x17   :  { %5132 = vmatmul.mubr.msk.f32.gmra.mrb[6].mxu1 %vm164_vm1, %v6489_v8  ;;  %993 = vperm.xlu1 %6078, %v6489_v8  }
  0x18   :  { %5134 = vmatprep.mubr.msk.f32.mxu1 %vm164_vm1, %v6494_v9  ;;  %989 = vperm.xlu0 %6077, %v6480_v7  }
  0x1b   :  { %5135 = vmatmul.mubr.msk.f32.gmra.mrb[8].mxu1 %vm164_vm1, %v6503_v10  ;;  %1001 = vperm.xlu1 %6078, %v6503_v10  }
  0x1c   :  { %5137 = vmatprep.mubr.msk.f32.mxu1 %vm164_vm1, %v6508_v11  ;;  %997 = vperm.xlu0 %6077, %v6494_v9  }
  0x1f   :  { %5138 = vmatmul.mubr.msk.f32.gmra.mrb[10].mxu1 %vm164_vm1, %v6517_v12  ;;  %1009 = vperm.xlu1 %6078, %v6517_v12  }
  0x20   :  { %5140 = vmatprep.mubr.msk.f32.mxu1 %vm164_vm1, %v6522_v13  ;;  %1005 = vperm.xlu0 %6077, %v6508_v11  }
  0x23   :  { %5141 = vmatmul.mubr.msk.f32.gmra.mrb[12].mxu1 %vm164_vm1, %v6531_v14  ;;  %1017 = vperm.xlu1 %6078, %v6531_v14  }
  0x24   :  { %5143 = vmatprep.mubr.msk.f32.mxu1 %vm164_vm1, %v6536_v15  ;;  %1013 = vperm.xlu0 %6077, %v6522_v13  }
  0x27   :  { %5144 = vmatmul.mubr.msk.f32.gmra.mrb[14].mxu1 %vm164_vm1, %v6545_v16  ;;  %1025 = vperm.xlu1 %6078, %v6545_v16  }
  0x28   :  { %5178 = vmatprep.mubr.f32.mxu1 %v6552_v17  ;;  %1021 = vperm.xlu0 %6077, %v6536_v15  }
  0xde   :  { %v5124_v20 = vpop.f32.mrb[0].mxu1 }
  0xdf   :  { %v6576_v21 = vadd.f32 %v5124_v20, %v4568_v19  ;;  %v283_v22 = vpop.f32.mrb[1].mxu1  ;;  %v6663_v20 = vld [vmem:[%s8839_s9 + $0x38] sm:$0xff] }
  0xe0   :  { %v6578_v23 = vadd.f32 %v4568_v19, %v283_v22  ;;  %8844 = vst [vmem:[#allocation6_spill] sm:$0xff] %v6663_v20  ;;  %v6668_v22 = vld [vmem:[%s8839_s9 + $0x40] sm:$0xff] }
  0xe1   :  { %8845 = vst [vmem:[#allocation7_spill] sm:$0xff] %v6668_v22 }
  0xe2   :  { %v5789_v24 = vpack.c.bf16 %v6576_v21, %v6578_v23  ;;  %v5127_v25 = vpop.f32.mrb[2].mxu1 }
  0xe3   :  { %v6582_v26 = vadd.f32 %v5127_v25, %v4568_v19  ;;  %v293_v27 = vpop.f32.mrb[3].mxu1  ;;  %v6680_v25 = vld [vmem:[%s8839_s9 + $0x50] sm:$0xff] }
  0xe4   :  { %v6584_v28 = vadd.f32 %v4568_v19, %v293_v27  ;;  %5790 = vmatprep.subr.bf16.mxu1 %v5789_v24  ;;  %8847 = vst [vmem:[#allocation9_spill] sm:$0xff] %v6680_v25  ;;  %v6687_v27 = vld [vmem:[%s8839_s9 + $0x58] sm:$0xff] }
  0xe5   :  { %5792 = vmatpush3.bf16.msra.mxu1 %v5789_v24  ;;  %v6675_v24 = vld [vmem:[%s8839_s9 + $0x48] sm:$0xff]  ;;  %8848 = vst [vmem:[#allocation10_spill] sm:$0xff] %v6687_v27 }
  0xe6   :  { %v5793_v29 = vpack.c.bf16 %v6582_v26, %v6584_v28  ;;  %v5130_v30 = vpop.f32.mrb[4].mxu1  ;;  %8846 = vst [vmem:[#allocation8_spill] sm:$0xff] %v6675_v24 }
  0xe7   :  { %v6588_v31 = vadd.f32 %v5130_v30, %v4568_v19  ;;  %v303_v32 = vpop.f32.mrb[5].mxu1  ;;  %v6699_v30 = vld [vmem:[%s8839_s9 + $0x68] sm:$0xff] }
  0xe8   :  { %v6590_v33 = vadd.f32 %v4568_v19, %v303_v32  ;;  %5794 = vmatprep.subr.bf16.mxu1 %v5793_v29  ;;  %8850 = vst [vmem:[#allocation12_spill] sm:$0xff] %v6699_v30  ;;  %v6704_v32 = vld [vmem:[%s8839_s9 + $0x70] sm:$0xff] }
  0xe9   :  { %5796 = vmatpush3.bf16.msra.mxu1 %v5793_v29  ;;  %v6692_v29 = vld [vmem:[%s8839_s9 + $0x60] sm:$0xff]  ;;  %8851 = vst [vmem:[#allocation13_spill] sm:$0xff] %v6704_v32 }
  0xea   :  { %v5797_v34 = vpack.c.bf16 %v6588_v31, %v6590_v33  ;;  %v5133_v35 = vpop.f32.mrb[6].mxu1  ;;  %8849 = vst [vmem:[#allocation11_spill] sm:$0xff] %v6692_v29 }
  0xeb   :  { %v6594_v36 = vadd.f32 %v5133_v35, %v4568_v19  ;;  %v313_v37 = vpop.f32.mrb[7].mxu1  ;;  %v6716_v35 = vld [vmem:[%s8839_s9 + $0x80] sm:$0xff] }
  0xec   :  { %v6596_v38 = vadd.f32 %v4568_v19, %v313_v37  ;;  %5798 = vmatprep.subr.bf16.mxu1 %v5797_v34  ;;  %8853 = vst [vmem:[#allocation15_spill] sm:$0xff] %v6716_v35  ;;  %v6723_v37 = vld [vmem:[%s8839_s9 + $0x88] sm:$0xff] }
  0xed   :  { %5800 = vmatpush3.bf16.msra.mxu1 %v5797_v34  ;;  %v6711_v34 = vld [vmem:[%s8839_s9 + $0x78] sm:$0xff]  ;;  %8854 = vst [vmem:[#allocation16_spill] sm:$0xff] %v6723_v37 }
  0xee   :  { %v5801_v39 = vpack.c.bf16 %v6594_v36, %v6596_v38  ;;  %v5136_v40 = vpop.f32.mrb[8].mxu1  ;;  %8852 = vst [vmem:[#allocation14_spill] sm:$0xff] %v6711_v34 }
  0xef   :  { %v6600_v41 = vadd.f32 %v5136_v40, %v4568_v19  ;;  %v323_v42 = vpop.f32.mrb[9].mxu1  ;;  %v6735_v40 = vld [vmem:[%s8839_s9 + $0x98] sm:$0xff] }
  0xf0   :  { %v6602_v43 = vadd.f32 %v4568_v19, %v323_v42  ;;  %5802 = vmatprep.subr.bf16.mxu1 %v5801_v39  ;;  %8856 = vst [vmem:[#allocation18_spill] sm:$0xff] %v6735_v40  ;;  %v6740_v42 = vld [vmem:[%s8839_s9 + $0xa0] sm:$0xff] }
  0xf1   :  { %5804 = vmatpush3.bf16.msra.mxu1 %v5801_v39  ;;  %v6728_v39 = vld [vmem:[%s8839_s9 + $0x90] sm:$0xff]  ;;  %8857 = vst [vmem:[#allocation19_spill] sm:$0xff] %v6740_v42 }
  0xf2   :  { %v5805_v44 = vpack.c.bf16 %v6600_v41, %v6602_v43  ;;  %v5139_v45 = vpop.f32.mrb[10].mxu1  ;;  %8855 = vst [vmem:[#allocation17_spill] sm:$0xff] %v6728_v39 }
  0xf3   :  { %v6606_v46 = vadd.f32 %v5139_v45, %v4568_v19  ;;  %v333_v47 = vpop.f32.mrb[11].mxu1  ;;  %v6752_v45 = vld [vmem:[%s8839_s9 + $0xb0] sm:$0xff] }
  0xf4   :  { %v6608_v48 = vadd.f32 %v4568_v19, %v333_v47  ;;  %5806 = vmatprep.subr.bf16.mxu1 %v5805_v44  ;;  %8859 = vst [vmem:[#allocation21_spill] sm:$0xff] %v6752_v45  ;;  %v6759_v47 = vld [vmem:[%s8839_s9 + $0xb8] sm:$0xff] }
  0xf5   :  { %5808 = vmatpush3.bf16.msra.mxu1 %v5805_v44  ;;  %v6747_v44 = vld [vmem:[%s8839_s9 + $0xa8] sm:$0xff]  ;;  %8860 = vst [vmem:[#allocation22_spill] sm:$0xff] %v6759_v47 }
  0xf6   :  { %v5809_v49 = vpack.c.bf16 %v6606_v46, %v6608_v48  ;;  %v5142_v50 = vpop.f32.mrb[12].mxu1  ;;  %8858 = vst [vmem:[#allocation20_spill] sm:$0xff] %v6747_v44 }
  0xf7   :  { %v6612_v51 = vadd.f32 %v5142_v50, %v4568_v19  ;;  %v343_v52 = vpop.f32.mrb[13].mxu1  ;;  %v6771_v50 = vld [vmem:[%s8839_s9 + $0xc8] sm:$0xff] }
  0xf8   :  { %v6614_v53 = vadd.f32 %v4568_v19, %v343_v52  ;;  %5810 = vmatprep.subr.bf16.mxu1 %v5809_v49  ;;  %8862 = vst [vmem:[#allocation24_spill] sm:$0xff] %v6771_v50  ;;  %v6776_v52 = vld [vmem:[%s8839_s9 + $0xd0] sm:$0xff] }
  0xf9   :  { %5812 = vmatpush3.bf16.msra.mxu1 %v5809_v49  ;;  %v6764_v49 = vld [vmem:[%s8839_s9 + $0xc0] sm:$0xff]  ;;  %8863 = vst [vmem:[#allocation25_spill] sm:$0xff] %v6776_v52 }
  0xfa   :  { %v5813_v54 = vpack.c.bf16 %v6612_v51, %v6614_v53  ;;  %v5145_v55 = vpop.f32.mrb[14].mxu1  ;;  %8861 = vst [vmem:[#allocation23_spill] sm:$0xff] %v6764_v49 }
  0xfb   :  { %v6618_v56 = vadd.f32 %v5145_v55, %v4568_v19  ;;  %v353_v57 = vpop.f32.mrb[15].mxu1  ;;  %v6788_v55 = vld [vmem:[%s8839_s9 + $0xe0] sm:$0xff] }
  0xfc   :  { %v6620_v58 = vadd.f32 %v4568_v19, %v353_v57  ;;  %5814 = vmatprep.subr.bf16.mxu1 %v5813_v54  ;;  %v6656_v19 = vld [vmem:[%s8839_s9 + $0x30] sm:$0xff]  ;;  %8865 = vst [vmem:[#allocation27_spill] sm:$0xff] %v6788_v55  ;;  %v6795_v57 = vld [vmem:[%s8839_s9 + $0xe8] sm:$0xff] }
  0xfd   :  { %5816 = vmatpush3.bf16.msra.mxu1 %v5813_v54  ;;  %8843 = vst [vmem:[#allocation5_spill] sm:$0xff] %v6656_v19  ;;  %v6783_v54 = vld [vmem:[%s8839_s9 + $0xd8] sm:$0xff]  ;;  %8866 = vst [vmem:[#allocation28_spill] sm:$0xff] %v6795_v57 }
  0xfe   :  { %v5817_v59 = vpack.c.bf16 %v6618_v56, %v6620_v58  ;;  %8864 = vst [vmem:[#allocation26_spill] sm:$0xff] %v6783_v54 }
 0x100   :  { %5818 = vmatprep.subr.bf16.mxu1 %v5817_v59 }
 0x101   :  { %5820 = vmatpush3.bf16.msra.mxu1 %v5817_v59  ;;  %v6800_v59 = vld [vmem:[%s8839_s9 + $0xf0] sm:$0xff] }
 0x102   :  { %8867 = vst [vmem:[#allocation29_spill] sm:$0xff] %v6800_v59 }
 0x104   :  { %5179 = vmatmul.mubr.f32.vlgmr.msra.gmra.mrb[16].mxu1 %v6627_v60 }
 0x105   :  { %5181 = vmatprep.mubr.f32.mxu1 %v6632_v61 }
 0x108   :  { %5182 = vmatmul.mubr.f32.gmra.mrb[18].mxu1 %v6639_v62 }
 0x109   :  { %5184 = vmatprep.mubr.f32.mxu1 %v6644_v63 }
 0x10c   :  { %5185 = vmatmul.mubr.f32.gmra.mrb[20].mxu1 %v6651_v0 }
 0x10d   :  { %5187 = vmatprep.mubr.f32.mxu1 %v6656_v19 }
 0x110   :  { %5188 = vmatmul.mubr.f32.gmra.mrb[22].mxu1 %v6663_v20 }
 0x111   :  { %5190 = vmatprep.mubr.f32.mxu1 %v6668_v22 }
 0x114   :  { %5191 = vmatmul.mubr.f32.gmra.mrb[24].mxu1 %v6675_v24 }
 0x115   :  { %5193 = vmatprep.mubr.f32.mxu1 %v6680_v25  ;;  %v757_v25 = vld [vmem:[%s8875_s8 + $0x40] sm:$0xff] }
 0x118   :  { %5194 = vmatmul.mubr.f32.gmra.mrb[26].mxu1 %v6687_v27 }
 0x119   :  { %5196 = vmatprep.mubr.f32.mxu1 %v6692_v29 }
 0x11c   :  { %5197 = vmatmul.mubr.f32.gmra.mrb[28].mxu1 %v6699_v30 }
 0x11d   :  { %5199 = vmatprep.mubr.f32.mxu1 %v6704_v32 }
 0x120   :  { %5200 = vmatmul.mubr.f32.gmra.mrb[30].mxu1 %v6711_v34 }
 0x121   :  { %5202 = vmatprep.mubr.f32.mxu1 %v6716_v35 }
 0x124   :  { %5203 = vmatmul.mubr.f32.gmra.mrb[32].mxu1 %v6723_v37 }
 0x125   :  { %5205 = vmatprep.mubr.f32.mxu1 %v6728_v39 }
 0x128   :  { %5206 = vmatmul.mubr.f32.gmra.mrb[34].mxu1 %v6735_v40 }
 0x129   :  { %5208 = vmatprep.mubr.f32.mxu1 %v6740_v42  ;;  %v750_v42 = vld [vmem:[%s8875_s8 + $0x8] sm:$0xff] }
 0x12c   :  { %5209 = vmatmul.mubr.f32.gmra.mrb[36].mxu1 %v6747_v44  ;;  %v749_v44 = vld [vmem:[%s8875_s8] sm:$0xff] }
 0x12d   :  { %5211 = vmatprep.mubr.f32.mxu1 %v6752_v45  ;;  %v5821_v34 = vpack.c.bf16 %v750_v42, %v749_v44 }
 0x12f   :  { %5822 = vmatprep.subr.bf16.mxu0 %v5821_v34 }
 0x130   :  { %5212 = vmatmul.mubr.f32.gmra.mrb[38].mxu1 %v6759_v47  ;;  %5824 = vmatpush3.bf16.msra.mxu0 %v5821_v34 }
 0x131   :  { %5214 = vmatprep.mubr.f32.mxu1 %v6764_v49  ;;  %v6815_v49 = vld [vmem:[%s8870_s4] sm:$0x7] }
 0x132   :  { %8871 = vst [vmem:[#allocation32_spill] sm:$0xff] %v6815_v49 }
 0x134   :  { %5215 = vmatmul.mubr.f32.gmra.mrb[40].mxu1 %v6771_v50 }
 0x135   :  { %5217 = vmatprep.mubr.f32.mxu1 %v6776_v52  ;;  %v966_v52 = vpop.permute.xlu0 %965 }
 0x138   :  { %5218 = vmatmul.mubr.f32.gmra.mrb[42].mxu1 %v6783_v54  ;;  %v974_v54 = vpop.permute.xlu1 %973 }
 0x139   :  { %5220 = vmatprep.mubr.f32.mxu1 %v6788_v55  ;;  %v1028_v55 = vlaneseq }
 0x13b   :  { %v6810_v50 = vshrl.u32 %v1028_v55, 7 }
 0x13c   :  { %5221 = vmatmul.mubr.f32.gmra.mrb[44].mxu1 %v6795_v57  ;;  %v978_v47 = vpop.permute.xlu1 %977 }
 0x13d   :  { %5223 = vmatprep.mubr.f32.mxu1 %v6800_v59  ;;  %8869 = vst [vmem:[#allocation31_spill] sm:$0xff] %v6810_v50  ;;  %v6820_v59 = vld [vmem:[%s8872_s30] sm:$0x7]  ;;  %v6823_v57 = vsub.s32 0, %v6810_v50  ;;  %v751_v50 = vld [vmem:[%s8875_s8 + $0x10] sm:$0xff] }
 0x13e   :  { %8873 = vst [vmem:[#allocation33_spill] sm:$0xff] %v6820_v59 }
 0x13f   :  { %8874 = vst [vmem:[#allocation34_spill] sm:$0xff] %v6823_v57  ;;  %v6827_v45 = vrot.slane %v6815_v49, %v6823_v57  ;;  %v6831_v55 = vrot.slane %v6820_v59, %v6823_v57  ;;  %v752_v57 = vld [vmem:[%s8875_s8 + $0x18] sm:$0xff] }
 0x140   :  { %5224 = vmatmul.mubr.f32.gmra.mrb[46].mxu1 %v6807_v18  ;;  %v970_v18 = vpop.permute.xlu0 %969  ;;  %v986_v39 = vpop.permute.xlu1 %985  ;;  %v5825_v32 = vpack.c.bf16 %v752_v57, %v751_v50  ;;  %v755_v57 = vld [vmem:[%s8875_s8 + $0x30] sm:$0xff] }
 0x141   :  { %v1034_v40 = vmul.f32 %v6827_v45, %v974_v54  ;;  %v1035_v49 = vmul.f32 %v6827_v45, %v978_v47  ;;  %v1037_v59 = vmul.f32 %v6827_v45, %v986_v39  ;;  %v753_v47 = vld [vmem:[%s8875_s8 + $0x20] sm:$0xff]  ;;  %v754_v54 = vld [vmem:[%s8875_s8 + $0x28] sm:$0xff] }
 0x142   :  { %5826 = vmatprep.subr.bf16.mxu0 %v5825_v32  ;;  %v5829_v50 = vpack.c.bf16 %v754_v54, %v753_v47 }
 0x143   :  { %v6850_v30 = vadd.f32 %v6831_v55, %v1034_v40  ;;  %v6853_v29 = vadd.f32 %v6831_v55, %v1035_v49  ;;  %v6862_v39 = vadd.f32 %v6831_v55, %v1037_v59  ;;  %v756_v59 = vld [vmem:[%s8875_s8 + $0x38] sm:$0xff]  ;;  %5828 = vmatpush3.bf16.msra.mxu0 %v5825_v32  ;;  %v1032_v32 = vmul.f32 %v6827_v45, %v966_v52 }
 0x144   :  { %v982_v37 = vpop.permute.xlu0 %981  ;;  %v994_v40 = vpop.permute.xlu1 %993  ;;  %5830 = vmatprep.subr.bf16.mxu0 %v5829_v50  ;;  %v5833_v54 = vpack.c.bf16 %v756_v59, %v755_v57  ;;  %v1033_v57 = vmul.f32 %v6827_v45, %v970_v18 }
 0x145   :  { %v1036_v35 = vmul.f32 %v6827_v45, %v982_v37  ;;  %v1039_v44 = vmul.f32 %v6827_v45, %v994_v40  ;;  %v6912_v18 = vadd.f32 %v6831_v55, %v1032_v32 }
 0x147   :  { %v6865_v37 = vadd.f32 %v6831_v55, %v1036_v35  ;;  %v6876_v35 = vadd.f32 %v6831_v55, %v1039_v44  ;;  %v758_v44 = vld [vmem:[%s8875_s8 + $0x48] sm:$0xff]  ;;  %5832 = vmatpush3.bf16.msra.mxu0 %v5829_v50 }
 0x148   :  { %v990_v42 = vpop.permute.xlu0 %989  ;;  %v1002_v34 = vpop.permute.xlu1 %1001  ;;  %5834 = vmatprep.subr.bf16.mxu0 %v5833_v54  ;;  %v5837_v20 = vpack.c.bf16 %v758_v44, %v757_v25  ;;  %v6915_v25 = vadd.f32 %v6831_v55, %v1033_v57 }
 0x149   :  { %v1038_v49 = vmul.f32 %v6827_v45, %v990_v42  ;;  %v1041_v42 = vmul.f32 %v6827_v45, %v1002_v34 }
 0x14b   :  { %v6879_v27 = vadd.f32 %v6831_v55, %v1038_v49  ;;  %v6890_v49 = vadd.f32 %v6831_v55, %v1041_v42  ;;  %v759_v42 = vld [vmem:[%s8875_s8 + $0x50] sm:$0xff]  ;;  %5836 = vmatpush3.bf16.msra.mxu0 %v5833_v54 }
 0x14c   :  { %v998_v40 = vpop.permute.xlu0 %997  ;;  %v1010_v34 = vpop.permute.xlu1 %1009  ;;  %5838 = vmatprep.subr.bf16.mxu0 %v5837_v20 }
 0x14d   :  { %v1040_v47 = vmul.f32 %v6827_v45, %v998_v40  ;;  %v1043_v59 = vmul.f32 %v6827_v45, %v1010_v34 }
 0x14f   :  { %v6893_v24 = vadd.f32 %v6831_v55, %v1040_v47  ;;  %v760_v47 = vld [vmem:[%s8875_s8 + $0x58] sm:$0xff]  ;;  %v6906_v52 = vadd.f32 %v6831_v55, %v1043_v59  ;;  %5840 = vmatpush3.bf16.msra.mxu0 %v5837_v20  ;;  %s6307_s8 = smov 32  }
 0x150   :  { %v1006_v40 = vpop.permute.xlu0 %1005  ;;  %v1018_v34 = vpop.permute.xlu1 %1017  ;;  %v5841_v0 = vpack.c.bf16 %v760_v47, %v759_v42 }
 0x151   :  { %v1042_v22 = vmul.f32 %v6827_v45, %v1006_v40  ;;  %v1045_v44 = vmul.f32 %v6827_v45, %v1018_v34  ;;  %v6929_v34 = vpack.c.bf16 %v6915_v25, %v6912_v18 }
 0x152   :  { %5842 = vmatprep.subr.bf16.mxu0 %v5841_v0 }
 0x153   :  { %v6909_v50 = vadd.f32 %v6831_v55, %v1042_v22  ;;  %v6920_v59 = vadd.f32 %v6831_v55, %v1045_v44  ;;  %5844 = vmatpush3.bf16.msra.mxu0 %v5841_v0 }
 0x154   :  { %v1014_v40 = vpop.permute.xlu0 %1013  ;;  %v1026_v32 = vpop.permute.xlu1 %1025  ;;  %5846 = vmatprep.subr.bf16.mxu0 %v6929_v34 }
 0x155   :  { %v1044_v19 = vmul.f32 %v6827_v45, %v1014_v40  ;;  %v1047_v54 = vmul.f32 %v6827_v45, %v1026_v32 }
 0x157   :  { %v6923_v22 = vadd.f32 %v6831_v55, %v1044_v19  ;;  %v6932_v42 = vadd.f32 %v6831_v55, %v1047_v54 }
 0x158   :  { %v1022_v63 = vpop.permute.xlu0 %1021 }
 0x159   :  { %v1046_v57 = vmul.f32 %v6827_v45, %v1022_v63 }
 0x15b   :  { %v6935_v47 = vadd.f32 %v6831_v55, %v1046_v57 }
 0x1d7   :  { %v5180_v19 = vpop.f32.mrb[16].mxu1 }
 0x1d8   :  { %605 = vrot.lane.b32.xlu1 %v5180_v19, %s6307_s8  ;;  %v428_v20 = vpop.f32.mrb[17].mxu1 }
 0x1d9   :  { %603 = vrot.lane.b32.xlu0 %v428_v20, %s6307_s8 }
 0x1db   :  { %v5183_v63 = vpop.f32.mrb[18].mxu1 }
 0x1dc   :  { %609 = vrot.lane.b32.xlu1 %v5183_v63, %s6307_s8  ;;  %v438_v45 = vpop.f32.mrb[19].mxu1 }
 0x1dd   :  { %607 = vrot.lane.b32.xlu0 %v438_v45, %s6307_s8 }
 0x1df   :  { %v5186_v40 = vpop.f32.mrb[20].mxu1 }
 0x1e0   :  { %613 = vrot.lane.b32.xlu1 %v5186_v40, %s6307_s8  ;;  %v448_v55 = vpop.f32.mrb[21].mxu1 }
 0x1e1   :  { %611 = vrot.lane.b32.xlu0 %v448_v55, %s6307_s8 }
 0x1e3   :  { %v5189_v0 = vpop.f32.mrb[22].mxu1 }
 0x1e4   :  { %617 = vrot.lane.b32.xlu1 %v5189_v0, %s6307_s8  ;;  %v458_v44 = vpop.f32.mrb[23].mxu1 }
 0x1e5   :  { %615 = vrot.lane.b32.xlu0 %v458_v44, %s6307_s8 }
 0x1e7   :  { %v5192_v32 = vpop.f32.mrb[24].mxu1 }
 0x1e8   :  { %621 = vrot.lane.b32.xlu1 %v5192_v32, %s6307_s8  ;;  %v468_v54 = vpop.f32.mrb[25].mxu1 }
 0x1e9   :  { %619 = vrot.lane.b32.xlu0 %v468_v54, %s6307_s8 }
 0x1eb   :  { %v5195_v57 = vpop.f32.mrb[26].mxu1 }
 0x1ec   :  { %625 = vrot.lane.b32.xlu1 %v5195_v57, %s6307_s8  ;;  %v478_v19 = vpop.f32.mrb[27].mxu1 }
 0x1ed   :  { %623 = vrot.lane.b32.xlu0 %v478_v19, %s6307_s8 }
 0x1ef   :  { %v5198_v20 = vpop.f32.mrb[28].mxu1 }
 0x1f0   :  { %629 = vrot.lane.b32.xlu1 %v5198_v20, %s6307_s8  ;;  %v488_v63 = vpop.f32.mrb[29].mxu1 }
 0x1f1   :  { %627 = vrot.lane.b32.xlu0 %v488_v63, %s6307_s8 }
 0x1f3   :  { %v5201_v45 = vpop.f32.mrb[30].mxu1 }
 0x1f4   :  { %633 = vrot.lane.b32.xlu1 %v5201_v45, %s6307_s8  ;;  %v498_v40 = vpop.f32.mrb[31].mxu1 }
 0x1f5   :  { %631 = vrot.lane.b32.xlu0 %v498_v40, %s6307_s8 }
 0x1f7   :  { %v5204_v55 = vpop.f32.mrb[32].mxu1 }
 0x1f8   :  { %669 = vrot.lane.b32.xlu1 %v5204_v55, %s6308_s5  ;;  %v508_v0 = vpop.f32.mrb[33].mxu1 }
 0x1f9   :  { %667 = vrot.lane.b32.xlu0 %v508_v0, %s6308_s5 }
 0x1fb   :  { %v5207_v44 = vpop.f32.mrb[34].mxu1 }
 0x1fc   :  { %673 = vrot.lane.b32.xlu1 %v5207_v44, %s6308_s5  ;;  %v518_v32 = vpop.f32.mrb[35].mxu1 }
 0x1fd   :  { %671 = vrot.lane.b32.xlu0 %v518_v32, %s6308_s5 }
 0x1ff   :  { %v5210_v54 = vpop.f32.mrb[36].mxu1 }
 0x200   :  { %677 = vrot.lane.b32.xlu1 %v5210_v54, %s6308_s5  ;;  %v528_v57 = vpop.f32.mrb[37].mxu1 }
 0x201   :  { %675 = vrot.lane.b32.xlu0 %v528_v57, %s6308_s5 }
 0x203   :  { %v5213_v19 = vpop.f32.mrb[38].mxu1 }
 0x204   :  { %681 = vrot.lane.b32.xlu1 %v5213_v19, %s6308_s5  ;;  %v538_v20 = vpop.f32.mrb[39].mxu1 }
 0x205   :  { %679 = vrot.lane.b32.xlu0 %v538_v20, %s6308_s5  ;;  %v8823_v20 = vmov 2  }
 0x206   :  { %6080 = vset.pattern.permute.xlu1 %v8823_v20  ;;  %6079 = vset.pattern.permute.xlu0 %v8823_v20 }
 0x207   :  { %v5216_v63 = vpop.f32.mrb[40].mxu1 }
 0x208   :  { %685 = vrot.lane.b32.xlu1 %v5216_v63, %s6308_s5  ;;  %v548_v45 = vpop.f32.mrb[41].mxu1 }
 0x209   :  { %683 = vrot.lane.b32.xlu0 %v548_v45, %s6308_s5 }
 0x20b   :  { %v5219_v40 = vpop.f32.mrb[42].mxu1 }
 0x20c   :  { %689 = vrot.lane.b32.xlu1 %v5219_v40, %s6308_s5  ;;  %v558_v55 = vpop.f32.mrb[43].mxu1 }
 0x20d   :  { %687 = vrot.lane.b32.xlu0 %v558_v55, %s6308_s5 }
 0x20f   :  { %v5222_v0 = vpop.f32.mrb[44].mxu1 }
 0x210   :  { %693 = vrot.lane.b32.xlu1 %v5222_v0, %s6308_s5  ;;  %v568_v44 = vpop.f32.mrb[45].mxu1 }
 0x211   :  { %691 = vrot.lane.b32.xlu0 %v568_v44, %s6308_s5 }
 0x213   :  { %v5225_v32 = vpop.f32.mrb[46].mxu1 }
 0x214   :  { %697 = vrot.lane.b32.xlu1 %v5225_v32, %s6308_s5  ;;  %v578_v54 = vpop.f32.mrb[47].mxu1 }
 0x215   :  { %695 = vrot.lane.b32.xlu0 %v578_v54, %s6308_s5 }
 0x218   :  { %1177 = vperm.xlu1 %6080, %v6445_v2  }
 0x219   :  { %1173 = vperm.xlu0 %6079, %v6440_v1  }
 0x21c   :  { %1181 = vperm.xlu1 %6080, %v6452_v3  }
 0x21d   :  { %1185 = vperm.xlu0 %6079, %v6461_v4  }
 0x220   :  { %1189 = vperm.xlu1 %6080, %v6466_v5  }
 0x221   :  { %1193 = vperm.xlu0 %6079, %v6475_v6  }
 0x224   :  { %1201 = vperm.xlu1 %6080, %v6489_v8  }
 0x225   :  { %1197 = vperm.xlu0 %6079, %v6480_v7  }
 0x228   :  { %1209 = vperm.xlu1 %6080, %v6503_v10  }
 0x229   :  { %1205 = vperm.xlu0 %6079, %v6494_v9  }
 0x22c   :  { %1217 = vperm.xlu1 %6080, %v6517_v12  }
 0x22d   :  { %1213 = vperm.xlu0 %6079, %v6508_v11  }
 0x230   :  { %1225 = vperm.xlu1 %6080, %v6531_v14  }
 0x231   :  { %1221 = vperm.xlu0 %6079, %v6522_v13  }
 0x234   :  { %1233 = vperm.xlu1 %6080, %v6545_v16  }
 0x235   :  { %1229 = vperm.xlu0 %6079, %v6536_v15   ;;  %v5849_v15 = vpack.c.bf16 %v6853_v29, %v6850_v30 }
 0x24a   :  { %v606_v57 = vpop.permute.xlu1 %605 }
 0x24b   :  { %v604_v19 = vpop.permute.xlu0 %603  ;;  %v717_v12 = vsel %vm715_vm2, %v6576_v21, %v606_v57 }
 0x24c   :  { %v716_v10 = vsel %vm715_vm2, %v6578_v23, %v604_v19 }
 0x24e   :  { %v610_v63 = vpop.permute.xlu1 %609 }
 0x24f   :  { %v608_v45 = vpop.permute.xlu0 %607  ;;  %v719_v21 = vsel %vm715_vm2, %v6582_v26, %v610_v63 }
 0x250   :  { %v718_v32 = vsel %vm715_vm2, %v6584_v28, %v608_v45 }
 0x252   :  { %v614_v40 = vpop.permute.xlu1 %613 }
 0x253   :  { %v612_v55 = vpop.permute.xlu0 %611  ;;  %v721_v26 = vsel %vm715_vm2, %v6588_v31, %v614_v40 }
 0x254   :  { %v720_v28 = vsel %vm715_vm2, %v6590_v33, %v612_v55 }
 0x256   :  { %v618_v0 = vpop.permute.xlu1 %617 }
 0x257   :  { %v616_v44 = vpop.permute.xlu0 %615  ;;  %v723_v31 = vsel %vm715_vm2, %v6594_v36, %v618_v0 }
 0x258   :  { %v722_v33 = vsel %vm715_vm2, %v6596_v38, %v616_v44 }
 0x25a   :  { %v6980_v2 = vpop.permute.xlu1 %621 }
 0x25b   :  { %v620_v1 = vpop.permute.xlu0 %619  ;;  %v725_v36 = vsel %vm715_vm2, %v6600_v41, %v6980_v2 }
 0x25c   :  { %v724_v38 = vsel %vm715_vm2, %v6602_v43, %v620_v1 }
 0x25e   :  { %v6984_v3 = vpop.permute.xlu1 %625 }
 0x25f   :  { %v6986_v4 = vpop.permute.xlu0 %623  ;;  %v727_v41 = vsel %vm715_vm2, %v6606_v46, %v6984_v3 }
 0x260   :  { %v726_v43 = vsel %vm715_vm2, %v6608_v48, %v6986_v4 }
 0x262   :  { %v6990_v5 = vpop.permute.xlu1 %629 }
 0x263   :  { %v6992_v6 = vpop.permute.xlu0 %627  ;;  %v729_v46 = vsel %vm715_vm2, %v6612_v51, %v6990_v5 }
 0x264   :  { %v728_v48 = vsel %vm715_vm2, %v6614_v53, %v6992_v6 }
 0x266   :  { %v6996_v7 = vpop.permute.xlu1 %633 }
 0x267   :  { %v6998_v8 = vpop.permute.xlu0 %631  ;;  %v731_v51 = vsel %vm715_vm2, %v6618_v56, %v6996_v7  ;;  %v8877_v56 = vld [vmem:[#allocation4_spill] sm:$0xff]  ;;  %v8878_v7 = vld [vmem:[#allocation5_spill] sm:$0xff] }
 0x268   :  { %v730_v53 = vsel %vm715_vm2, %v6620_v58, %v6998_v8  ;;  %v8876_v58 = vld [vmem:[#allocation3_spill] sm:$0xff]  ;;  %v8879_v8 = vld [vmem:[#allocation6_spill] sm:$0xff] }
 0x26a   :  { %v670_v9 = vpop.permute.xlu1 %669 }
 0x26b   :  { %v668_v11 = vpop.permute.xlu0 %667  ;;  %v734_v14 = vsel %vm732_vm3, %v717_v12, %v670_v9  ;;  %v5853_v9 = vpack.c.bf16 %v6862_v39, %v6865_v37 }
 0x26c   :  { %v733_v13 = vsel %vm732_vm3, %v716_v10, %v668_v11  ;;  %v5857_v11 = vpack.c.bf16 %v6876_v35, %v6879_v27 }
 0x26d   :  { %5250 = vmatprep.mubr.msk.f32.mxu0 %vm768_vm4, %v733_v13 }
 0x26e   :  { %5251 = vmatmul.mubr.msk.f32.vlgmr.msra.gmra.mrb[0].mxu0 %vm768_vm4, %v734_v14  ;;  %v674_v16 = vpop.permute.xlu1 %673  ;;  %v5861_v14 = vpack.c.bf16 %v6890_v49, %v6893_v24 }
 0x26f   :  { %5848 = vmatpush3.bf16.msra.mxu0 %v6929_v34  ;;  %v672_v23 = vpop.permute.xlu0 %671  ;;  %v736_v57 = vsel %vm732_vm3, %v719_v21, %v674_v16 }
 0x270   :  { %5850 = vmatprep.subr.bf16.mxu0 %v5849_v15  ;;  %v735_v54 = vsel %vm732_vm3, %v718_v32, %v672_v23  ;;  %v5865_v32 = vpack.c.bf16 %v6906_v52, %v6909_v50 }
 0x271   :  { %5253 = vmatprep.mubr.msk.f32.mxu0 %vm768_vm4, %v735_v54  ;;  %v5869_v54 = vpack.c.bf16 %v6920_v59, %v6923_v22 }
 0x272   :  { %5254 = vmatmul.mubr.msk.f32.gmra.mrb[2].mxu0 %vm768_vm4, %v736_v57  ;;  %v678_v19 = vpop.permute.xlu1 %677 }
 0x273   :  { %5852 = vmatpush3.bf16.msra.mxu0 %v5849_v15  ;;  %v676_v34 = vpop.permute.xlu0 %675  ;;  %v738_v45 = vsel %vm732_vm3, %v721_v26, %v678_v19  ;;  %v8881_v26 = vld [vmem:[#allocation8_spill] sm:$0xff] }
 0x274   :  { %5854 = vmatprep.subr.bf16.mxu0 %v5853_v9  ;;  %v737_v63 = vsel %vm732_vm3, %v720_v28, %v676_v34  ;;  %v8880_v34 = vld [vmem:[#allocation7_spill] sm:$0xff] }
 0x275   :  { %5256 = vmatprep.mubr.msk.f32.mxu0 %vm768_vm4, %v737_v63  ;;  %v8882_v63 = vld [vmem:[#allocation9_spill] sm:$0xff] }
 0x276   :  { %5257 = vmatmul.mubr.msk.f32.gmra.mrb[4].mxu0 %vm768_vm4, %v738_v45  ;;  %v682_v10 = vpop.permute.xlu1 %681  ;;  %v8887_v45 = vld [vmem:[#allocation14_spill] sm:$0xff] }
 0x277   :  { %5856 = vmatpush3.bf16.msra.mxu0 %v5853_v9  ;;  %v680_v55 = vpop.permute.xlu0 %679  ;;  %v740_v12 = vsel %vm732_vm3, %v723_v31, %v682_v10  ;;  %v5873_v9 = vpack.c.bf16 %v6932_v42, %v6935_v47  ;;  %v8888_v10 = vld [vmem:[#allocation15_spill] sm:$0xff] }
 0x278   :  { %5858 = vmatprep.subr.bf16.mxu0 %v5857_v11  ;;  %v739_v40 = vsel %vm732_vm3, %v722_v33, %v680_v55  ;;  %v8890_v33 = vld [vmem:[#allocation17_spill] sm:$0xff]  ;;  %v8891_v55 = vld [vmem:[#allocation18_spill] sm:$0xff]  ;;  %v8892_v31 = vld [vmem:[#allocation19_spill] sm:$0xff] }
 0x279   :  { %5259 = vmatprep.mubr.msk.f32.mxu0 %vm768_vm4, %v739_v40  ;;  %v8893_v40 = vld [vmem:[#allocation20_spill] sm:$0xff] }
 0x27a   :  { %5260 = vmatmul.mubr.msk.f32.gmra.mrb[6].mxu0 %vm768_vm4, %v740_v12  ;;  %v686_v13 = vpop.permute.xlu1 %685  ;;  %v8894_v12 = vld [vmem:[#allocation21_spill] sm:$0xff] }
 0x27b   :  { %5860 = vmatpush3.bf16.msra.mxu0 %v5857_v11  ;;  %v684_v44 = vpop.permute.xlu0 %683  ;;  %v742_v16 = vsel %vm732_vm3, %v725_v36, %v686_v13  ;;  %v8889_v11 = vld [vmem:[#allocation16_spill] sm:$0xff]  ;;  %v8895_v13 = vld [vmem:[#allocation22_spill] sm:$0xff] }
 0x27c   :  { %5862 = vmatprep.subr.bf16.mxu0 %v5861_v14  ;;  %v741_v0 = vsel %vm732_vm3, %v724_v38, %v684_v44  ;;  %v8897_v38 = vld [vmem:[#allocation24_spill] sm:$0xff]  ;;  %v8898_v44 = vld [vmem:[#allocation25_spill] sm:$0xff]  ;;  %v8899_v36 = vld [vmem:[#allocation26_spill] sm:$0xff] }
 0x27d   :  { %5262 = vmatprep.mubr.msk.f32.mxu0 %vm768_vm4, %v741_v0  ;;  %v8900_v0 = vld [vmem:[#allocation27_spill] sm:$0xff] }
 0x27e   :  { %5263 = vmatmul.mubr.msk.f32.gmra.mrb[8].mxu0 %vm768_vm4, %v742_v16  ;;  %v690_v15 = vpop.permute.xlu1 %689  ;;  %v8901_v16 = vld [vmem:[#allocation28_spill] sm:$0xff] }
 0x27f   :  { %5864 = vmatpush3.bf16.msra.mxu0 %v5861_v14  ;;  %v688_v1 = vpop.permute.xlu0 %687  ;;  %v744_v23 = vsel %vm732_vm3, %v727_v41, %v690_v15  ;;  %v8896_v14 = vld [vmem:[#allocation23_spill] sm:$0xff]  ;;  %v8902_v15 = vld [vmem:[#allocation29_spill] sm:$0xff] }
 0x280   :  { %5866 = vmatprep.subr.bf16.mxu0 %v5865_v32  ;;  %v743_v2 = vsel %vm732_vm3, %v726_v43, %v688_v1  ;;  %v8904_v43 = vld [vmem:[#allocation31_spill] sm:$0xff] }
 0x281   :  { %5265 = vmatprep.mubr.msk.f32.mxu0 %vm768_vm4, %v743_v2  ;;  %v1238_v1 = vsub.s32 2, %v8904_v43 }
 0x282   :  { %5266 = vmatmul.mubr.msk.f32.gmra.mrb[10].mxu0 %vm768_vm4, %v744_v23  ;;  %v694_v21 = vpop.permute.xlu1 %693  ;;  %v8905_v23 = vld [vmem:[#allocation32_spill] sm:$0xff] }
 0x283   :  { %5868 = vmatpush3.bf16.msra.mxu0 %v5865_v32  ;;  %v692_v4 = vpop.permute.xlu0 %691  ;;  %v746_v57 = vsel %vm732_vm3, %v729_v46, %v694_v21  ;;  %v8903_v32 = vld [vmem:[#allocation30_spill] sm:$0xff]  ;;  %v7122_v21 = vrot.slane %v8905_v23, %v1238_v1 }
 0x284   :  { %5870 = vmatprep.subr.bf16.mxu0 %v5869_v54  ;;  %v745_v3 = vsel %vm732_vm3, %v728_v48, %v692_v4 }
 0x285   :  { %5268 = vmatprep.mubr.msk.f32.mxu0 %vm768_vm4, %v745_v3 }
 0x286   :  { %5269 = vmatmul.mubr.msk.f32.gmra.mrb[12].mxu0 %vm768_vm4, %v746_v57  ;;  %v698_v19 = vpop.permute.xlu1 %697 }
 0x287   :  { %5872 = vmatpush3.bf16.msra.mxu0 %v5869_v54  ;;  %v696_v6 = vpop.permute.xlu0 %695  ;;  %v748_v28 = vsel %vm732_vm3, %v731_v51, %v698_v19  ;;  %v8906_v54 = vld [vmem:[#allocation33_spill] sm:$0xff] }
 0x288   :  { %5874 = vmatprep.subr.bf16.mxu0 %v5873_v9  ;;  %v747_v5 = vsel %vm732_vm3, %v730_v53, %v696_v6  ;;  %v7125_v48 = vrot.slane %v8906_v54, %v1238_v1  ;;  %v1662_v53 = vld [vmem:[%s8907_s29 + $0x8] sm:$0xff]  ;;  %v1663_v6 = vld [vmem:[%s8907_s29 + $0x10] sm:$0xff] }
 0x289   :  { %5271 = vmatprep.mubr.msk.f32.mxu0 %vm768_vm4, %v747_v5 }
 0x28a   :  { %5272 = vmatmul.mubr.msk.f32.gmra.mrb[14].mxu0 %vm768_vm4, %v748_v28 }
 0x28b   :  { %5876 = vmatpush3.bf16.msra.mxu0 %v5873_v9  ;;  %5306 = vmatprep.mubr.f32.mxu0 %v6552_v17  ;;  %v8883_v17 = vld [vmem:[#allocation10_spill] sm:$0xff] }
 0x28c   :  { %v1661_v9 = vld [vmem:[%s8907_s29] sm:$0xff] }
 0x28d   :  { %v5877_v28 = vpack.c.bf16 %v1662_v53, %v1661_v9 }
 0x28e   :  { %5307 = vmatmul.mubr.f32.vlgmr.msra.gmra.mrb[16].mxu0 %v6627_v60  ;;  %v8884_v60 = vld [vmem:[#allocation11_spill] sm:$0xff] }
 0x28f   :  { %5309 = vmatprep.mubr.f32.mxu0 %v6632_v61  ;;  %v8885_v61 = vld [vmem:[#allocation12_spill] sm:$0xff]  ;;  %5878 = vmatprep.subr.bf16.mxu1 %v5877_v28 }
 0x290   :  { %5880 = vmatpush3.bf16.msra.mxu1 %v5877_v28 }
 0x292   :  { %5310 = vmatmul.mubr.f32.gmra.mrb[18].mxu0 %v6639_v62  ;;  %v8886_v62 = vld [vmem:[#allocation13_spill] sm:$0xff] }
 0x293   :  { %5312 = vmatprep.mubr.f32.mxu0 %v8876_v58  ;;  %v1664_v58 = vld [vmem:[%s8907_s29 + $0x18] sm:$0xff] }
 0x296   :  { %5313 = vmatmul.mubr.f32.gmra.mrb[20].mxu0 %v8877_v56 }
 0x297   :  { %5315 = vmatprep.mubr.f32.mxu0 %v8878_v7  ;;  %v1178_v41 = vpop.permute.xlu1 %1177 }
 0x298   :  { %v1174_v2 = vpop.permute.xlu0 %1173 }
 0x29a   :  { %5316 = vmatmul.mubr.f32.gmra.mrb[22].mxu0 %v8879_v8  ;;  %v5881_v8 = vpack.c.bf16 %v1664_v58, %v1663_v6 }
 0x29b   :  { %5318 = vmatprep.mubr.f32.mxu0 %v8880_v34  ;;  %v1182_v4 = vpop.permute.xlu1 %1181  ;;  %v1665_v34 = vld [vmem:[%s8907_s29 + $0x20] sm:$0xff] }
 0x29c   :  { %v1242_v46 = vmul.f32 %v7122_v21, %v1182_v4  ;;  %v1186_v3 = vpop.permute.xlu0 %1185  ;;  %5882 = vmatprep.subr.bf16.mxu1 %v5881_v8 }
 0x29d   :  { %v1243_v57 = vmul.f32 %v7122_v21, %v1186_v3  ;;  %5884 = vmatpush3.bf16.msra.mxu1 %v5881_v8  ;;  %v1671_v3 = vld [vmem:[%s8907_s29 + $0x50] sm:$0xff] }
 0x29e   :  { %5319 = vmatmul.mubr.f32.gmra.mrb[24].mxu0 %v8881_v26  ;;  %v7130_v19 = vadd.f32 %v7125_v48, %v1242_v46  ;;  %v1666_v26 = vld [vmem:[%s8907_s29 + $0x28] sm:$0xff] }
 0x29f   :  { %5321 = vmatprep.mubr.f32.mxu0 %v8882_v63  ;;  %v7142_v51 = vadd.f32 %v7125_v48, %v1243_v57  ;;  %v1190_v5 = vpop.permute.xlu1 %1189  ;;  %v1672_v57 = vld [vmem:[%s8907_s29 + $0x58] sm:$0xff] }
 0x2a0   :  { %v1244_v56 = vmul.f32 %v7122_v21, %v1190_v5  ;;  %v1194_v7 = vpop.permute.xlu0 %1193  ;;  %v5897_v28 = vpack.c.bf16 %v1672_v57, %v1671_v3 }
 0x2a1   :  { %v1245_v63 = vmul.f32 %v7122_v21, %v1194_v7 }
 0x2a2   :  { %5322 = vmatmul.mubr.f32.gmra.mrb[26].mxu0 %v8883_v17  ;;  %v7156_v17 = vadd.f32 %v7125_v48, %v1244_v56 }
 0x2a3   :  { %5324 = vmatprep.mubr.f32.mxu0 %v8884_v60  ;;  %v7159_v60 = vadd.f32 %v7125_v48, %v1245_v63 }
 0x2a6   :  { %5325 = vmatmul.mubr.f32.gmra.mrb[28].mxu0 %v8885_v61  ;;  %v1202_v61 = vpop.permute.xlu1 %1201 }
 0x2a7   :  { %5327 = vmatprep.mubr.f32.mxu0 %v8886_v62  ;;  %v5885_v62 = vpack.c.bf16 %v1666_v26, %v1665_v34 }
 0x2a9   :  { %5886 = vmatprep.subr.bf16.mxu1 %v5885_v62 }
 0x2aa   :  { %5328 = vmatmul.mubr.f32.gmra.mrb[30].mxu0 %v8887_v45  ;;  %v1247_v45 = vmul.f32 %v7122_v21, %v1202_v61  ;;  %5888 = vmatpush3.bf16.msra.mxu1 %v5885_v62 }
 0x2ab   :  { %5330 = vmatprep.mubr.f32.mxu0 %v8888_v10  ;;  %v1198_v10 = vpop.permute.xlu0 %1197 }
 0x2ae   :  { %5331 = vmatmul.mubr.f32.gmra.mrb[32].mxu0 %v8889_v11  ;;  %v1667_v11 = vld [vmem:[%s8907_s29 + $0x30] sm:$0xff] }
 0x2af   :  { %5333 = vmatprep.mubr.f32.mxu0 %v8890_v33  ;;  %v1668_v33 = vld [vmem:[%s8907_s29 + $0x38] sm:$0xff] }
 0x2b2   :  { %5334 = vmatmul.mubr.f32.gmra.mrb[34].mxu0 %v8891_v55  ;;  %v1246_v55 = vmul.f32 %v7122_v21, %v1198_v10 }
 0x2b3   :  { %5336 = vmatprep.mubr.f32.mxu0 %v8892_v31  ;;  %v7170_v31 = vadd.f32 %v7125_v48, %v1247_v45 }
 0x2b6   :  { %5337 = vmatmul.mubr.f32.gmra.mrb[36].mxu0 %v8893_v40  ;;  %v7173_v40 = vadd.f32 %v7125_v48, %v1246_v55 }
 0x2b7   :  { %5339 = vmatprep.mubr.f32.mxu0 %v8894_v12  ;;  %v1210_v12 = vpop.permute.xlu1 %1209 }
 0x2ba   :  { %5340 = vmatmul.mubr.f32.gmra.mrb[38].mxu0 %v8895_v13  ;;  %v5889_v13 = vpack.c.bf16 %v1668_v33, %v1667_v11 }
 0x2bb   :  { %5342 = vmatprep.mubr.f32.mxu0 %v8896_v14  ;;  %v1249_v14 = vmul.f32 %v7122_v21, %v1210_v12  ;;  %v1218_v23 = vpop.permute.xlu1 %1217 }
 0x2bc   :  { %5890 = vmatprep.subr.bf16.mxu1 %v5889_v13  ;;  %v1251_v4 = vmul.f32 %v7122_v21, %v1218_v23 }
 0x2bd   :  { %5892 = vmatpush3.bf16.msra.mxu1 %v5889_v13 }
 0x2be   :  { %5343 = vmatmul.mubr.f32.gmra.mrb[40].mxu0 %v8897_v38  ;;  %v1206_v38 = vpop.permute.xlu0 %1205 }
 0x2bf   :  { %5345 = vmatprep.mubr.f32.mxu0 %v8898_v44  ;;  %v1669_v44 = vld [vmem:[%s8907_s29 + $0x40] sm:$0xff]  ;;  %v1226_v5 = vpop.permute.xlu1 %1225 }
 0x2c0   :  { %v1253_v58 = vmul.f32 %v7122_v21, %v1226_v5 }
 0x2c2   :  { %5346 = vmatmul.mubr.f32.gmra.mrb[42].mxu0 %v8899_v36  ;;  %v1670_v36 = vld [vmem:[%s8907_s29 + $0x48] sm:$0xff]  ;;  %v1214_v46 = vpop.permute.xlu0 %1213  ;;  %v7214_v8 = vadd.f32 %v7125_v48, %v1253_v58 }
 0x2c3   :  { %5348 = vmatprep.mubr.f32.mxu0 %v8900_v0  ;;  %v1248_v0 = vmul.f32 %v7122_v21, %v1206_v38  ;;  %v5893_v54 = vpack.c.bf16 %v1670_v36, %v1669_v44  ;;  %v1234_v26 = vpop.permute.xlu1 %1233 }
 0x2c4   :  { %v1255_v61 = vmul.f32 %v7122_v21, %v1234_v26 }
 0x2c5   :  { %v7189_v1 = vadd.f32 %v7125_v48, %v1248_v0  ;;  %5894 = vmatprep.subr.bf16.mxu1 %v5893_v54 }
 0x2c6   :  { %5349 = vmatmul.mubr.f32.gmra.mrb[44].mxu0 %v8901_v16  ;;  %v7184_v16 = vadd.f32 %v7125_v48, %v1249_v14  ;;  %v1222_v56 = vpop.permute.xlu0 %1221  ;;  %5896 = vmatpush3.bf16.msra.mxu1 %v5893_v54  ;;  %v7226_v10 = vadd.f32 %v7125_v48, %v1255_v61 }
 0x2c7   :  { %5351 = vmatprep.mubr.f32.mxu0 %v8902_v15  ;;  %v1241_v15 = vmul.f32 %v7122_v21, %v1178_v41  ;;  %v1250_v41 = vmul.f32 %v7122_v21, %v1214_v46  ;;  %v1252_v7 = vmul.f32 %v7122_v21, %v1222_v56  ;;  %5898 = vmatprep.subr.bf16.mxu1 %v5897_v28 }
 0x2c9   :  { %v7203_v9 = vadd.f32 %v7125_v48, %v1241_v15  ;;  %v7209_v6 = vadd.f32 %v7125_v48, %v1250_v41  ;;  %v7217_v34 = vadd.f32 %v7125_v48, %v1252_v7 }
 0x2ca   :  { %5352 = vmatmul.mubr.f32.gmra.mrb[46].mxu0 %v8903_v32  ;;  %v1240_v32 = vmul.f32 %v7122_v21, %v1174_v2  ;;  %v7200_v2 = vadd.f32 %v7125_v48, %v1251_v4  ;;  %v1230_v62 = vpop.permute.xlu0 %1229  ;;  %5900 = vmatpush3.bf16.msra.mxu1 %v5897_v28 }
 0x2cb   :  { %8908 = vst [vmem:[#allocation3_spill] sm:$0xff] %v7203_v9  ;;  %v1254_v45 = vmul.f32 %v7122_v21, %v1230_v62 }
 0x2cc   :  { %v7206_v53 = vadd.f32 %v7125_v48, %v1240_v32 }
 0x2cd   :  { %v7229_v11 = vadd.f32 %v7125_v48, %v1254_v45 }
 0x2ce   :  { %8909 = vst [vmem:[#allocation4_spill] sm:$0xff] %v7206_v53  ;;  %v7221_v63 = vpack.c.bf16 %v7203_v9, %v7206_v53 }
 0x2d0   :  { %5902 = vmatprep.subr.bf16.mxu1 %v7221_v63 }
 0x341   :  { %v7232_v33 = vpop.f32.mrb[0].mxu0 }
 0x342   :  { %v7234_v55 = vpop.f32.mrb[1].mxu0 }
 0x345   :  { %v7236_v12 = vpop.f32.mrb[2].mxu0 }
 0x346   :  { %v7238_v13 = vpop.f32.mrb[3].mxu0 }
 0x349   :  { %v7240_v14 = vpop.f32.mrb[4].mxu0 }
 0x34a   :  { %v7242_v21 = vpop.f32.mrb[5].mxu0 }
 0x34d   :  { %v7244_v38 = vpop.f32.mrb[6].mxu0 }
 0x34e   :  { %v7246_v44 = vpop.f32.mrb[7].mxu0 }
 0x351   :  { %v7248_v48 = vpop.f32.mrb[8].mxu0 }
 0x352   :  { %8910 = vst [vmem:[#allocation5_spill] sm:$0xff] %v7248_v48  ;;  %v7250_v36 = vpop.f32.mrb[9].mxu0 }
 0x353   :  { %8911 = vst [vmem:[#allocation6_spill] sm:$0xff] %v7250_v36  ;;  %v5905_v36 = vpack.c.bf16 %v7142_v51, %v7130_v19 }
 0x355   :  { %v7252_v0 = vpop.f32.mrb[10].mxu0 }
 0x356   :  { %8912 = vst [vmem:[#allocation7_spill] sm:$0xff] %v7252_v0  ;;  %v7254_v15 = vpop.f32.mrb[11].mxu0 }
 0x357   :  { %8913 = vst [vmem:[#allocation8_spill] sm:$0xff] %v7254_v15 }
 0x359   :  { %v7256_v32 = vpop.f32.mrb[12].mxu0 }
 0x35a   :  { %8914 = vst [vmem:[#allocation9_spill] sm:$0xff] %v7256_v32  ;;  %v7258_v23 = vpop.f32.mrb[13].mxu0 }
 0x35b   :  { %8915 = vst [vmem:[#allocation10_spill] sm:$0xff] %v7258_v23 }
 0x35d   :  { %v7260_v54 = vpop.f32.mrb[14].mxu0 }
 0x35e   :  { %8916 = vst [vmem:[#allocation11_spill] sm:$0xff] %v7260_v54  ;;  %v7262_v4 = vpop.f32.mrb[15].mxu0 }
 0x35f   :  { %8917 = vst [vmem:[#allocation12_spill] sm:$0xff] %v7262_v4 }
 0x361   :  { %v5308_v46 = vpop.f32.mrb[16].mxu0 }
 0x362   :  { %1519 = vrot.lane.b32.xlu0 %v5308_v46, %s6307_s8  ;;  %v1342_v3 = vpop.f32.mrb[17].mxu0 }
 0x363   :  { %1517 = vrot.lane.b32.xlu1 %v1342_v3, %s6307_s8 }
 0x365   :  { %v5311_v57 = vpop.f32.mrb[18].mxu0 }
 0x366   :  { %1523 = vrot.lane.b32.xlu0 %v5311_v57, %s6307_s8  ;;  %v1352_v41 = vpop.f32.mrb[19].mxu0 }
 0x367   :  { %1521 = vrot.lane.b32.xlu1 %v1352_v41, %s6307_s8 }
 0x369   :  { %v5314_v5 = vpop.f32.mrb[20].mxu0 }
 0x36a   :  { %1527 = vrot.lane.b32.xlu0 %v5314_v5, %s6307_s8  ;;  %v1362_v28 = vpop.f32.mrb[21].mxu0 }
 0x36b   :  { %1525 = vrot.lane.b32.xlu1 %v1362_v28, %s6307_s8 }
 0x36d   :  { %v5317_v58 = vpop.f32.mrb[22].mxu0 }
 0x36e   :  { %1531 = vrot.lane.b32.xlu0 %v5317_v58, %s6307_s8  ;;  %v1372_v56 = vpop.f32.mrb[23].mxu0 }
 0x36f   :  { %1529 = vrot.lane.b32.xlu1 %v1372_v56, %s6307_s8 }
 0x371   :  { %v5320_v7 = vpop.f32.mrb[24].mxu0 }
 0x372   :  { %1535 = vrot.lane.b32.xlu0 %v5320_v7, %s6307_s8  ;;  %v1382_v26 = vpop.f32.mrb[25].mxu0 }
 0x373   :  { %1533 = vrot.lane.b32.xlu1 %v1382_v26, %s6307_s8 }
 0x375   :  { %v5323_v61 = vpop.f32.mrb[26].mxu0 }
 0x376   :  { %1539 = vrot.lane.b32.xlu0 %v5323_v61, %s6307_s8  ;;  %v1392_v62 = vpop.f32.mrb[27].mxu0 }
 0x377   :  { %1537 = vrot.lane.b32.xlu1 %v1392_v62, %s6307_s8 }
 0x379   :  { %v5326_v45 = vpop.f32.mrb[28].mxu0 }
 0x37a   :  { %1543 = vrot.lane.b32.xlu0 %v5326_v45, %s6307_s8  ;;  %v1402_v46 = vpop.f32.mrb[29].mxu0 }
 0x37b   :  { %1541 = vrot.lane.b32.xlu1 %v1402_v46, %s6307_s8 }
 0x37d   :  { %v5329_v3 = vpop.f32.mrb[30].mxu0 }
 0x37e   :  { %1547 = vrot.lane.b32.xlu0 %v5329_v3, %s6307_s8  ;;  %v1412_v57 = vpop.f32.mrb[31].mxu0 }
 0x37f   :  { %1545 = vrot.lane.b32.xlu1 %v1412_v57, %s6307_s8 }
 0x381   :  { %v5332_v41 = vpop.f32.mrb[32].mxu0 }
 0x382   :  { %1583 = vrot.lane.b32.xlu0 %v5332_v41, %s6308_s5  ;;  %v1422_v5 = vpop.f32.mrb[33].mxu0 }
 0x383   :  { %1581 = vrot.lane.b32.xlu1 %v1422_v5, %s6308_s5 }
 0x385   :  { %v5335_v28 = vpop.f32.mrb[34].mxu0 }
 0x386   :  { %1587 = vrot.lane.b32.xlu0 %v5335_v28, %s6308_s5  ;;  %v1432_v58 = vpop.f32.mrb[35].mxu0 }
 0x387   :  { %1585 = vrot.lane.b32.xlu1 %v1432_v58, %s6308_s5 }
 0x389   :  { %v5338_v56 = vpop.f32.mrb[36].mxu0 }
 0x38a   :  { %1591 = vrot.lane.b32.xlu0 %v5338_v56, %s6308_s5  ;;  %v1442_v7 = vpop.f32.mrb[37].mxu0 }
 0x38b   :  { %1589 = vrot.lane.b32.xlu1 %v1442_v7, %s6308_s5 }
 0x38d   :  { %v5341_v26 = vpop.f32.mrb[38].mxu0 }
 0x38e   :  { %1595 = vrot.lane.b32.xlu0 %v5341_v26, %s6308_s5  ;;  %v1452_v61 = vpop.f32.mrb[39].mxu0 }
 0x38f   :  { %1593 = vrot.lane.b32.xlu1 %v1452_v61, %s6308_s5 }
 0x391   :  { %v5344_v62 = vpop.f32.mrb[40].mxu0 }
 0x392   :  { %1599 = vrot.lane.b32.xlu0 %v5344_v62, %s6308_s5  ;;  %v1462_v45 = vpop.f32.mrb[41].mxu0 }
 0x393   :  { %1597 = vrot.lane.b32.xlu1 %v1462_v45, %s6308_s5 }
 0x395   :  { %v5347_v46 = vpop.f32.mrb[42].mxu0 }
 0x396   :  { %1603 = vrot.lane.b32.xlu0 %v5347_v46, %s6308_s5  ;;  %v1472_v3 = vpop.f32.mrb[43].mxu0 }
 0x397   :  { %1601 = vrot.lane.b32.xlu1 %v1472_v3, %s6308_s5 }
 0x399   :  { %v5350_v57 = vpop.f32.mrb[44].mxu0 }
 0x39a   :  { %1607 = vrot.lane.b32.xlu0 %v5350_v57, %s6308_s5  ;;  %v1482_v41 = vpop.f32.mrb[45].mxu0 }
 0x39b   :  { %1605 = vrot.lane.b32.xlu1 %v1482_v41, %s6308_s5 }
 0x39d   :  { %v5353_v5 = vpop.f32.mrb[46].mxu0 }
 0x39e   :  { %1611 = vrot.lane.b32.xlu0 %v5353_v5, %s6308_s5  ;;  %v1492_v28 = vpop.f32.mrb[47].mxu0 }
 0x39f   :  { %1609 = vrot.lane.b32.xlu1 %v1492_v28, %s6308_s5 }
 0x3d4   :  { %v1520_v58 = vpop.permute.xlu0 %1519 }
 0x3d5   :  { %v1518_v56 = vpop.permute.xlu1 %1517  ;;  %v1630_v23 = vsel %vm715_vm2, %v6915_v25, %v1520_v58 }
 0x3d6   :  { %v1629_v4 = vsel %vm715_vm2, %v6912_v18, %v1518_v56 }
 0x3d8   :  { %v1524_v7 = vpop.permute.xlu0 %1523 }
 0x3d9   :  { %v1522_v26 = vpop.permute.xlu1 %1521  ;;  %v1632_v25 = vsel %vm715_vm2, %v6853_v29, %v1524_v7 }
 0x3da   :  { %v1631_v48 = vsel %vm715_vm2, %v6850_v30, %v1522_v26  ;;  %v5917_v26 = vpack.c.bf16 %v7184_v16, %v7189_v1 }
 0x3dc   :  { %v1528_v61 = vpop.permute.xlu0 %1527 }
 0x3dd   :  { %v1526_v62 = vpop.permute.xlu1 %1525  ;;  %v1634_v29 = vsel %vm715_vm2, %v6862_v39, %v1528_v61 }
 0x3de   :  { %v1633_v30 = vsel %vm715_vm2, %v6865_v37, %v1526_v62 }
 0x3e0   :  { %v1532_v45 = vpop.permute.xlu0 %1531 }
 0x3e1   :  { %v1530_v46 = vpop.permute.xlu1 %1529  ;;  %v1636_v39 = vsel %vm715_vm2, %v6876_v35, %v1532_v45 }
 0x3e2   :  { %v1635_v37 = vsel %vm715_vm2, %v6879_v27, %v1530_v46 }
 0x3e4   :  { %v1536_v3 = vpop.permute.xlu0 %1535 }
 0x3e5   :  { %v1534_v20 = vpop.permute.xlu1 %1533  ;;  %v1638_v35 = vsel %vm715_vm2, %v6890_v49, %v1536_v3 }
 0x3e6   :  { %v1637_v27 = vsel %vm715_vm2, %v6893_v24, %v1534_v20 }
 0x3e8   :  { %v7296_v57 = vpop.permute.xlu0 %1539 }
 0x3e9   :  { %v1538_v43 = vpop.permute.xlu1 %1537  ;;  %v1640_v49 = vsel %vm715_vm2, %v6906_v52, %v7296_v57 }
 0x3ea   :  { %v1639_v24 = vsel %vm715_vm2, %v6909_v50, %v1538_v43  ;;  %v7371_v50 = vld [vmem:[%s8766_s6] ss:$0 sm:$0xff] }
 0x3ec   :  { %v7298_v41 = vpop.permute.xlu0 %1543 }
 0x3ed   :  { %v7300_v9 = vpop.permute.xlu1 %1541  ;;  %v1642_v57 = vsel %vm715_vm2, %v6920_v59, %v7298_v41  ;;  %v5929_v59 = vpack.c.bf16 %v7226_v10, %v7229_v11 }
 0x3ee   :  { %v1641_v52 = vsel %vm715_vm2, %v6923_v22, %v7300_v9  ;;  %v7388_v22 = vadd.f32 %v7371_v50, %v7234_v55 }
 0x3f0   :  { %v7302_v5 = vpop.permute.xlu0 %1547 }
 0x3f1   :  { %v7304_v28 = vpop.permute.xlu1 %1545 }
 0x3f2   :  { %v1643_v41 = vsel %vm715_vm2, %v6935_v47, %v7304_v28  ;;  %v7410_v47 = vadd.f32 %v7371_v50, %v7238_v13  ;;  %v7424_v13 = vadd.f32 %v7371_v50, %v7242_v21  ;;  %v6254_v28 = vld [vmem:[%s8839_s9 + $0x8] sm:$0xff]  ;;  %v7440_v21 = vadd.f32 %v7371_v50, %v7246_v44  ;;  %v8919_v44 = vld [vmem:[#allocation6_spill] sm:$0xff] }
 0x3f4   :  { %v1584_v53 = vpop.permute.xlu0 %1583 }
 0x3f5   :  { %v1582_v54 = vpop.permute.xlu1 %1581  ;;  %v1646_v15 = vsel %vm732_vm3, %v1630_v23, %v1584_v53 }
 0x3f6   :  { %v1645_v32 = vsel %vm732_vm3, %v1629_v4, %v1582_v54  ;;  %v5913_v4 = vpack.c.bf16 %v7170_v31, %v7173_v40 }
 0x3f7   :  { %5378 = vmatprep.mubr.msk.f32.mxu1 %vm768_vm4, %v1645_v32  ;;  %v5909_v32 = vpack.c.bf16 %v7159_v60, %v7156_v17 }
 0x3f8   :  { %5379 = vmatmul.mubr.msk.f32.vlgmr.msra.gmra.mrb[48].mxu1 %vm768_vm4, %v1646_v15  ;;  %v1588_v0 = vpop.permute.xlu0 %1587 }
 0x3f9   :  { %5904 = vmatpush3.bf16.msra.mxu1 %v7221_v63  ;;  %v1586_v18 = vpop.permute.xlu1 %1585  ;;  %v1648_v53 = vsel %vm732_vm3, %v1632_v25, %v1588_v0 }
 0x3fa   :  { %v1647_v54 = vsel %vm732_vm3, %v1631_v48, %v1586_v18  ;;  %5906 = vmatprep.subr.bf16.mxu1 %v5905_v36  ;;  %v5921_v18 = vpack.c.bf16 %v7200_v2, %v7209_v6 }
 0x3fb   :  { %5381 = vmatprep.mubr.msk.f32.mxu1 %vm768_vm4, %v1647_v54 }
 0x3fc   :  { %5382 = vmatmul.mubr.msk.f32.gmra.mrb[50].mxu1 %vm768_vm4, %v1648_v53  ;;  %v1592_v15 = vpop.permute.xlu0 %1591  ;;  %v5925_v53 = vpack.c.bf16 %v7214_v8, %v7217_v34 }
 0x3fd   :  { %5908 = vmatpush3.bf16.msra.mxu1 %v5905_v36  ;;  %v1590_v63 = vpop.permute.xlu1 %1589  ;;  %v1650_v0 = vsel %vm732_vm3, %v1634_v29, %v1592_v15 }
 0x3fe   :  { %v1649_v48 = vsel %vm732_vm3, %v1633_v30, %v1590_v63  ;;  %5910 = vmatprep.subr.bf16.mxu1 %v5909_v32  ;;  %v7384_v30 = vadd.f32 %v7232_v33, %v7371_v50  ;;  %v1644_v33 = vsel %vm715_vm2, %v6932_v42, %v7302_v5  ;;  %v6253_v42 = vld [vmem:[%s8839_s9] sm:$0xff] }
 0x3ff   :  { %5384 = vmatprep.mubr.msk.f32.mxu1 %vm768_vm4, %v1649_v48 }
 0x400   :  { %5385 = vmatmul.mubr.msk.f32.gmra.mrb[52].mxu1 %vm768_vm4, %v1650_v0  ;;  %v1596_v23 = vpop.permute.xlu0 %1595  ;;  %v5965_v48 = vpack.c.bf16 %v7384_v30, %v7388_v22  ;;  %v7406_v0 = vadd.f32 %v7236_v12, %v7371_v50  ;;  %v7420_v12 = vadd.f32 %v7240_v14, %v7371_v50 }
 0x401   :  { %5912 = vmatpush3.bf16.msra.mxu1 %v5909_v32  ;;  %v1594_v36 = vpop.permute.xlu1 %1593  ;;  %v1652_v56 = vsel %vm732_vm3, %v1636_v39, %v1596_v23  ;;  %v6255_v23 = vld [vmem:[%s8839_s9 + $0x10] sm:$0xff] }
 0x402   :  { %v1651_v58 = vsel %vm732_vm3, %v1635_v37, %v1594_v36  ;;  %5914 = vmatprep.subr.bf16.mxu1 %v5913_v4  ;;  %v5969_v5 = vpack.c.bf16 %v7406_v0, %v7410_v47  ;;  %v5973_v14 = vpack.c.bf16 %v7420_v12, %v7424_v13  ;;  %v6256_v37 = vld [vmem:[%s8839_s9 + $0x18] sm:$0xff]  ;;  %v6257_v36 = vld [vmem:[%s8839_s9 + $0x20] sm:$0xff] }
 0x403   :  { %5387 = vmatprep.mubr.msk.f32.mxu1 %vm768_vm4, %v1651_v58  ;;  %v8918_v39 = vld [vmem:[#allocation5_spill] sm:$0xff] }
 0x404   :  { %5388 = vmatmul.mubr.msk.f32.gmra.mrb[54].mxu1 %vm768_vm4, %v1652_v56  ;;  %v1600_v7 = vpop.permute.xlu0 %1599  ;;  %v7452_v58 = vadd.f32 %v8918_v39, %v7371_v50  ;;  %v7456_v56 = vadd.f32 %v7371_v50, %v8919_v44  ;;  %v6280_v39 = vld [vmem:[%s8839_s9 + $0xd8] sm:$0xff]  ;;  %v6281_v44 = vld [vmem:[%s8839_s9 + $0xe0] sm:$0xff] }
 0x405   :  { %5916 = vmatpush3.bf16.msra.mxu1 %v5913_v4  ;;  %v1598_v61 = vpop.permute.xlu1 %1597  ;;  %v1654_v45 = vsel %vm732_vm3, %v1638_v35, %v1600_v7  ;;  %v7436_v4 = vadd.f32 %v7244_v38, %v7371_v50  ;;  %v6258_v7 = vld [vmem:[%s8839_s9 + $0x28] sm:$0xff] }
 0x406   :  { %v1653_v62 = vsel %vm732_vm3, %v1637_v27, %v1598_v61  ;;  %5918 = vmatprep.subr.bf16.mxu1 %v5917_v26  ;;  %v5981_v27 = vpack.c.bf16 %v7452_v58, %v7456_v56  ;;  %v8920_v61 = vld [vmem:[#allocation7_spill] sm:$0xff] }
 0x407   :  { %5390 = vmatprep.mubr.msk.f32.mxu1 %vm768_vm4, %v1653_v62  ;;  %v5977_v38 = vpack.c.bf16 %v7436_v4, %v7440_v21  ;;  %v7468_v35 = vadd.f32 %v8920_v61, %v7371_v50  ;;  %v8921_v62 = vld [vmem:[#allocation8_spill] sm:$0xff]  ;;  %v6284_v61 = vld [vmem:[%s8839_s9 + $0xf8] sm:$0xff] }
 0x408   :  { %5391 = vmatmul.mubr.msk.f32.gmra.mrb[56].mxu1 %vm768_vm4, %v1654_v45  ;;  %v1604_v46 = vpop.permute.xlu0 %1603  ;;  %v7472_v45 = vadd.f32 %v7371_v50, %v8921_v62  ;;  %v125_v62 = vld [vmem:[%s8767_s2 + $0x8] sm:$0xff] }
 0x409   :  { %5920 = vmatpush3.bf16.msra.mxu1 %v5917_v26  ;;  %v1602_v20 = vpop.permute.xlu1 %1601  ;;  %v1656_v25 = vsel %vm732_vm3, %v1640_v49, %v1604_v46  ;;  %v6259_v26 = vld [vmem:[%s8839_s9 + $0x30] sm:$0xff]  ;;  %v6260_v46 = vld [vmem:[%s8839_s9 + $0x38] sm:$0xff] }
 0x40a   :  { %v1655_v3 = vsel %vm732_vm3, %v1639_v24, %v1602_v20  ;;  %5922 = vmatprep.subr.bf16.mxu1 %v5921_v18  ;;  %v5985_v24 = vpack.c.bf16 %v7468_v35, %v7472_v45  ;;  %v8922_v20 = vld [vmem:[#allocation9_spill] sm:$0xff] }
 0x40b   :  { %5393 = vmatprep.mubr.msk.f32.mxu1 %vm768_vm4, %v1655_v3  ;;  %v7484_v49 = vadd.f32 %v8922_v20, %v7371_v50  ;;  %v8923_v3 = vld [vmem:[#allocation10_spill] sm:$0xff] }
 0x40c   :  { %5394 = vmatmul.mubr.msk.f32.gmra.mrb[58].mxu1 %vm768_vm4, %v1656_v25  ;;  %v1608_v54 = vpop.permute.xlu0 %1607  ;;  %v7488_v25 = vadd.f32 %v7371_v50, %v8923_v3  ;;  %v6286_v20 = vld [vmem:[%s8838_s0] sm:$0xff]  ;;  %v127_v3 = vld [vmem:[%s8767_s2 + $0x18] sm:$0xff] }
 0x40d   :  { %5924 = vmatpush3.bf16.msra.mxu1 %v5921_v18  ;;  %v1606_v43 = vpop.permute.xlu1 %1605  ;;  %v1658_v32 = vsel %vm732_vm3, %v1642_v57, %v1608_v54  ;;  %v6261_v18 = vld [vmem:[%s8839_s9 + $0x40] sm:$0xff]  ;;  %v6262_v54 = vld [vmem:[%s8839_s9 + $0x48] sm:$0xff] }
 0x40e   :  { %v1657_v15 = vsel %vm732_vm3, %v1641_v52, %v1606_v43  ;;  %5926 = vmatprep.subr.bf16.mxu1 %v5925_v53  ;;  %v5989_v52 = vpack.c.bf16 %v7484_v49, %v7488_v25  ;;  %v8924_v43 = vld [vmem:[#allocation11_spill] sm:$0xff] }
 0x40f   :  { %5396 = vmatprep.mubr.msk.f32.mxu1 %vm768_vm4, %v1657_v15  ;;  %v7500_v57 = vadd.f32 %v8924_v43, %v7371_v50  ;;  %v8925_v15 = vld [vmem:[#allocation12_spill] sm:$0xff] }
 0x410   :  { %5397 = vmatmul.mubr.msk.f32.gmra.mrb[60].mxu1 %vm768_vm4, %v1658_v32  ;;  %v1612_v9 = vpop.permute.xlu0 %1611  ;;  %v7504_v32 = vadd.f32 %v7371_v50, %v8925_v15  ;;  %v6266_v50 = vld [vmem:[%s8839_s9 + $0x68] sm:$0xff]  ;;  %v130_v15 = vld [vmem:[%s8767_s2 + $0x30] sm:$0xff] }
 0x411   :  { %5928 = vmatpush3.bf16.msra.mxu1 %v5925_v53  ;;  %v1610_v63 = vpop.permute.xlu1 %1609  ;;  %v1660_v55 = vsel %vm732_vm3, %v1644_v33, %v1612_v9  ;;  %v6263_v53 = vld [vmem:[%s8839_s9 + $0x50] sm:$0xff]  ;;  %v6264_v9 = vld [vmem:[%s8839_s9 + $0x58] sm:$0xff]  ;;  %v129_v43 = vld [vmem:[%s8767_s2 + $0x28] sm:$0xff] }
 0x412   :  { %v1659_v29 = vsel %vm732_vm3, %v1643_v41, %v1610_v63  ;;  %5930 = vmatprep.subr.bf16.mxu1 %v5929_v59  ;;  %v5993_v41 = vpack.c.bf16 %v7500_v57, %v7504_v32  ;;  %v6267_v63 = vld [vmem:[%s8839_s9 + $0x70] sm:$0xff]  ;;  %v6268_v33 = vld [vmem:[%s8839_s9 + $0x78] sm:$0xff] }
 0x413   :  { %5399 = vmatprep.mubr.msk.f32.mxu1 %vm768_vm4, %v1659_v29  ;;  %v6269_v29 = vld [vmem:[%s8839_s9 + $0x80] sm:$0xff] }
 0x414   :  { %5400 = vmatmul.mubr.msk.f32.gmra.mrb[62].mxu1 %vm768_vm4, %v1660_v55  ;;  %v6270_v55 = vld [vmem:[%s8839_s9 + $0x88] sm:$0xff] }
 0x415   :  { %5932 = vmatpush3.bf16.msra.mxu1 %v5929_v59  ;;  %5434 = vmatprep.mubr.f32.mxu1 %v6253_v42  ;;  %v6265_v59 = vld [vmem:[%s8839_s9 + $0x60] sm:$0xff]  ;;  %v6272_v42 = vld [vmem:[%s8839_s9 + $0x98] sm:$0xff] }
 0x416   :  { %5966 = vmatprep.subr.bf16.mxu1 %v5965_v48 }
 0x418   :  { %5435 = vmatmul.mubr.f32.vlgmr.msra.gmra.mrb[64].mxu1 %v6254_v28  ;;  %v6274_v28 = vld [vmem:[%s8839_s9 + $0xa8] sm:$0xff] }
 0x419   :  { %5968 = vmatpush3.bf16.msra.mxu1 %v5965_v48  ;;  %5437 = vmatprep.mubr.f32.mxu1 %v6255_v23  ;;  %v6271_v48 = vld [vmem:[%s8839_s9 + $0x90] sm:$0xff] }
 0x41a   :  { %5970 = vmatprep.subr.bf16.mxu1 %v5969_v5  ;;  %v6275_v23 = vld [vmem:[%s8839_s9 + $0xb0] sm:$0xff] }
 0x41c   :  { %5438 = vmatmul.mubr.f32.gmra.mrb[66].mxu1 %v6256_v37  ;;  %v6277_v37 = vld [vmem:[%s8839_s9 + $0xc0] sm:$0xff] }
 0x41d   :  { %5972 = vmatpush3.bf16.msra.mxu1 %v5969_v5  ;;  %5440 = vmatprep.mubr.f32.mxu1 %v6257_v36  ;;  %v6273_v5 = vld [vmem:[%s8839_s9 + $0xa0] sm:$0xff]  ;;  %v6278_v36 = vld [vmem:[%s8839_s9 + $0xc8] sm:$0xff] }
 0x41e   :  { %5974 = vmatprep.subr.bf16.mxu1 %v5973_v14 }
 0x420   :  { %5441 = vmatmul.mubr.f32.gmra.mrb[68].mxu1 %v6258_v7  ;;  %v6282_v7 = vld [vmem:[%s8839_s9 + $0xe8] sm:$0xff] }
 0x421   :  { %5976 = vmatpush3.bf16.msra.mxu1 %v5973_v14  ;;  %5443 = vmatprep.mubr.f32.mxu1 %v6259_v26  ;;  %v6276_v14 = vld [vmem:[%s8839_s9 + $0xb8] sm:$0xff]  ;;  %v6283_v26 = vld [vmem:[%s8839_s9 + $0xf0] sm:$0xff] }
 0x422   :  { %5978 = vmatprep.subr.bf16.mxu1 %v5977_v38 }
 0x424   :  { %5444 = vmatmul.mubr.f32.gmra.mrb[70].mxu1 %v6260_v46  ;;  %v126_v46 = vld [vmem:[%s8767_s2 + $0x10] sm:$0xff] }
 0x425   :  { %5980 = vmatpush3.bf16.msra.mxu1 %v5977_v38  ;;  %5446 = vmatprep.mubr.f32.mxu1 %v6261_v18  ;;  %v6279_v38 = vld [vmem:[%s8839_s9 + $0xd0] sm:$0xff]  ;;  %v8827_v18 = vmov 1  }
 0x426   :  { %5982 = vmatprep.subr.bf16.mxu1 %v5981_v27  ;;  %6082 = vset.pattern.permute.xlu0 %v8827_v18 }
 0x427   :  { %6081 = vset.pattern.permute.xlu1 %v8827_v18 }
 0x428   :  { %5447 = vmatmul.mubr.f32.gmra.mrb[72].mxu1 %v6262_v54  ;;  %1069 = vperm.xlu1 %6081, %v6286_v20   ;;  %v128_v54 = vld [vmem:[%s8767_s2 + $0x20] sm:$0xff] }
 0x429   :  { %5984 = vmatpush3.bf16.msra.mxu1 %v5981_v27  ;;  %5449 = vmatprep.mubr.f32.mxu1 %v6263_v53  ;;  %v124_v27 = vld [vmem:[%s8767_s2] sm:$0xff]  ;;  %v6287_v53 = vld [vmem:[%s8838_s0 + $0x10] sm:$0xff] }
 0x42a   :  { %5986 = vmatprep.subr.bf16.mxu1 %v5985_v24 }
 0x42c   :  { %5450 = vmatmul.mubr.f32.gmra.mrb[74].mxu1 %v6264_v9  ;;  %v131_v9 = vld [vmem:[%s8767_s2 + $0x38] sm:$0xff] }
 0x42d   :  { %5988 = vmatpush3.bf16.msra.mxu1 %v5985_v24  ;;  %5452 = vmatprep.mubr.f32.mxu1 %v6265_v59  ;;  %v6285_v24 = vld [vmem:[%s8838_s0 + $0x8] sm:$0xff]  ;;  %v132_v59 = vld [vmem:[%s8767_s2 + $0x40] sm:$0xff] }
 0x42e   :  { %5990 = vmatprep.subr.bf16.mxu1 %v5989_v52  ;;  %1073 = vperm.xlu0 %6082, %v6285_v24  }
 0x430   :  { %5453 = vmatmul.mubr.f32.gmra.mrb[76].mxu1 %v6266_v50  ;;  %v134_v50 = vld [vmem:[%s8767_s2 + $0x50] sm:$0xff] }
 0x431   :  { %5992 = vmatpush3.bf16.msra.mxu1 %v5989_v52  ;;  %5455 = vmatprep.mubr.f32.mxu1 %v6267_v63  ;;  %v6288_v52 = vld [vmem:[%s8838_s0 + $0x18] sm:$0xff] }
 0x432   :  { %5994 = vmatprep.subr.bf16.mxu1 %v5993_v41  ;;  %1077 = vperm.xlu0 %6082, %v6287_v53   ;;  %v135_v63 = vld [vmem:[%s8767_s2 + $0x58] sm:$0xff] }
 0x433   :  { %1081 = vperm.xlu1 %6081, %v6288_v52  }
 0x434   :  { %5456 = vmatmul.mubr.f32.gmra.mrb[78].mxu1 %v6268_v33  ;;  %v136_v33 = vld [vmem:[%s8767_s2 + $0x60] sm:$0xff] }
 0x435   :  { %5996 = vmatpush3.bf16.msra.mxu1 %v5993_v41  ;;  %5458 = vmatprep.mubr.f32.mxu1 %v6269_v29  ;;  %v133_v41 = vld [vmem:[%s8767_s2 + $0x48] sm:$0xff] }
 0x436   :  { %v137_v29 = vld [vmem:[%s8767_s2 + $0x68] sm:$0xff] }
 0x438   :  { %5459 = vmatmul.mubr.f32.gmra.mrb[80].mxu1 %v6270_v55  ;;  %v138_v55 = vld [vmem:[%s8767_s2 + $0x70] sm:$0xff] }
 0x439   :  { %5461 = vmatprep.mubr.f32.mxu1 %v6271_v48  ;;  %v139_v48 = vld [vmem:[%s8767_s2 + $0x78] sm:$0xff] }
 0x43c   :  { %5462 = vmatmul.mubr.f32.gmra.mrb[82].mxu1 %v6272_v42  ;;  %v140_v42 = vld [vmem:[%s8767_s2 + $0x80] sm:$0xff] }
 0x43d   :  { %5464 = vmatprep.mubr.f32.mxu1 %v6273_v5  ;;  %v141_v5 = vld [vmem:[%s8767_s2 + $0x88] sm:$0xff] }
 0x440   :  { %5465 = vmatmul.mubr.f32.gmra.mrb[84].mxu1 %v6274_v28  ;;  %v142_v28 = vld [vmem:[%s8767_s2 + $0x90] sm:$0xff] }
 0x441   :  { %5467 = vmatprep.mubr.f32.mxu1 %v6275_v23  ;;  %v143_v23 = vld [vmem:[%s8767_s2 + $0x98] sm:$0xff] }
 0x444   :  { %5468 = vmatmul.mubr.f32.gmra.mrb[86].mxu1 %v6276_v14  ;;  %v144_v14 = vld [vmem:[%s8767_s2 + $0xa0] sm:$0xff] }
 0x445   :  { %5470 = vmatprep.mubr.f32.mxu1 %v6277_v37  ;;  %v145_v37 = vld [vmem:[%s8767_s2 + $0xa8] sm:$0xff] }
 0x448   :  { %5471 = vmatmul.mubr.f32.gmra.mrb[88].mxu1 %v6278_v36  ;;  %v146_v36 = vld [vmem:[%s8767_s2 + $0xb0] sm:$0xff] }
 0x449   :  { %5473 = vmatprep.mubr.f32.mxu1 %v6279_v38  ;;  %v147_v38 = vld [vmem:[%s8767_s2 + $0xb8] sm:$0xff] }
 0x44c   :  { %5474 = vmatmul.mubr.f32.gmra.mrb[90].mxu1 %v6280_v39  ;;  %v148_v39 = vld [vmem:[%s8767_s2 + $0xc0] sm:$0xff] }
 0x44d   :  { %5476 = vmatprep.mubr.f32.mxu1 %v6281_v44  ;;  %v149_v44 = vld [vmem:[%s8767_s2 + $0xc8] sm:$0xff] }
 0x450   :  { %5477 = vmatmul.mubr.f32.gmra.mrb[92].mxu1 %v6282_v7  ;;  %v150_v7 = vld [vmem:[%s8767_s2 + $0xd0] sm:$0xff] }
 0x451   :  { %5479 = vmatprep.mubr.f32.mxu1 %v6283_v26  ;;  %v151_v26 = vld [vmem:[%s8767_s2 + $0xd8] sm:$0xff] }
 0x454   :  { %5480 = vmatmul.mubr.f32.gmra.mrb[94].mxu1 %v6284_v61  ;;  %v153_v61 = vld [vmem:[%s8767_s2 + $0xe8] sm:$0xff] }
 0x455   :  { %5594 = vmatprep.mubr.f32.mxu1 %v124_v27  ;;  %v152_v27 = vld [vmem:[%s8767_s2 + $0xe0] sm:$0xff] }
 0x458   :  { %5595 = vmatmul.mubr.f32.vlgmr.msra.gmra.mrb[96].mxu1 %v125_v62  ;;  %v154_v62 = vld [vmem:[%s8767_s2 + $0xf0] sm:$0xff] }
 0x459   :  { %5597 = vmatprep.mubr.f32.mxu1 %v126_v46  ;;  %v155_v46 = vld [vmem:[%s8767_s2 + $0xf8] sm:$0xff] }
 0x45c   :  { %5598 = vmatmul.mubr.f32.gmra.mrb[98].mxu1 %v127_v3  ;;  %v2258_v3 = vld [vmem:[%s8768_s11] sm:$0xff] }
 0x45d   :  { %5600 = vmatprep.mubr.f32.mxu1 %v128_v54  ;;  %v2259_v54 = vld [vmem:[%s8768_s11 + $0x8] sm:$0xff] }
 0x45e   :  { %v5933_v52 = vpack.c.bf16 %v2259_v54, %v2258_v3 }
 0x460   :  { %5601 = vmatmul.mubr.f32.gmra.mrb[100].mxu1 %v129_v43  ;;  %5934 = vmatprep.subr.bf16.mxu0 %v5933_v52 }
 0x461   :  { %5603 = vmatprep.mubr.f32.mxu1 %v130_v15  ;;  %5936 = vmatpush3.bf16.msra.mxu0 %v5933_v52 }
 0x464   :  { %5604 = vmatmul.mubr.f32.gmra.mrb[102].mxu1 %v131_v9 }
 0x465   :  { %5606 = vmatprep.mubr.f32.mxu1 %v132_v59  ;;  %v2260_v59 = vld [vmem:[%s8768_s11 + $0x10] sm:$0xff] }
 0x468   :  { %5607 = vmatmul.mubr.f32.gmra.mrb[104].mxu1 %v133_v41  ;;  %v2261_v41 = vld [vmem:[%s8768_s11 + $0x18] sm:$0xff] }
 0x469   :  { %5609 = vmatprep.mubr.f32.mxu1 %v134_v50  ;;  %v5937_v50 = vpack.c.bf16 %v2261_v41, %v2260_v59  ;;  %v2264_v59 = vld [vmem:[%s8768_s11 + $0x30] sm:$0xff]  ;;  %v2265_v41 = vld [vmem:[%s8768_s11 + $0x38] sm:$0xff] }
 0x46b   :  { %5938 = vmatprep.subr.bf16.mxu0 %v5937_v50 }
 0x46c   :  { %5610 = vmatmul.mubr.f32.gmra.mrb[106].mxu1 %v135_v63  ;;  %5940 = vmatpush3.bf16.msra.mxu0 %v5937_v50  ;;  %v5945_v50 = vpack.c.bf16 %v2265_v41, %v2264_v59  ;;  %v2269_v59 = vld [vmem:[%s8768_s11 + $0x58] sm:$0xff] }
 0x46d   :  { %5612 = vmatprep.mubr.f32.mxu1 %v136_v33 }
 0x470   :  { %5613 = vmatmul.mubr.f32.gmra.mrb[108].mxu1 %v137_v29  ;;  %v4603_v29 = vld [vmem:[%s8769_s10] ss:$0 sm:$0xff] }
 0x471   :  { %5615 = vmatprep.mubr.f32.mxu1 %v138_v55 }
 0x474   :  { %5616 = vmatmul.mubr.f32.gmra.mrb[110].mxu1 %v139_v48 }
 0x475   :  { %5618 = vmatprep.mubr.f32.mxu1 %v140_v42 }
 0x478   :  { %5619 = vmatmul.mubr.f32.gmra.mrb[112].mxu1 %v141_v5 }
 0x479   :  { %5621 = vmatprep.mubr.f32.mxu1 %v142_v28 }
 0x47c   :  { %5622 = vmatmul.mubr.f32.gmra.mrb[114].mxu1 %v143_v23 }
 0x47d   :  { %5624 = vmatprep.mubr.f32.mxu1 %v144_v14 }
 0x480   :  { %5625 = vmatmul.mubr.f32.gmra.mrb[116].mxu1 %v145_v37 }
 0x481   :  { %5627 = vmatprep.mubr.f32.mxu1 %v146_v36 }
 0x484   :  { %5628 = vmatmul.mubr.f32.gmra.mrb[118].mxu1 %v147_v38 }
 0x485   :  { %5630 = vmatprep.mubr.f32.mxu1 %v148_v39 }
 0x488   :  { %5631 = vmatmul.mubr.f32.gmra.mrb[120].mxu1 %v149_v44  ;;  %v2262_v44 = vld [vmem:[%s8768_s11 + $0x20] sm:$0xff] }
 0x489   :  { %5633 = vmatprep.mubr.f32.mxu1 %v150_v7  ;;  %v2263_v7 = vld [vmem:[%s8768_s11 + $0x28] sm:$0xff] }
 0x48c   :  { %5634 = vmatmul.mubr.f32.gmra.mrb[122].mxu1 %v151_v26 }
 0x48d   :  { %5636 = vmatprep.mubr.f32.mxu1 %v152_v27  ;;  %v5941_v27 = vpack.c.bf16 %v2263_v7, %v2262_v44  ;;  %v2267_v44 = vld [vmem:[%s8768_s11 + $0x48] sm:$0xff] }
 0x48f   :  { %5942 = vmatprep.subr.bf16.mxu0 %v5941_v27 }
 0x490   :  { %5637 = vmatmul.mubr.f32.gmra.mrb[124].mxu1 %v153_v61  ;;  %5944 = vmatpush3.bf16.msra.mxu0 %v5941_v27 }
 0x491   :  { %5639 = vmatprep.mubr.f32.mxu1 %v154_v62  ;;  %5946 = vmatprep.subr.bf16.mxu0 %v5945_v50 }
 0x494   :  { %5640 = vmatmul.mubr.f32.gmra.mrb[126].mxu1 %v155_v46  ;;  %5948 = vmatpush3.bf16.msra.mxu0 %v5945_v50 }
 0x4cb   :  { %v7681_v24 = vpop.f32.mrb[48].mxu1 }
 0x4cc   :  { %8926 = vst [vmem:[#allocation13_spill] sm:$0xff] %v7681_v24  ;;  %v7683_v20 = vpop.f32.mrb[49].mxu1  ;;  %v8946_v24 = vld [vmem:[#allocation3_spill] sm:$0xff] }
 0x4cd   :  { %8927 = vst [vmem:[#allocation14_spill] sm:$0xff] %v7683_v20 }
 0x4cf   :  { %v7691_v53 = vpop.f32.mrb[50].mxu1 }
 0x4d0   :  { %8928 = vst [vmem:[#allocation15_spill] sm:$0xff] %v7691_v53  ;;  %v7693_v43 = vpop.f32.mrb[51].mxu1 }
 0x4d1   :  { %8929 = vst [vmem:[#allocation16_spill] sm:$0xff] %v7693_v43 }
 0x4d3   :  { %v7695_v15 = vpop.f32.mrb[52].mxu1 }
 0x4d4   :  { %8930 = vst [vmem:[#allocation17_spill] sm:$0xff] %v7695_v15  ;;  %v7697_v9 = vpop.f32.mrb[53].mxu1 }
 0x4d5   :  { %8931 = vst [vmem:[#allocation18_spill] sm:$0xff] %v7697_v9 }
 0x4d7   :  { %v7705_v63 = vpop.f32.mrb[54].mxu1 }
 0x4d8   :  { %8932 = vst [vmem:[#allocation19_spill] sm:$0xff] %v7705_v63  ;;  %v7707_v33 = vpop.f32.mrb[55].mxu1 }
 0x4d9   :  { %8933 = vst [vmem:[#allocation20_spill] sm:$0xff] %v7707_v33 }
 0x4db   :  { %v5392_v55 = vpop.f32.mrb[56].mxu1 }
 0x4dc   :  { %v7712_v48 = vadd.f32 %v5392_v55, %v4603_v29  ;;  %v1834_v42 = vpop.f32.mrb[57].mxu1 }
 0x4dd   :  { %v7714_v5 = vadd.f32 %v4603_v29, %v1834_v42 }
 0x4de   :  { %8934 = vst [vmem:[#allocation21_spill] sm:$0xff] %v7712_v48 }
 0x4df   :  { %8935 = vst [vmem:[#allocation22_spill] sm:$0xff] %v7714_v5  ;;  %v5395_v28 = vpop.f32.mrb[58].mxu1 }
 0x4e0   :  { %v7716_v23 = vadd.f32 %v5395_v28, %v4603_v29  ;;  %v1844_v14 = vpop.f32.mrb[59].mxu1 }
 0x4e1   :  { %v7718_v37 = vadd.f32 %v4603_v29, %v1844_v14 }
 0x4e2   :  { %8936 = vst [vmem:[#allocation23_spill] sm:$0xff] %v7716_v23 }
 0x4e3   :  { %8937 = vst [vmem:[#allocation24_spill] sm:$0xff] %v7718_v37  ;;  %v5398_v36 = vpop.f32.mrb[60].mxu1  ;;  %v7874_v37 = vpop.permute.xlu1 %1069 }
 0x4e4   :  { %v7720_v38 = vadd.f32 %v5398_v36, %v4603_v29  ;;  %v1854_v39 = vpop.f32.mrb[61].mxu1 }
 0x4e5   :  { %v7728_v26 = vadd.f32 %v4603_v29, %v1854_v39  ;;  %v2266_v39 = vld [vmem:[%s8768_s11 + $0x40] sm:$0xff] }
 0x4e6   :  { %8938 = vst [vmem:[#allocation25_spill] sm:$0xff] %v7720_v38  ;;  %v5949_v7 = vpack.c.bf16 %v2267_v44, %v2266_v39  ;;  %v2471_v39 = vld [vmem:[%s8770_s13 + $0x8] sm:$0xff] }
 0x4e7   :  { %8939 = vst [vmem:[#allocation26_spill] sm:$0xff] %v7728_v26  ;;  %v5401_v61 = vpop.f32.mrb[62].mxu1 }
 0x4e8   :  { %v7730_v62 = vadd.f32 %v5401_v61, %v4603_v29  ;;  %v1864_v46 = vpop.f32.mrb[63].mxu1  ;;  %5950 = vmatprep.subr.bf16.mxu0 %v5949_v7 }
 0x4e9   :  { %v7732_v3 = vadd.f32 %v4603_v29, %v1864_v46  ;;  %5952 = vmatpush3.bf16.msra.mxu0 %v5949_v7 }
 0x4ea   :  { %8940 = vst [vmem:[#allocation27_spill] sm:$0xff] %v7730_v62 }
 0x4eb   :  { %8941 = vst [vmem:[#allocation28_spill] sm:$0xff] %v7732_v3  ;;  %v5436_v54 = vpop.f32.mrb[64].mxu1 }
 0x4ec   :  { %2116 = vrot.lane.b32.xlu0 %v5436_v54, %s6307_s8  ;;  %v1939_v52 = vpop.f32.mrb[65].mxu1 }
 0x4ed   :  { %2114 = vrot.lane.b32.xlu1 %v1939_v52, %s6307_s8  ;;  %v2268_v52 = vld [vmem:[%s8768_s11 + $0x50] sm:$0xff] }
 0x4ee   :  { %v5953_v41 = vpack.c.bf16 %v2269_v59, %v2268_v52 }
 0x4ef   :  { %v5439_v55 = vpop.f32.mrb[66].mxu1 }
 0x4f0   :  { %2120 = vrot.lane.b32.xlu0 %v5439_v55, %s6307_s8  ;;  %v1949_v29 = vpop.f32.mrb[67].mxu1  ;;  %5954 = vmatprep.subr.bf16.mxu0 %v5953_v41 }
 0x4f1   :  { %2118 = vrot.lane.b32.xlu1 %v1949_v29, %s6307_s8  ;;  %5956 = vmatpush3.bf16.msra.mxu0 %v5953_v41 }
 0x4f3   :  { %v5442_v42 = vpop.f32.mrb[68].mxu1 }
 0x4f4   :  { %2124 = vrot.lane.b32.xlu0 %v5442_v42, %s6307_s8  ;;  %v1959_v28 = vpop.f32.mrb[69].mxu1 }
 0x4f5   :  { %2122 = vrot.lane.b32.xlu1 %v1959_v28, %s6307_s8 }
 0x4f7   :  { %v5445_v14 = vpop.f32.mrb[70].mxu1 }
 0x4f8   :  { %2128 = vrot.lane.b32.xlu0 %v5445_v14, %s6307_s8  ;;  %v1969_v36 = vpop.f32.mrb[71].mxu1 }
 0x4f9   :  { %2126 = vrot.lane.b32.xlu1 %v1969_v36, %s6307_s8  ;;  %v2470_v36 = vld [vmem:[%s8770_s13] sm:$0xff] }
 0x4fa   :  { %v7775_v7 = vpack.c.bf16 %v2471_v39, %v2470_v36 }
 0x4fb   :  { %v5448_v27 = vpop.f32.mrb[72].mxu1 }
 0x4fc   :  { %2132 = vrot.lane.b32.xlu0 %v5448_v27, %s6307_s8  ;;  %v1979_v61 = vpop.f32.mrb[73].mxu1  ;;  %5958 = vmatprep.subr.bf16.mxu0 %v7775_v7 }
 0x4fd   :  { %2130 = vrot.lane.b32.xlu1 %v1979_v61, %s6307_s8 }
 0x4ff   :  { %v5451_v46 = vpop.f32.mrb[74].mxu1 }
 0x500   :  { %2136 = vrot.lane.b32.xlu0 %v5451_v46, %s6307_s8  ;;  %v1989_v54 = vpop.f32.mrb[75].mxu1 }
 0x501   :  { %2134 = vrot.lane.b32.xlu1 %v1989_v54, %s6307_s8 }
 0x503   :  { %v5454_v50 = vpop.f32.mrb[76].mxu1 }
 0x504   :  { %v1999_v55 = vpop.f32.mrb[77].mxu1 }
 0x505   :  { %2140 = vrot.lane.b32.xlu1 %v5454_v50, %s6307_s8 }
 0x507   :  { %v5457_v29 = vpop.f32.mrb[78].mxu1 }
 0x508   :  { %v2009_v42 = vpop.f32.mrb[79].mxu1 }
 0x509   :  { %2138 = vrot.lane.b32.xlu1 %v1999_v55, %s6307_s8  ;;  %2142 = vrot.lane.b32.xlu0 %v2009_v42, %s6307_s8 }
 0x50b   :  { %v5460_v28 = vpop.f32.mrb[80].mxu1 }
 0x50c   :  { %v2019_v14 = vpop.f32.mrb[81].mxu1 }
 0x50d   :  { %2144 = vrot.lane.b32.xlu1 %v5457_v29, %s6307_s8  ;;  %2180 = vrot.lane.b32.xlu0 %v5460_v28, %s6308_s5 }
 0x50f   :  { %v5463_v44 = vpop.f32.mrb[82].mxu1 }
 0x510   :  { %v2029_v27 = vpop.f32.mrb[83].mxu1 }
 0x511   :  { %2178 = vrot.lane.b32.xlu1 %v2019_v14, %s6308_s5  ;;  %2184 = vrot.lane.b32.xlu0 %v5463_v44, %s6308_s5  ;;  %v6289_v44 = vld [vmem:[%s8838_s0 + $0x20] sm:$0xff] }
 0x513   :  { %v5466_v61 = vpop.f32.mrb[84].mxu1 }
 0x514   :  { %v2039_v46 = vpop.f32.mrb[85].mxu1 }
 0x515   :  { %2182 = vrot.lane.b32.xlu1 %v2029_v27, %s6308_s5  ;;  %2188 = vrot.lane.b32.xlu0 %v5466_v61, %s6308_s5 }
 0x517   :  { %v5469_v54 = vpop.f32.mrb[86].mxu1 }
 0x518   :  { %v2049_v52 = vpop.f32.mrb[87].mxu1 }
 0x519   :  { %2186 = vrot.lane.b32.xlu1 %v2039_v46, %s6308_s5  ;;  %2192 = vrot.lane.b32.xlu0 %v5469_v54, %s6308_s5  ;;  %v6290_v46 = vld [vmem:[%s8838_s0 + $0x28] sm:$0xff]  ;;  %v6291_v54 = vld [vmem:[%s8838_s0 + $0x30] sm:$0xff] }
 0x51b   :  { %v5472_v59 = vpop.f32.mrb[88].mxu1 }
 0x51c   :  { %v2059_v41 = vpop.f32.mrb[89].mxu1 }
 0x51d   :  { %2190 = vrot.lane.b32.xlu1 %v2049_v52, %s6308_s5  ;;  %2196 = vrot.lane.b32.xlu0 %v5472_v59, %s6308_s5 }
 0x51f   :  { %v5475_v50 = vpop.f32.mrb[90].mxu1 }
 0x520   :  { %v2069_v55 = vpop.f32.mrb[91].mxu1 }
 0x521   :  { %2194 = vrot.lane.b32.xlu1 %v2059_v41, %s6308_s5  ;;  %2200 = vrot.lane.b32.xlu0 %v5475_v50, %s6308_s5  ;;  %v6292_v41 = vld [vmem:[%s8838_s0 + $0x38] sm:$0xff]  ;;  %v6293_v50 = vld [vmem:[%s8838_s0 + $0x40] sm:$0xff] }
 0x523   :  { %v5478_v29 = vpop.f32.mrb[92].mxu1 }
 0x524   :  { %v2079_v42 = vpop.f32.mrb[93].mxu1 }
 0x525   :  { %2198 = vrot.lane.b32.xlu1 %v2069_v55, %s6308_s5  ;;  %2202 = vrot.lane.b32.xlu0 %v2079_v42, %s6308_s5  ;;  %v6294_v42 = vld [vmem:[%s8838_s0 + $0x48] sm:$0xff] }
 0x527   :  { %v5481_v28 = vpop.f32.mrb[94].mxu1 }
 0x528   :  { %v2089_v14 = vpop.f32.mrb[95].mxu1 }
 0x529   :  { %2204 = vrot.lane.b32.xlu1 %v5478_v29, %s6308_s5  ;;  %2206 = vrot.lane.b32.xlu0 %v2089_v14, %s6308_s5 }
 0x52b   :  { %v7792_v36 = vpop.f32.mrb[96].mxu1 }
 0x52c   :  { %v7794_v39 = vpop.f32.mrb[97].mxu1 }
 0x52d   :  { %2208 = vrot.lane.b32.xlu1 %v5481_v28, %s6308_s5  ;;  %1085 = vperm.xlu0 %6082, %v6289_v44   ;;  %v6295_v28 = vld [vmem:[%s8838_s0 + $0x50] sm:$0xff] }
 0x52f   :  { %v7800_v27 = vpop.f32.mrb[98].mxu1 }
 0x530   :  { %v7802_v61 = vpop.f32.mrb[99].mxu1 }
 0x531   :  { %1089 = vperm.xlu1 %6081, %v6290_v46   ;;  %1093 = vperm.xlu0 %6082, %v6291_v54   ;;  %v6296_v46 = vld [vmem:[%s8838_s0 + $0x58] sm:$0xff]  ;;  %v6297_v54 = vld [vmem:[%s8838_s0 + $0x60] sm:$0xff] }
 0x533   :  { %v7810_v52 = vpop.f32.mrb[100].mxu1 }
 0x534   :  { %v7812_v59 = vpop.f32.mrb[101].mxu1 }
 0x535   :  { %1097 = vperm.xlu1 %6081, %v6292_v41   ;;  %1101 = vperm.xlu0 %6082, %v6293_v50  }
 0x537   :  { %v7820_v55 = vpop.f32.mrb[102].mxu1 }
 0x538   :  { %v7822_v29 = vpop.f32.mrb[103].mxu1 }
 0x539   :  { %1105 = vperm.xlu1 %6081, %v6294_v42   ;;  %1109 = vperm.xlu0 %6082, %v6295_v28   ;;  %v6298_v42 = vld [vmem:[%s8838_s0 + $0x68] sm:$0xff]  ;;  %v6299_v28 = vld [vmem:[%s8838_s0 + $0x70] sm:$0xff] }
 0x53b   :  { %v7830_v14 = vpop.f32.mrb[104].mxu1 }
 0x53c   :  { %v7832_v44 = vpop.f32.mrb[105].mxu1 }
 0x53d   :  { %1113 = vperm.xlu1 %6081, %v6296_v46   ;;  %1117 = vperm.xlu0 %6082, %v6297_v54   ;;  %v6300_v54 = vld [vmem:[%s8838_s0 + $0x78] sm:$0xff] }
 0x53f   :  { %v7840_v41 = vpop.f32.mrb[106].mxu1 }
 0x540   :  { %v7842_v50 = vpop.f32.mrb[107].mxu1 }
 0x541   :  { %1121 = vperm.xlu1 %6081, %v6298_v42   ;;  %1125 = vperm.xlu0 %6082, %v6299_v28   ;;  %v8944_v28 = vmov 0  }
 0x543   :  { %v7850_v46 = vpop.f32.mrb[108].mxu1 }
 0x544   :  { %v7852_v18 = vpop.f32.mrb[109].mxu1 }
 0x545   :  { %1129 = vperm.xlu1 %6081, %v6300_v54   ;;  %2915 = vrot.lane.b32.xlu0 %v7388_v22, %s6307_s8  ;;  %v7872_v22 = vpop.permute.xlu0 %1073 }
 0x547   :  { %v7859_v3 = vpop.f32.mrb[110].mxu1 }
 0x548   :  { %8942 = vst [vmem:[#allocation29_spill] sm:$0xff] %v7859_v3  ;;  %v7861_v42 = vpop.f32.mrb[111].mxu1 }
 0x549   :  { %8943 = vst [vmem:[#allocation30_spill] sm:$0xff] %v7861_v42  ;;  %2917 = vrot.lane.b32.xlu1 %v7384_v30, %s6307_s8  ;;  %v3059_v42 = vld [vmem:[%s8771_s15] sm:$0xff] }
 0x54a   :  { %6083 = vset.pattern.permute.xlu1 %v8944_v28 }
 0x54b   :  { %v5620_v62 = vpop.f32.mrb[112].mxu1 }
 0x54c   :  { %v2820_v26 = vpop.f32.mrb[113].mxu1 }
 0x54d   :  { %2981 = vrot.lane.b32.xlu1 %v5620_v62, %s6308_s5  ;;  %2979 = vrot.lane.b32.xlu0 %v2820_v26, %s6308_s5  ;;  %v7878_v26 = vpop.permute.xlu0 %1077 }
 0x54f   :  { %v5623_v38 = vpop.f32.mrb[114].mxu1 }
 0x550   :  { %v2830_v54 = vpop.f32.mrb[115].mxu1 }
 0x551   :  { %2921 = vrot.lane.b32.xlu1 %v7406_v0, %s6307_s8  ;;  %2919 = vrot.lane.b32.xlu0 %v7410_v47, %s6307_s8  ;;  %v7884_v0 = vpop.permute.xlu1 %1081 }
 0x553   :  { %v5626_v30 = vpop.f32.mrb[116].mxu1 }
 0x554   :  { %v2840_v23 = vpop.f32.mrb[117].mxu1 }
 0x555   :  { %2985 = vrot.lane.b32.xlu1 %v5623_v38, %s6308_s5  ;;  %2983 = vrot.lane.b32.xlu0 %v2830_v54, %s6308_s5 }
 0x557   :  { %v5629_v62 = vpop.f32.mrb[118].mxu1 }
 0x558   :  { %v2850_v5 = vpop.f32.mrb[119].mxu1 }
 0x559   :  { %2925 = vrot.lane.b32.xlu1 %v7420_v12, %s6307_s8  ;;  %2923 = vrot.lane.b32.xlu0 %v7424_v13, %s6307_s8 }
 0x55b   :  { %v5632_v47 = vpop.f32.mrb[120].mxu1 }
 0x55c   :  { %v2860_v48 = vpop.f32.mrb[121].mxu1 }
 0x55d   :  { %2989 = vrot.lane.b32.xlu1 %v5626_v30, %s6308_s5  ;;  %2987 = vrot.lane.b32.xlu0 %v2840_v23, %s6308_s5 }
 0x55e   :  { %v2117_v38 = vpop.permute.xlu0 %2116 }
 0x55f   :  { %v2115_v54 = vpop.permute.xlu1 %2114  ;;  %v5635_v33 = vpop.f32.mrb[122].mxu1  ;;  %v2227_v28 = vsel %vm715_vm2, %v8946_v24, %v2117_v38 }
 0x560   :  { %v2870_v63 = vpop.f32.mrb[123].mxu1 }
 0x561   :  { %2929 = vrot.lane.b32.xlu1 %v7436_v4, %s6307_s8  ;;  %2927 = vrot.lane.b32.xlu0 %v7440_v21, %s6307_s8 }
 0x562   :  { %v2121_v12 = vpop.permute.xlu0 %2120 }
 0x563   :  { %v2119_v13 = vpop.permute.xlu1 %2118  ;;  %v5638_v9 = vpop.f32.mrb[124].mxu1 }
 0x564   :  { %v2880_v15 = vpop.f32.mrb[125].mxu1  ;;  %v2228_v24 = vsel %vm715_vm2, %v7130_v19, %v2119_v13 }
 0x565   :  { %2993 = vrot.lane.b32.xlu1 %v5629_v62, %s6308_s5  ;;  %2991 = vrot.lane.b32.xlu0 %v2850_v5, %s6308_s5 }
 0x566   :  { %v2125_v30 = vpop.permute.xlu0 %2124 }
 0x567   :  { %v2123_v23 = vpop.permute.xlu1 %2122  ;;  %v5641_v43 = vpop.f32.mrb[126].mxu1 }
 0x568   :  { %v2890_v53 = vpop.f32.mrb[127].mxu1  ;;  %v2230_v19 = vsel %vm715_vm2, %v7156_v17, %v2123_v23 }
 0x569   :  { %2933 = vrot.lane.b32.xlu1 %v7452_v58, %s6307_s8  ;;  %2931 = vrot.lane.b32.xlu0 %v7456_v56, %s6307_s8 }
 0x56a   :  { %v7898_v4 = vpop.permute.xlu0 %2128 }
 0x56b   :  { %v2127_v21 = vpop.permute.xlu1 %2126 }
 0x56d   :  { %2997 = vrot.lane.b32.xlu1 %v5632_v47, %s6308_s5  ;;  %2995 = vrot.lane.b32.xlu0 %v2860_v48, %s6308_s5 }
 0x56e   :  { %v7904_v5 = vpop.permute.xlu0 %2132 }
 0x56f   :  { %v7902_v62 = vpop.permute.xlu1 %2130 }
 0x570   :  { %v2234_v23 = vsel %vm715_vm2, %v7189_v1, %v7902_v62 }
 0x571   :  { %2937 = vrot.lane.b32.xlu1 %v7468_v35, %s6307_s8  ;;  %2935 = vrot.lane.b32.xlu0 %v7472_v45, %s6307_s8 }
 0x572   :  { %v7914_v56 = vpop.permute.xlu0 %2136 }
 0x573   :  { %v7910_v58 = vpop.permute.xlu1 %2134 }
 0x574   :  { %v2236_v1 = vsel %vm715_vm2, %v7209_v6, %v7910_v58 }
 0x575   :  { %3001 = vrot.lane.b32.xlu1 %v5635_v33, %s6308_s5  ;;  %2999 = vrot.lane.b32.xlu0 %v2870_v63, %s6308_s5 }
 0x577   :  { %v7916_v47 = vpop.permute.xlu1 %2140 }
 0x579   :  { %2941 = vrot.lane.b32.xlu1 %v7484_v49, %s6307_s8  ;;  %2939 = vrot.lane.b32.xlu0 %v7488_v25, %s6307_s8  ;;  %v2472_v49 = vld [vmem:[%s8770_s13 + $0x10] sm:$0xff]  ;;  %v2473_v25 = vld [vmem:[%s8770_s13 + $0x18] sm:$0xff] }
 0x57a   :  { %v5961_v3 = vpack.c.bf16 %v2473_v25, %v2472_v49 }
 0x57b   :  { %v7922_v35 = vpop.permute.xlu1 %2138  ;;  %v7924_v48 = vpop.permute.xlu0 %2142 }
 0x57d   :  { %3005 = vrot.lane.b32.xlu1 %v5638_v9, %s6308_s5  ;;  %3003 = vrot.lane.b32.xlu0 %v2880_v15, %s6308_s5  ;;  %v8945_v9 = vld [vmem:[#allocation4_spill] sm:$0xff] }
 0x57e   :  { %v2226_v15 = vsel %vm715_vm2, %v8945_v9, %v2115_v54  ;;  %v3060_v54 = vld [vmem:[%s8771_s15 + $0x8] sm:$0xff] }
 0x57f   :  { %v7928_v45 = vpop.permute.xlu1 %2144  ;;  %v2181_v63 = vpop.permute.xlu0 %2180  ;;  %v7962_v49 = vpack.c.bf16 %v3060_v54, %v3059_v42 }
 0x581   :  { %2945 = vrot.lane.b32.xlu1 %v7500_v57, %s6307_s8  ;;  %2943 = vrot.lane.b32.xlu0 %v7504_v32, %s6307_s8  ;;  %v2243_v32 = vsel %vm732_vm3, %v2227_v28, %v2181_v63 }
 0x583   :  { %v2179_v33 = vpop.permute.xlu1 %2178  ;;  %v2185_v20 = vpop.permute.xlu0 %2184 }
 0x584   :  { %v2242_v57 = vsel %vm732_vm3, %v2226_v15, %v2179_v33 }
 0x585   :  { %5506 = vmatprep.mubr.msk.f32.mxu0 %vm768_vm4, %v2242_v57  ;;  %3007 = vrot.lane.b32.xlu0 %v2890_v53, %s6308_s5  ;;  %v2229_v53 = vsel %vm715_vm2, %v7142_v51, %v2121_v12  ;;  %v2231_v51 = vsel %vm715_vm2, %v7159_v60, %v2125_v30 }
 0x586   :  { %5507 = vmatmul.mubr.msk.f32.vlgmr.msra.gmra.mrb[48].mxu0 %vm768_vm4, %v2243_v32  ;;  %3009 = vrot.lane.b32.xlu1 %v5641_v43, %s6308_s5  ;;  %v2245_v25 = vsel %vm732_vm3, %v2229_v53, %v2185_v20  ;;  %v2232_v20 = vsel %vm715_vm2, %v7173_v40, %v2127_v21  ;;  %v2235_v21 = vsel %vm715_vm2, %v7184_v16, %v7904_v5  ;;  %v6301_v32 = vld [vmem:[%s8870_s4] sm:$0x7] }
 0x587   :  { %v2183_v28 = vpop.permute.xlu1 %2182  ;;  %v2189_v38 = vpop.permute.xlu0 %2188  ;;  %5960 = vmatpush3.bf16.msra.mxu0 %v7775_v7  ;;  %v2237_v16 = vsel %vm715_vm2, %v7200_v2, %v7914_v56  ;;  %v2239_v2 = vsel %vm715_vm2, %v7214_v8, %v7916_v47  ;;  %v2241_v47 = vsel %vm715_vm2, %v7226_v10, %v7928_v45  ;;  %v3062_v10 = vld [vmem:[%s8771_s15 + $0x18] sm:$0xff] }
 0x588   :  { %v2244_v63 = vsel %vm732_vm3, %v2228_v24, %v2183_v28  ;;  %5962 = vmatprep.subr.bf16.mxu0 %v5961_v3  ;;  %v2247_v42 = vsel %vm732_vm3, %v2231_v51, %v2189_v38  ;;  %v2238_v24 = vsel %vm715_vm2, %v7217_v34, %v7922_v35  ;;  %v6302_v34 = vld [vmem:[%s8872_s30] sm:$0x7] }
 0x589   :  { %5509 = vmatprep.mubr.msk.f32.mxu0 %vm768_vm4, %v2244_v63  ;;  %v2240_v63 = vsel %vm715_vm2, %v7229_v11, %v7924_v48  ;;  %v3061_v48 = vld [vmem:[%s8771_s15 + $0x10] sm:$0xff]  ;;  %v3063_v51 = vld [vmem:[%s8771_s15 + $0x20] sm:$0xff] }
 0x58a   :  { %5510 = vmatmul.mubr.msk.f32.gmra.mrb[50].mxu0 %vm768_vm4, %v2245_v25 }
 0x58b   :  { %v2187_v43 = vpop.permute.xlu1 %2186  ;;  %v2193_v13 = vpop.permute.xlu0 %2192  ;;  %5964 = vmatpush3.bf16.msra.mxu0 %v5961_v3  ;;  %v2233_v3 = vsel %vm715_vm2, %v7170_v31, %v7898_v4  ;;  %v8947_v4 = vld [vmem:[#allocation31_spill] sm:$0xff] }
 0x58c   :  { %v2246_v7 = vsel %vm732_vm3, %v2230_v19, %v2187_v43  ;;  %5998 = vmatprep.subr.bf16.mxu0 %v7962_v49  ;;  %v2249_v30 = vsel %vm732_vm3, %v2233_v3, %v2193_v13  ;;  %v1134_v15 = vsub.s32 1, %v8947_v4  ;;  %v6001_v13 = vpack.c.bf16 %v3062_v10, %v3061_v48 }
 0x58d   :  { %5512 = vmatprep.mubr.msk.f32.mxu0 %vm768_vm4, %v2246_v7  ;;  %v3064_v7 = vld [vmem:[%s8771_s15 + $0x28] sm:$0xff] }
 0x58e   :  { %5513 = vmatmul.mubr.msk.f32.gmra.mrb[52].mxu0 %vm768_vm4, %v2247_v42  ;;  %v8006_v54 = vrot.slane %v6301_v32, %v1134_v15  ;;  %v8023_v35 = vrot.slane %v6302_v34, %v1134_v15  ;;  %v3069_v15 = vld [vmem:[%s8771_s15 + $0x50] sm:$0xff] }
 0x58f   :  { %v2191_v17 = vpop.permute.xlu1 %2190  ;;  %v2197_v12 = vpop.permute.xlu0 %2196 }
 0x590   :  { %v2248_v60 = vsel %vm732_vm3, %v2232_v20, %v2191_v17  ;;  %v2251_v33 = vsel %vm732_vm3, %v2235_v21, %v2197_v12  ;;  %v1136_v53 = vmul.f32 %v8006_v54, %v7874_v37  ;;  %v1137_v19 = vmul.f32 %v8006_v54, %v7872_v22  ;;  %v3065_v20 = vld [vmem:[%s8771_s15 + $0x30] sm:$0xff]  ;;  %v3066_v17 = vld [vmem:[%s8771_s15 + $0x38] sm:$0xff] }
 0x591   :  { %5515 = vmatprep.mubr.msk.f32.mxu0 %vm768_vm4, %v2248_v60  ;;  %v1138_v11 = vmul.f32 %v8006_v54, %v7878_v26  ;;  %v1139_v45 = vmul.f32 %v8006_v54, %v7884_v0  ;;  %v6005_v0 = vpack.c.bf16 %v3064_v7, %v3063_v51  ;;  %v6009_v3 = vpack.c.bf16 %v3066_v17, %v3065_v20  ;;  %v3067_v60 = vld [vmem:[%s8771_s15 + $0x40] sm:$0xff] }
 0x592   :  { %5516 = vmatmul.mubr.msk.f32.gmra.mrb[54].mxu0 %vm768_vm4, %v2249_v30  ;;  %v1156_v43 = vadd.f32 %v8023_v35, %v1136_v53  ;;  %v1157_v22 = vadd.f32 %v8023_v35, %v1137_v19  ;;  %v3068_v30 = vld [vmem:[%s8771_s15 + $0x48] sm:$0xff] }
 0x593   :  { %v2195_v9 = vpop.permute.xlu1 %2194  ;;  %v2201_v40 = vpop.permute.xlu0 %2200  ;;  %v1158_v26 = vadd.f32 %v8023_v35, %v1138_v11  ;;  %v1159_v42 = vadd.f32 %v8023_v35, %v1139_v45  ;;  %v6013_v21 = vpack.c.bf16 %v3068_v30, %v3067_v60 }
 0x594   :  { %v2250_v31 = vsel %vm732_vm3, %v2234_v23, %v2195_v9  ;;  %v2253_v6 = vsel %vm732_vm3, %v2237_v16, %v2201_v40 }
 0x595   :  { %5518 = vmatprep.mubr.msk.f32.mxu0 %vm768_vm4, %v2250_v31 }
 0x596   :  { %5519 = vmatmul.mubr.msk.f32.gmra.mrb[56].mxu0 %vm768_vm4, %v2251_v33  ;;  %v3070_v33 = vld [vmem:[%s8771_s15 + $0x58] sm:$0xff] }
 0x597   :  { %v2199_v62 = vpop.permute.xlu1 %2198  ;;  %v2203_v57 = vpop.permute.xlu0 %2202 }
 0x598   :  { %v2252_v5 = vsel %vm732_vm3, %v2236_v1, %v2199_v62  ;;  %v2254_v58 = vsel %vm732_vm3, %v2238_v24, %v2203_v57 }
 0x599   :  { %5521 = vmatprep.mubr.msk.f32.mxu0 %vm768_vm4, %v2252_v5  ;;  %v6017_v5 = vpack.c.bf16 %v3070_v33, %v3069_v15 }
 0x59a   :  { %5522 = vmatmul.mubr.msk.f32.gmra.mrb[58].mxu0 %vm768_vm4, %v2253_v6 }
 0x59b   :  { %v2205_v56 = vpop.permute.xlu1 %2204  ;;  %5524 = vmatprep.mubr.msk.f32.mxu0 %vm768_vm4, %v2254_v58  ;;  %v2207_v28 = vpop.permute.xlu0 %2206 }
 0x59c   :  { %v2255_v38 = vsel %vm732_vm3, %v2239_v2, %v2205_v56  ;;  %v2256_v8 = vsel %vm732_vm3, %v2240_v63, %v2207_v28 }
 0x59e   :  { %5525 = vmatmul.mubr.msk.f32.gmra.mrb[60].mxu0 %vm768_vm4, %v2255_v38 }
 0x59f   :  { %v2209_v25 = vpop.permute.xlu1 %2208  ;;  %5527 = vmatprep.mubr.msk.f32.mxu0 %vm768_vm4, %v2256_v8 }
 0x5a0   :  { %v2257_v37 = vsel %vm732_vm3, %v2241_v47, %v2209_v25 }
 0x5a2   :  { %5528 = vmatmul.mubr.msk.f32.gmra.mrb[62].mxu0 %vm768_vm4, %v2257_v37 }
 0x5a3   :  { %5538 = vmatprep.mubr.msk.f32.mxu0 %vm715_vm2, %v1156_v43 }
 0x5a6   :  { %5539 = vmatmul.mubr.msk.f32.vlgmr.msra.gmra.mrb[64].mxu0 %vm715_vm2, %v1157_v22 }
 0x5a7   :  { %5541 = vmatprep.mubr.msk.f32.mxu0 %vm715_vm2, %v1158_v26  ;;  %6000 = vmatpush3.bf16.msra.mxu0 %v7962_v49 }
 0x5a8   :  { %6002 = vmatprep.subr.bf16.mxu0 %v6001_v13 }
 0x5aa   :  { %5542 = vmatmul.mubr.msk.f32.gmra.mrb[66].mxu0 %vm715_vm2, %v1159_v42 }
 0x5ab   :  { %6004 = vmatpush3.bf16.msra.mxu0 %v6001_v13 }
 0x5ac   :  { %v1086_v12 = vpop.permute.xlu0 %1085  ;;  %6006 = vmatprep.subr.bf16.mxu0 %v6005_v0 }
 0x5ad   :  { %v1140_v49 = vmul.f32 %v8006_v54, %v1086_v12 }
 0x5af   :  { %v1160_v23 = vadd.f32 %v8023_v35, %v1140_v49  ;;  %6008 = vmatpush3.bf16.msra.mxu0 %v6005_v0 }
 0x5b0   :  { %v1090_v9 = vpop.permute.xlu1 %1089  ;;  %v1094_v40 = vpop.permute.xlu0 %1093  ;;  %6010 = vmatprep.subr.bf16.mxu0 %v6009_v3 }
 0x5b1   :  { %v1141_v31 = vmul.f32 %v8006_v54, %v1090_v9  ;;  %v1142_v4 = vmul.f32 %v8006_v54, %v1094_v40  ;;  %5544 = vmatprep.mubr.msk.f32.mxu0 %vm715_vm2, %v1160_v23 }
 0x5b3   :  { %v1161_v1 = vadd.f32 %v8023_v35, %v1141_v31  ;;  %v1162_v62 = vadd.f32 %v8023_v35, %v1142_v4  ;;  %6012 = vmatpush3.bf16.msra.mxu0 %v6009_v3 }
 0x5b4   :  { %v1098_v57 = vpop.permute.xlu1 %1097  ;;  %v1102_v16 = vpop.permute.xlu0 %1101  ;;  %6014 = vmatprep.subr.bf16.mxu0 %v6013_v21 }
 0x5b5   :  { %v1143_v32 = vmul.f32 %v8006_v54, %v1098_v57  ;;  %v1144_v24 = vmul.f32 %v8006_v54, %v1102_v16  ;;  %5545 = vmatmul.mubr.msk.f32.gmra.mrb[68].mxu0 %vm715_vm2, %v1161_v1 }
 0x5b6   :  { %5547 = vmatprep.mubr.msk.f32.mxu0 %vm715_vm2, %v1162_v62 }
 0x5b7   :  { %v1163_v6 = vadd.f32 %v8023_v35, %v1143_v32  ;;  %v1164_v58 = vadd.f32 %v8023_v35, %v1144_v24  ;;  %6016 = vmatpush3.bf16.msra.mxu0 %v6013_v21 }
 0x5b8   :  { %v1106_v2 = vpop.permute.xlu1 %1105  ;;  %v1110_v56 = vpop.permute.xlu0 %1109  ;;  %6018 = vmatprep.subr.bf16.mxu0 %v6017_v5 }
 0x5b9   :  { %v1145_v28 = vmul.f32 %v8006_v54, %v1106_v2  ;;  %v1146_v38 = vmul.f32 %v8006_v54, %v1110_v56  ;;  %5548 = vmatmul.mubr.msk.f32.gmra.mrb[70].mxu0 %vm715_vm2, %v1163_v6 }
 0x5ba   :  { %5550 = vmatprep.mubr.msk.f32.mxu0 %vm715_vm2, %v1164_v58 }
 0x5bb   :  { %v1165_v34 = vadd.f32 %v8023_v35, %v1145_v28  ;;  %v1166_v53 = vadd.f32 %v8023_v35, %v1146_v38  ;;  %6020 = vmatpush3.bf16.msra.mxu0 %v6017_v5 }
 0x5bc   :  { %v1114_v63 = vpop.permute.xlu1 %1113  ;;  %v1118_v8 = vpop.permute.xlu0 %1117 }
 0x5bd   :  { %v1147_v47 = vmul.f32 %v8006_v54, %v1114_v63  ;;  %v1148_v25 = vmul.f32 %v8006_v54, %v1118_v8  ;;  %5551 = vmatmul.mubr.msk.f32.gmra.mrb[72].mxu0 %vm715_vm2, %v1165_v34 }
 0x5be   :  { %5553 = vmatprep.mubr.msk.f32.mxu0 %vm715_vm2, %v1166_v53 }
 0x5bf   :  { %v1167_v19 = vadd.f32 %v8023_v35, %v1147_v47  ;;  %v1168_v37 = vadd.f32 %v8023_v35, %v1148_v25 }
 0x5c0   :  { %v1122_v43 = vpop.permute.xlu1 %1121  ;;  %v1126_v11 = vpop.permute.xlu0 %1125 }
 0x5c1   :  { %v1149_v48 = vmul.f32 %v8006_v54, %v1122_v43  ;;  %v1150_v10 = vmul.f32 %v8006_v54, %v1126_v11  ;;  %5554 = vmatmul.mubr.msk.f32.gmra.mrb[74].mxu0 %vm715_vm2, %v1167_v19 }
 0x5c2   :  { %5556 = vmatprep.mubr.msk.f32.mxu0 %vm715_vm2, %v1168_v37 }
 0x5c3   :  { %v1169_v22 = vadd.f32 %v8023_v35, %v1149_v48  ;;  %v1170_v45 = vadd.f32 %v8023_v35, %v1150_v10 }
 0x5c4   :  { %v1130_v13 = vpop.permute.xlu1 %1129  ;;  %v2916_v26 = vpop.permute.xlu0 %2915 }
 0x5c5   :  { %v1151_v51 = vmul.f32 %v8006_v54, %v1130_v13  ;;  %5557 = vmatmul.mubr.msk.f32.gmra.mrb[76].mxu0 %vm715_vm2, %v1169_v22  ;;  %v3027_v42 = vsel %vm715_vm2, %v7794_v39, %v2916_v26  ;;  %v8948_v22 = vld [vmem:[#allocation30_spill] sm:$0xff] }
 0x5c6   :  { %5559 = vmatprep.mubr.msk.f32.mxu0 %vm715_vm2, %v1170_v45 }
 0x5c7   :  { %v1171_v7 = vadd.f32 %v8023_v35, %v1151_v51  ;;  %v8949_v51 = vld [vmem:[#allocation29_spill] sm:$0xff] }
 0x5c8   :  { %v2918_v0 = vpop.permute.xlu1 %2917  ;;  %v2980_v20 = vpop.permute.xlu0 %2979 }
 0x5c9   :  { %v3043_v17 = vsel %vm732_vm3, %v3027_v42, %v2980_v20  ;;  %5560 = vmatmul.mubr.msk.f32.gmra.mrb[78].mxu0 %vm715_vm2, %v1171_v7  ;;  %v3028_v54 = vsel %vm715_vm2, %v7792_v36, %v2918_v0  ;;  %v3415_v0 = vld [vmem:[%s8772_s17] sm:$0xff]  ;;  %v3416_v20 = vld [vmem:[%s8772_s17 + $0x8] sm:$0xff] }
 0x5ca   :  { %5666 = vmatprep.mubr.msk.f32.mxu0 %vm768_vm4, %v3043_v17  ;;  %v6021_v17 = vpack.c.bf16 %v3416_v20, %v3415_v0 }
 0x5cc   :  { %v2982_v12 = vpop.permute.xlu1 %2981  ;;  %v2920_v3 = vpop.permute.xlu0 %2919  ;;  %6022 = vmatprep.subr.bf16.mxu0 %v6021_v17 }
 0x5cd   :  { %v3044_v49 = vsel %vm732_vm3, %v3028_v54, %v2982_v12  ;;  %v3029_v39 = vsel %vm715_vm2, %v7802_v61, %v2920_v3  ;;  %v3417_v54 = vld [vmem:[%s8772_s17 + $0x10] sm:$0xff]  ;;  %v3418_v12 = vld [vmem:[%s8772_s17 + $0x18] sm:$0xff] }
 0x5ce   :  { %5667 = vmatmul.mubr.msk.f32.vlgmr.msra.gmra.mrb[80].mxu0 %vm768_vm4, %v3044_v49  ;;  %v6025_v3 = vpack.c.bf16 %v3418_v12, %v3417_v54 }
 0x5cf   :  { %6024 = vmatpush3.bf16.msra.mxu0 %v6021_v17 }
 0x5d0   :  { %v2922_v35 = vpop.permute.xlu1 %2921  ;;  %v2984_v60 = vpop.permute.xlu0 %2983  ;;  %6026 = vmatprep.subr.bf16.mxu0 %v6025_v3 }
 0x5d1   :  { %v3045_v30 = vsel %vm732_vm3, %v3029_v39, %v2984_v60  ;;  %v3030_v23 = vsel %vm715_vm2, %v7800_v27, %v2922_v35 }
 0x5d2   :  { %5669 = vmatprep.mubr.msk.f32.mxu0 %vm768_vm4, %v3045_v30 }
 0x5d3   :  { %6028 = vmatpush3.bf16.msra.mxu0 %v6025_v3 }
 0x5d4   :  { %v2986_v9 = vpop.permute.xlu1 %2985  ;;  %v2924_v36 = vpop.permute.xlu0 %2923 }
 0x5d5   :  { %v3046_v40 = vsel %vm732_vm3, %v3030_v23, %v2986_v9  ;;  %v3031_v21 = vsel %vm715_vm2, %v7812_v59, %v2924_v36 }
 0x5d6   :  { %5670 = vmatmul.mubr.msk.f32.gmra.mrb[82].mxu0 %vm768_vm4, %v3046_v40  ;;  %v4620_v40 = vld [vmem:[%s8773_s12] ss:$0 sm:$0xff] }
 0x5d8   :  { %v2926_v31 = vpop.permute.xlu1 %2925  ;;  %v2988_v61 = vpop.permute.xlu0 %2987 }
 0x5d9   :  { %v3047_v4 = vsel %vm732_vm3, %v3031_v21, %v2988_v61  ;;  %v3032_v15 = vsel %vm715_vm2, %v7810_v52, %v2926_v31 }
 0x5da   :  { %5672 = vmatprep.mubr.msk.f32.mxu0 %vm768_vm4, %v3047_v4 }
 0x5dc   :  { %v2990_v33 = vpop.permute.xlu1 %2989  ;;  %v2928_v27 = vpop.permute.xlu0 %2927 }
 0x5dd   :  { %v3048_v1 = vsel %vm732_vm3, %v3032_v15, %v2990_v33  ;;  %v3033_v62 = vsel %vm715_vm2, %v7822_v29, %v2928_v27 }
 0x5de   :  { %5673 = vmatmul.mubr.msk.f32.gmra.mrb[84].mxu0 %vm768_vm4, %v3048_v1 }
 0x5e0   :  { %v2930_v57 = vpop.permute.xlu1 %2929  ;;  %v2992_v59 = vpop.permute.xlu0 %2991 }
 0x5e1   :  { %v3049_v16 = vsel %vm732_vm3, %v3033_v62, %v2992_v59  ;;  %v3034_v5 = vsel %vm715_vm2, %v7820_v55, %v2930_v57 }
 0x5e2   :  { %5675 = vmatprep.mubr.msk.f32.mxu0 %vm768_vm4, %v3049_v16 }
 0x5e4   :  { %v2994_v32 = vpop.permute.xlu1 %2993  ;;  %v2932_v52 = vpop.permute.xlu0 %2931 }
 0x5e5   :  { %v3050_v24 = vsel %vm732_vm3, %v3034_v5, %v2994_v32  ;;  %v3035_v6 = vsel %vm715_vm2, %v7832_v44, %v2932_v52 }
 0x5e6   :  { %5676 = vmatmul.mubr.msk.f32.gmra.mrb[86].mxu0 %vm768_vm4, %v3050_v24 }
 0x5e8   :  { %v2934_v58 = vpop.permute.xlu1 %2933  ;;  %v2996_v29 = vpop.permute.xlu0 %2995 }
 0x5e9   :  { %v3051_v2 = vsel %vm732_vm3, %v3035_v6, %v2996_v29  ;;  %v3036_v56 = vsel %vm715_vm2, %v7830_v14, %v2934_v58 }
 0x5ea   :  { %5678 = vmatprep.mubr.msk.f32.mxu0 %vm768_vm4, %v3051_v2 }
 0x5ec   :  { %v2998_v28 = vpop.permute.xlu1 %2997  ;;  %v2936_v55 = vpop.permute.xlu0 %2935 }
 0x5ed   :  { %v3052_v38 = vsel %vm732_vm3, %v3036_v56, %v2998_v28  ;;  %v3037_v34 = vsel %vm715_vm2, %v7842_v50, %v2936_v55 }
 0x5ee   :  { %5679 = vmatmul.mubr.msk.f32.gmra.mrb[88].mxu0 %vm768_vm4, %v3052_v38 }
 0x5f0   :  { %v2938_v53 = vpop.permute.xlu1 %2937  ;;  %v3000_v44 = vpop.permute.xlu0 %2999 }
 0x5f1   :  { %v3053_v63 = vsel %vm732_vm3, %v3037_v34, %v3000_v44  ;;  %v3038_v8 = vsel %vm715_vm2, %v7840_v41, %v2938_v53  ;;  %v4637_v34 = vld [vmem:[%s8774_s14] ss:$0 sm:$0xff] }
 0x5f2   :  { %5681 = vmatprep.mubr.msk.f32.mxu0 %vm768_vm4, %v3053_v63 }
 0x5f4   :  { %v3002_v47 = vpop.permute.xlu1 %3001  ;;  %v2940_v14 = vpop.permute.xlu0 %2939 }
 0x5f5   :  { %v3054_v25 = vsel %vm732_vm3, %v3038_v8, %v3002_v47  ;;  %v3039_v19 = vsel %vm715_vm2, %v7852_v18, %v2940_v14 }
 0x5f6   :  { %5682 = vmatmul.mubr.msk.f32.gmra.mrb[90].mxu0 %vm768_vm4, %v3054_v25 }
 0x5f8   :  { %v2942_v37 = vpop.permute.xlu1 %2941  ;;  %v3004_v50 = vpop.permute.xlu0 %3003 }
 0x5f9   :  { %v3055_v43 = vsel %vm732_vm3, %v3039_v19, %v3004_v50  ;;  %v3040_v11 = vsel %vm715_vm2, %v7850_v46, %v2942_v37 }
 0x5fa   :  { %5684 = vmatprep.mubr.msk.f32.mxu0 %vm768_vm4, %v3055_v43 }
 0x5fc   :  { %v3006_v48 = vpop.permute.xlu1 %3005  ;;  %v2944_v41 = vpop.permute.xlu0 %2943 }
 0x5fd   :  { %v3056_v10 = vsel %vm732_vm3, %v3040_v11, %v3006_v48  ;;  %v3041_v45 = vsel %vm715_vm2, %v8948_v22, %v2944_v41 }
 0x5fe   :  { %5685 = vmatmul.mubr.msk.f32.gmra.mrb[92].mxu0 %vm768_vm4, %v3056_v10 }
 0x600   :  { %v2946_v13 = vpop.permute.xlu1 %2945  ;;  %v3008_v18 = vpop.permute.xlu0 %3007 }
 0x601   :  { %v3057_v26 = vsel %vm732_vm3, %v3041_v45, %v3008_v18  ;;  %v3042_v7 = vsel %vm715_vm2, %v8949_v51, %v2946_v13  ;;  %v8268_v45 = vld [vmem:[%s8775_s16] ss:$0 sm:$0xff] }
 0x602   :  { %5687 = vmatprep.mubr.msk.f32.mxu0 %vm768_vm4, %v3057_v26 }
 0x604   :  { %v3010_v42 = vpop.permute.xlu1 %3009 }
 0x605   :  { %v3058_v46 = vsel %vm732_vm3, %v3042_v7, %v3010_v42 }
 0x606   :  { %5688 = vmatmul.mubr.msk.f32.gmra.mrb[94].mxu0 %vm768_vm4, %v3058_v46 }
 0x659   :  { %v8195_v49 = vpop.f32.mrb[48].mxu0 }
 0x65a   :  { %v8197_v39 = vpop.f32.mrb[49].mxu0 }
 0x65d   :  { %v8199_v35 = vpop.f32.mrb[50].mxu0 }
 0x65e   :  { %v8201_v60 = vpop.f32.mrb[51].mxu0 }
 0x661   :  { %v8203_v30 = vpop.f32.mrb[52].mxu0 }
 0x662   :  { %v8205_v23 = vpop.f32.mrb[53].mxu0 }
 0x665   :  { %v8207_v9 = vpop.f32.mrb[54].mxu0 }
 0x666   :  { %v8209_v36 = vpop.f32.mrb[55].mxu0 }
 0x669   :  { %v5520_v21 = vpop.f32.mrb[56].mxu0 }
 0x66a   :  { %v8214_v31 = vadd.f32 %v5520_v21, %v4620_v40  ;;  %v2431_v61 = vpop.f32.mrb[57].mxu0 }
 0x66b   :  { %v8216_v4 = vadd.f32 %v4620_v40, %v2431_v61 }
 0x66d   :  { %v5523_v15 = vpop.f32.mrb[58].mxu0 }
 0x66e   :  { %v8218_v33 = vadd.f32 %v5523_v15, %v4620_v40  ;;  %v2441_v27 = vpop.f32.mrb[59].mxu0 }
 0x66f   :  { %v8220_v1 = vadd.f32 %v4620_v40, %v2441_v27 }
 0x671   :  { %v5526_v62 = vpop.f32.mrb[60].mxu0 }
 0x672   :  { %v8222_v57 = vadd.f32 %v5526_v62, %v4620_v40  ;;  %v2451_v59 = vpop.f32.mrb[61].mxu0 }
 0x673   :  { %v8224_v16 = vadd.f32 %v4620_v40, %v2451_v59 }
 0x675   :  { %v5529_v5 = vpop.f32.mrb[62].mxu0 }
 0x676   :  { %v8226_v32 = vadd.f32 %v5529_v5, %v4620_v40  ;;  %v2461_v52 = vpop.f32.mrb[63].mxu0 }
 0x677   :  { %v8228_v24 = vadd.f32 %v4620_v40, %v2461_v52 }
 0x679   :  { %v8230_v6 = vpop.f32.mrb[64].mxu0 }
 0x67a   :  { %v8232_v58 = vpop.f32.mrb[65].mxu0 }
 0x67d   :  { %v8234_v29 = vpop.f32.mrb[66].mxu0 }
 0x67e   :  { %v8236_v2 = vpop.f32.mrb[67].mxu0 }
 0x688   :  { %v8238_v56 = vpop.f32.mrb[68].mxu0 }
 0x689   :  { %v8240_v28 = vpop.f32.mrb[69].mxu0 }
 0x68c   :  { %v8242_v55 = vpop.f32.mrb[70].mxu0 }
 0x68d   :  { %v8244_v38 = vpop.f32.mrb[71].mxu0 }
 0x690   :  { %v5552_v53 = vpop.f32.mrb[72].mxu0 }
 0x691   :  { %v8249_v44 = vadd.f32 %v5552_v53, %v4637_v34  ;;  %v2635_v63 = vpop.f32.mrb[73].mxu0 }
 0x692   :  { %v8251_v8 = vadd.f32 %v4637_v34, %v2635_v63 }
 0x694   :  { %v5555_v47 = vpop.f32.mrb[74].mxu0 }
 0x695   :  { %v8253_v14 = vadd.f32 %v5555_v47, %v4637_v34  ;;  %v2645_v25 = vpop.f32.mrb[75].mxu0 }
 0x696   :  { %v8255_v19 = vadd.f32 %v4637_v34, %v2645_v25 }
 0x698   :  { %v5558_v37 = vpop.f32.mrb[76].mxu0 }
 0x699   :  { %v8257_v50 = vadd.f32 %v5558_v37, %v4637_v34  ;;  %v2655_v43 = vpop.f32.mrb[77].mxu0 }
 0x69a   :  { %v8259_v11 = vadd.f32 %v4637_v34, %v2655_v43 }
 0x69c   :  { %v5561_v48 = vpop.f32.mrb[78].mxu0 }
 0x69d   :  { %v8261_v41 = vadd.f32 %v5561_v48, %v4637_v34  ;;  %v2665_v10 = vpop.f32.mrb[79].mxu0 }
 0x69e   :  { %v8263_v22 = vadd.f32 %v4637_v34, %v2665_v10 }
 0x6a1   :  { %v5668_v13 = vpop.f32.mrb[80].mxu0 }
 0x6a2   :  { %v3198_v18 = vadd.f32 %v5668_v13, %v8268_v45  ;;  %v3192_v26 = vpop.f32.mrb[81].mxu0 }
 0x6a3   :  { %v3193_v51 = vadd.f32 %v8268_v45, %v3192_v26 }
 0x6a4   :  { %v3288_v7 = vmul.f32 0.044715, %v3198_v18 }
 0x6a5   :  { %v3287_v42 = vmul.f32 0.044715, %v3193_v51 }
 0x6a6   :  { %v3304_v46 = vmul.f32 %v3288_v7, %v3198_v18 }
 0x6a7   :  { %v3303_v0 = vmul.f32 %v3287_v42, %v3193_v51 }
 0x6a8   :  { %v3320_v20 = vmul.f32 %v3304_v46, %v3198_v18 }
 0x6a9   :  { %v3319_v17 = vmul.f32 %v3303_v0, %v3193_v51  ;;  %v5671_v54 = vpop.f32.mrb[82].mxu0 }
 0x6aa   :  { %v3336_v12 = vadd.f32 %v3320_v20, %v3198_v18  ;;  %v8273_v3 = vadd.f32 %v5671_v54, %v8268_v45  ;;  %v3202_v40 = vpop.f32.mrb[83].mxu0 }
 0x6ab   :  { %v3335_v21 = vadd.f32 %v3319_v17, %v3193_v51  ;;  %v3203_v61 = vadd.f32 %v8268_v45, %v3202_v40 }
 0x6ac   :  { %v3352_v15 = vmul.f32 0.7978846, %v3336_v12  ;;  %v3290_v27 = vmul.f32 0.044715, %v8273_v3 }
 0x6ad   :  { %v3289_v62 = vmul.f32 0.044715, %v3203_v61  ;;  %v3351_v59 = vmul.f32 0.7978846, %v3335_v21 }
 0x6ae   :  { %6125 = vtanh.f32 %v3352_v15  ;;  %v3306_v5 = vmul.f32 %v3290_v27, %v8273_v3 }
 0x6af   :  { %v3305_v52 = vmul.f32 %v3289_v62, %v3203_v61  ;;  %6127 = vtanh.f32 %v3351_v59  ;;  %v3271_v62 = vmul.f32 0.5, %v3193_v51 }
 0x6b0   :  { %v3322_v34 = vmul.f32 %v3306_v5, %v8273_v3  ;;  %v3272_v5 = vmul.f32 0.5, %v3198_v18 }
 0x6b1   :  { %v3321_v53 = vmul.f32 %v3305_v52, %v3203_v61  ;;  %v5674_v63 = vpop.f32.mrb[84].mxu0 }
 0x6b2   :  { %v3338_v47 = vadd.f32 %v3322_v34, %v8273_v3  ;;  %v8281_v25 = vadd.f32 %v5674_v63, %v8268_v45  ;;  %v3212_v37 = vpop.f32.mrb[85].mxu0 }
 0x6b3   :  { %v3337_v43 = vadd.f32 %v3321_v53, %v3203_v61  ;;  %v8284_v48 = vadd.f32 %v8268_v45, %v3212_v37 }
 0x6b4   :  { %v3292_v10 = vmul.f32 0.044715, %v8281_v25  ;;  %v3354_v13 = vmul.f32 0.7978846, %v3338_v47 }
 0x6b5   :  { %v3291_v26 = vmul.f32 0.044715, %v8284_v48  ;;  %v3353_v7 = vmul.f32 0.7978846, %v3337_v43 }
 0x6b6   :  { %v3308_v42 = vmul.f32 %v3292_v10, %v8281_v25  ;;  %6129 = vtanh.f32 %v3354_v13 }
 0x6b7   :  { %v3307_v46 = vmul.f32 %v3291_v26, %v8284_v48  ;;  %6131 = vtanh.f32 %v3353_v7 }
 0x6b8   :  { %v6126_v0 = vpop.eup %6125  ;;  %v3324_v20 = vmul.f32 %v3308_v42, %v8281_v25 }
 0x6b9   :  { %v6128_v17 = vpop.eup %6127  ;;  %v3384_v54 = vadd.f32 1.0, %v6126_v0  ;;  %v3323_v12 = vmul.f32 %v3307_v46, %v8284_v48  ;;  %v5677_v40 = vpop.f32.mrb[86].mxu0 }
 0x6ba   :  { %v3340_v21 = vadd.f32 %v3324_v20, %v8281_v25  ;;  %v8294_v15 = vadd.f32 %v5677_v40, %v8268_v45  ;;  %v3222_v27 = vpop.f32.mrb[87].mxu0  ;;  %v3383_v59 = vadd.f32 1.0, %v6128_v17 }
 0x6bb   :  { %v3339_v52 = vadd.f32 %v3323_v12, %v8284_v48  ;;  %v8298_v34 = vadd.f32 %v8268_v45, %v3222_v27  ;;  %v3400_v37 = vmul.f32 %v3384_v54, %v3272_v5  ;;  %v3273_v12 = vmul.f32 0.5, %v3203_v61 }
 0x6bc   :  { %v3294_v53 = vmul.f32 0.044715, %v8294_v15  ;;  %v3399_v63 = vmul.f32 %v3383_v59, %v3271_v62  ;;  %v3356_v47 = vmul.f32 0.7978846, %v3340_v21  ;;  %v3274_v62 = vmul.f32 0.5, %v8273_v3 }
 0x6bd   :  { %v3293_v43 = vmul.f32 0.044715, %v8298_v34  ;;  %v3355_v10 = vmul.f32 0.7978846, %v3339_v52 }
 0x6be   :  { %v3310_v13 = vmul.f32 %v3294_v53, %v8294_v15  ;;  %5698 = vmatprep.mubr.msk.f32.mxu0 %vm715_vm2, %v3399_v63  ;;  %6133 = vtanh.f32 %v3356_v47 }
 0x6bf   :  { %v3309_v18 = vmul.f32 %v3293_v43, %v8298_v34  ;;  %5699 = vmatmul.mubr.msk.f32.vlgmr.msra.gmra.mrb[96].mxu0 %vm715_vm2, %v3400_v37  ;;  %6135 = vtanh.f32 %v3355_v10 }
 0x6c0   :  { %v6130_v51 = vpop.eup %6129  ;;  %v3326_v26 = vmul.f32 %v3310_v13, %v8294_v15 }
 0x6c1   :  { %v6132_v7 = vpop.eup %6131  ;;  %v3325_v42 = vmul.f32 %v3309_v18, %v8298_v34  ;;  %v5680_v46 = vpop.f32.mrb[88].mxu0  ;;  %v3386_v0 = vadd.f32 1.0, %v6130_v51 }
 0x6c2   :  { %v3342_v20 = vadd.f32 %v3326_v26, %v8294_v15  ;;  %v8310_v17 = vadd.f32 %v5680_v46, %v8268_v45  ;;  %v3232_v54 = vpop.f32.mrb[89].mxu0  ;;  %v3385_v40 = vadd.f32 1.0, %v6132_v7  ;;  %v3275_v46 = vmul.f32 0.5, %v8284_v48 }
 0x6c3   :  { %v3341_v21 = vadd.f32 %v3325_v42, %v8298_v34  ;;  %v8314_v27 = vadd.f32 %v8268_v45, %v3232_v54  ;;  %v3402_v63 = vmul.f32 %v3386_v0, %v3274_v62 }
 0x6c4   :  { %v3296_v59 = vmul.f32 0.044715, %v8310_v17  ;;  %v3401_v5 = vmul.f32 %v3385_v40, %v3273_v12  ;;  %v3358_v52 = vmul.f32 0.7978846, %v3342_v20  ;;  %v3276_v12 = vmul.f32 0.5, %v8281_v25 }
 0x6c5   :  { %v3295_v53 = vmul.f32 0.044715, %v8314_v27  ;;  %v3357_v47 = vmul.f32 0.7978846, %v3341_v21 }
 0x6c6   :  { %v3312_v37 = vmul.f32 %v3296_v59, %v8310_v17  ;;  %5701 = vmatprep.mubr.msk.f32.mxu0 %vm715_vm2, %v3401_v5  ;;  %6137 = vtanh.f32 %v3358_v52 }
 0x6c7   :  { %v3311_v61 = vmul.f32 %v3295_v53, %v8314_v27  ;;  %5702 = vmatmul.mubr.msk.f32.gmra.mrb[98].mxu0 %vm715_vm2, %v3402_v63  ;;  %6139 = vtanh.f32 %v3357_v47 }
 0x6c8   :  { %v6134_v43 = vpop.eup %6133  ;;  %v3328_v3 = vmul.f32 %v3312_v37, %v8310_v17 }
 0x6c9   :  { %v6136_v10 = vpop.eup %6135  ;;  %v3327_v13 = vmul.f32 %v3311_v61, %v8314_v27  ;;  %v5683_v18 = vpop.f32.mrb[90].mxu0  ;;  %v3388_v51 = vadd.f32 1.0, %v6134_v43 }
 0x6ca   :  { %v3344_v26 = vadd.f32 %v3328_v3, %v8310_v17  ;;  %v8327_v7 = vadd.f32 %v5683_v18, %v8268_v45  ;;  %v3242_v42 = vpop.f32.mrb[91].mxu0  ;;  %v3387_v0 = vadd.f32 1.0, %v6136_v10  ;;  %v3277_v18 = vmul.f32 0.5, %v8298_v34 }
 0x6cb   :  { %v3343_v20 = vadd.f32 %v3327_v13, %v8314_v27  ;;  %v8332_v54 = vadd.f32 %v8268_v45, %v3242_v42  ;;  %v3404_v5 = vmul.f32 %v3388_v51, %v3276_v12 }
 0x6cc   :  { %v3298_v40 = vmul.f32 0.044715, %v8327_v7  ;;  %v3403_v21 = vmul.f32 %v3387_v0, %v3275_v46  ;;  %v3360_v62 = vmul.f32 0.7978846, %v3344_v26  ;;  %v3278_v46 = vmul.f32 0.5, %v8294_v15 }
 0x6cd   :  { %v3297_v59 = vmul.f32 0.044715, %v8332_v54  ;;  %v3359_v52 = vmul.f32 0.7978846, %v3343_v20 }
 0x6ce   :  { %v3314_v53 = vmul.f32 %v3298_v40, %v8327_v7  ;;  %5704 = vmatprep.mubr.msk.f32.mxu0 %vm715_vm2, %v3403_v21  ;;  %6141 = vtanh.f32 %v3360_v62 }
 0x6cf   :  { %v3313_v48 = vmul.f32 %v3297_v59, %v8332_v54  ;;  %5705 = vmatmul.mubr.msk.f32.gmra.mrb[100].mxu0 %vm715_vm2, %v3404_v5  ;;  %6143 = vtanh.f32 %v3359_v52 }
 0x6d0   :  { %v6138_v63 = vpop.eup %6137  ;;  %v3330_v25 = vmul.f32 %v3314_v53, %v8327_v7 }
 0x6d1   :  { %v6140_v47 = vpop.eup %6139  ;;  %v3329_v37 = vmul.f32 %v3313_v48, %v8332_v54  ;;  %v5686_v61 = vpop.f32.mrb[92].mxu0  ;;  %v3390_v43 = vadd.f32 1.0, %v6138_v63 }
 0x6d2   :  { %v3346_v3 = vadd.f32 %v3330_v25, %v8327_v7  ;;  %v8345_v10 = vadd.f32 %v5686_v61, %v8268_v45  ;;  %v3252_v13 = vpop.f32.mrb[93].mxu0  ;;  %v3389_v51 = vadd.f32 1.0, %v6140_v47  ;;  %v3279_v61 = vmul.f32 0.5, %v8314_v27 }
 0x6d3   :  { %v3345_v26 = vadd.f32 %v3329_v37, %v8332_v54  ;;  %v3253_v42 = vadd.f32 %v8268_v45, %v3252_v13  ;;  %v3406_v21 = vmul.f32 %v3390_v43, %v3278_v46 }
 0x6d4   :  { %v3300_v0 = vmul.f32 0.044715, %v8345_v10  ;;  %v3405_v20 = vmul.f32 %v3389_v51, %v3277_v18  ;;  %v3362_v12 = vmul.f32 0.7978846, %v3346_v3  ;;  %v3280_v18 = vmul.f32 0.5, %v8310_v17 }
 0x6d5   :  { %v3299_v40 = vmul.f32 0.044715, %v3253_v42  ;;  %v3361_v62 = vmul.f32 0.7978846, %v3345_v26 }
 0x6d6   :  { %v3316_v59 = vmul.f32 %v3300_v0, %v8345_v10  ;;  %5707 = vmatprep.mubr.msk.f32.mxu0 %vm715_vm2, %v3405_v20  ;;  %6145 = vtanh.f32 %v3362_v12 }
 0x6d7   :  { %v3315_v34 = vmul.f32 %v3299_v40, %v3253_v42  ;;  %5708 = vmatmul.mubr.msk.f32.gmra.mrb[102].mxu0 %vm715_vm2, %v3406_v21  ;;  %6147 = vtanh.f32 %v3361_v62 }
 0x6d8   :  { %v6142_v5 = vpop.eup %6141  ;;  %v3332_v52 = vmul.f32 %v3316_v59, %v8345_v10 }
 0x6d9   :  { %v6144_v15 = vpop.eup %6143  ;;  %v3331_v53 = vmul.f32 %v3315_v34, %v3253_v42  ;;  %v5689_v48 = vpop.f32.mrb[94].mxu0  ;;  %v3392_v63 = vadd.f32 1.0, %v6142_v5  ;;  %v3281_v5 = vmul.f32 0.5, %v8332_v54  ;;  %v3284_v54 = vmul.f32 0.5, %v8345_v10 }
 0x6da   :  { %v3348_v25 = vadd.f32 %v3332_v52, %v8345_v10  ;;  %v3268_v47 = vadd.f32 %v5689_v48, %v8268_v45  ;;  %v3262_v37 = vpop.f32.mrb[95].mxu0  ;;  %v3391_v43 = vadd.f32 1.0, %v6144_v15  ;;  %v4671_v10 = vld [vmem:[%s8776_s18] ss:$0 sm:$0xff] }
 0x6db   :  { %v3347_v3 = vadd.f32 %v3331_v53, %v3253_v42  ;;  %v3263_v13 = vadd.f32 %v8268_v45, %v3262_v37  ;;  %v3408_v20 = vmul.f32 %v3392_v63, %v3280_v18  ;;  %v3282_v53 = vmul.f32 0.5, %v8327_v7 }
 0x6dc   :  { %v3302_v51 = vmul.f32 0.044715, %v3268_v47  ;;  %v3407_v26 = vmul.f32 %v3391_v43, %v3279_v61  ;;  %v3364_v46 = vmul.f32 0.7978846, %v3348_v25  ;;  %v3283_v18 = vmul.f32 0.5, %v3253_v42 }
 0x6dd   :  { %v3301_v0 = vmul.f32 0.044715, %v3263_v13  ;;  %v3363_v12 = vmul.f32 0.7978846, %v3347_v3 }
 0x6de   :  { %v3318_v40 = vmul.f32 %v3302_v51, %v3268_v47  ;;  %5710 = vmatprep.mubr.msk.f32.mxu0 %vm715_vm2, %v3407_v26  ;;  %6149 = vtanh.f32 %v3364_v46 }
 0x6df   :  { %v3317_v21 = vmul.f32 %v3301_v0, %v3263_v13  ;;  %5711 = vmatmul.mubr.msk.f32.gmra.mrb[104].mxu0 %vm715_vm2, %v3408_v20  ;;  %6151 = vtanh.f32 %v3363_v12  ;;  %v3285_v12 = vmul.f32 0.5, %v3263_v13 }
 0x6e0   :  { %v6146_v27 = vpop.eup %6145  ;;  %v3334_v62 = vmul.f32 %v3318_v40, %v3268_v47 }
 0x6e1   :  { %v6148_v59 = vpop.eup %6147  ;;  %v3333_v45 = vmul.f32 %v3317_v21, %v3263_v13  ;;  %v3394_v34 = vadd.f32 1.0, %v6146_v27  ;;  %v3286_v21 = vmul.f32 0.5, %v3268_v47 }
 0x6e2   :  { %v3350_v17 = vadd.f32 %v3334_v62, %v3268_v47  ;;  %v3393_v52 = vadd.f32 1.0, %v6148_v59 }
 0x6e3   :  { %v3349_v15 = vadd.f32 %v3333_v45, %v3263_v13  ;;  %v3410_v25 = vmul.f32 %v3394_v34, %v3282_v53 }
 0x6e4   :  { %v3409_v48 = vmul.f32 %v3393_v52, %v3281_v5  ;;  %v3366_v63 = vmul.f32 0.7978846, %v3350_v17 }
 0x6e5   :  { %v3365_v37 = vmul.f32 0.7978846, %v3349_v15 }
 0x6e6   :  { %5713 = vmatprep.mubr.msk.f32.mxu0 %vm715_vm2, %v3409_v48  ;;  %6153 = vtanh.f32 %v3366_v63 }
 0x6e7   :  { %5714 = vmatmul.mubr.msk.f32.gmra.mrb[106].mxu0 %vm715_vm2, %v3410_v25  ;;  %6155 = vtanh.f32 %v3365_v37 }
 0x6e8   :  { %v6150_v61 = vpop.eup %6149 }
 0x6e9   :  { %v6152_v43 = vpop.eup %6151  ;;  %v3396_v3 = vadd.f32 1.0, %v6150_v61 }
 0x6ea   :  { %v3395_v51 = vadd.f32 1.0, %v6152_v43 }
 0x6eb   :  { %v3412_v46 = vmul.f32 %v3396_v3, %v3284_v54 }
 0x6ec   :  { %v3411_v26 = vmul.f32 %v3395_v51, %v3283_v18 }
 0x6ee   :  { %5716 = vmatprep.mubr.msk.f32.mxu0 %vm715_vm2, %v3411_v26 }
 0x6ef   :  { %5717 = vmatmul.mubr.msk.f32.gmra.mrb[108].mxu0 %vm715_vm2, %v3412_v46 }
 0x6f0   :  { %v6154_v7 = vpop.eup %6153 }
 0x6f1   :  { %v6156_v0 = vpop.eup %6155  ;;  %v3398_v20 = vadd.f32 1.0, %v6154_v7 }
 0x6f2   :  { %v3397_v40 = vadd.f32 1.0, %v6156_v0 }
 0x6f3   :  { %v3414_v62 = vmul.f32 %v3398_v20, %v3286_v21 }
 0x6f4   :  { %v3413_v27 = vmul.f32 %v3397_v40, %v3285_v12 }
 0x6f6   :  { %5719 = vmatprep.mubr.msk.f32.mxu0 %vm715_vm2, %v3413_v27 }
 0x6f7   :  { %5720 = vmatmul.mubr.msk.f32.gmra.mrb[110].mxu0 %vm715_vm2, %v3414_v62 }
 0x792   :  { %v5700_v42 = vpop.f32.mrb[96].mxu0 }
 0x793   :  { %v8375_v59 = vadd.f32 %v5700_v42, %v4671_v10  ;;  %v3540_v45 = vpop.f32.mrb[97].mxu0 }
 0x794   :  { %v8377_v34 = vadd.f32 %v4671_v10, %v3540_v45 }
 0x795   :  { %v3622_v13 = vsel %vm164_vm1, %v8375_v59, -inf }
 0x796   :  { %3623 = vmax.xlane.f32.xlu1 %v3622_v13  ;;  %v3619_v47 = vsel %vm164_vm1, %v8377_v34, -inf }
 0x797   :  { %3620 = vmax.xlane.f32.xlu0 %v3619_v47 }
 0x79a   :  { %v5703_v17 = vpop.f32.mrb[98].mxu0 }
 0x79b   :  { %v3550_v5 = vpop.f32.mrb[99].mxu0  ;;  %v8385_v15 = vadd.f32 %v5703_v17, %v4671_v10 }
 0x79c   :  { %v8383_v52 = vadd.f32 %v4671_v10, %v3550_v5 }
 0x79d   :  { %v3628_v63 = vsel %vm164_vm1, %v8385_v15, -inf }
 0x79e   :  { %v3625_v53 = vsel %vm164_vm1, %v8383_v52, -inf }
 0x79f   :  { %3626 = vmax.xlane.f32.xlu0 %v3625_v53 }
 0x7a2   :  { %v5706_v48 = vpop.f32.mrb[100].mxu0 }
 0x7a3   :  { %v8391_v25 = vadd.f32 %v5706_v48, %v4671_v10  ;;  %v3560_v37 = vpop.f32.mrb[101].mxu0  ;;  %3629 = vmax.xlane.f32.xlu0 %v3628_v63 }
 0x7a4   :  { %v8393_v61 = vadd.f32 %v4671_v10, %v3560_v37 }
 0x7a5   :  { %v3634_v43 = vsel %vm164_vm1, %v8391_v25, -inf }
 0x7a6   :  { %v3631_v3 = vsel %vm164_vm1, %v8393_v61, -inf }
 0x7a7   :  { %3632 = vmax.xlane.f32.xlu1 %v3631_v3  ;;  %3635 = vmax.xlane.f32.xlu0 %v3634_v43 }
 0x7aa   :  { %v5709_v18 = vpop.f32.mrb[102].mxu0 }
 0x7ab   :  { %v8399_v51 = vadd.f32 %v5709_v18, %v4671_v10  ;;  %v3570_v54 = vpop.f32.mrb[103].mxu0 }
 0x7ac   :  { %v8401_v26 = vadd.f32 %v4671_v10, %v3570_v54 }
 0x7ad   :  { %v3640_v46 = vsel %vm164_vm1, %v8399_v51, -inf }
 0x7ae   :  { %3641 = vmax.xlane.f32.xlu0 %v3640_v46  ;;  %v3637_v7 = vsel %vm164_vm1, %v8401_v26, -inf }
 0x7af   :  { %3638 = vmax.xlane.f32.xlu1 %v3637_v7 }
 0x7b2   :  { %v5712_v0 = vpop.f32.mrb[104].mxu0 }
 0x7b3   :  { %v8407_v20 = vadd.f32 %v5712_v0, %v4671_v10  ;;  %v3580_v12 = vpop.f32.mrb[105].mxu0 }
 0x7b4   :  { %v8409_v40 = vadd.f32 %v4671_v10, %v3580_v12 }
 0x7b5   :  { %v3646_v21 = vsel %vm164_vm1, %v8407_v20, -inf }
 0x7b6   :  { %3647 = vmax.xlane.f32.xlu0 %v3646_v21  ;;  %v3643_v27 = vsel %vm164_vm1, %v8409_v40, -inf }
 0x7b7   :  { %3644 = vmax.xlane.f32.xlu1 %v3643_v27 }
 0x7ba   :  { %v5715_v62 = vpop.f32.mrb[106].mxu0 }
 0x7bb   :  { %v8415_v42 = vadd.f32 %v5715_v62, %v4671_v10  ;;  %v3590_v45 = vpop.f32.mrb[107].mxu0 }
 0x7bc   :  { %v8417_v13 = vadd.f32 %v4671_v10, %v3590_v45 }
 0x7bd   :  { %v3652_v47 = vsel %vm164_vm1, %v8415_v42, -inf }
 0x7be   :  { %3653 = vmax.xlane.f32.xlu0 %v3652_v47  ;;  %v3649_v17 = vsel %vm164_vm1, %v8417_v13, -inf }
 0x7bf   :  { %3650 = vmax.xlane.f32.xlu1 %v3649_v17 }
 0x7c2   :  { %v5718_v5 = vpop.f32.mrb[108].mxu0 }
 0x7c3   :  { %v8423_v53 = vadd.f32 %v5718_v5, %v4671_v10  ;;  %v3600_v48 = vpop.f32.mrb[109].mxu0 }
 0x7c4   :  { %v8425_v63 = vadd.f32 %v4671_v10, %v3600_v48 }
 0x7c5   :  { %v3658_v37 = vsel %vm164_vm1, %v8423_v53, -inf }
 0x7c6   :  { %3659 = vmax.xlane.f32.xlu0 %v3658_v37  ;;  %v3655_v43 = vsel %vm164_vm1, %v8425_v63, -inf }
 0x7c7   :  { %3656 = vmax.xlane.f32.xlu1 %v3655_v43 }
 0x7ca   :  { %v5721_v3 = vpop.f32.mrb[110].mxu0 }
 0x7cb   :  { %v8431_v18 = vadd.f32 %v5721_v3, %v4671_v10  ;;  %v3610_v54 = vpop.f32.mrb[111].mxu0 }
 0x7cc   :  { %v8433_v46 = vadd.f32 %v4671_v10, %v3610_v54 }
 0x7cd   :  { %v3664_v7 = vsel %vm164_vm1, %v8431_v18, -inf }
 0x7ce   :  { %3665 = vmax.xlane.f32.xlu0 %v3664_v7  ;;  %v3661_v0 = vsel %vm164_vm1, %v8433_v46, -inf }
 0x7cf   :  { %3662 = vmax.xlane.f32.xlu1 %v3661_v0 }
 0x823   :  { %v3624_v12 = vpop.xlane.xlu1 %3623 }
 0x824   :  { %v3668_v21 = vsub.f32 %v8375_v59, %v3624_v12  ;;  %v3621_v27 = vpop.xlane.xlu0 %3620 }
 0x825   :  { %v3667_v62 = vsub.f32 %v8377_v34, %v3621_v27 }
 0x826   :  { %v3685_v45 = vmul.f32 1.442695, %v3668_v21 }
 0x827   :  { %v3683_v47 = vmul.f32 1.442695, %v3667_v62 }
 0x828   :  { %6157 = vpow2.f32 %v3685_v45 }
 0x829   :  { %6159 = vpow2.f32 %v3683_v47 }
 0x82c   :  { %v3627_v10 = vpop.xlane.xlu0 %3626 }
 0x82d   :  { %v3669_v17 = vsub.f32 %v8383_v52, %v3627_v10 }
 0x82f   :  { %v3687_v5 = vmul.f32 1.442695, %v3669_v17 }
 0x830   :  { %v3630_v48 = vpop.xlane.xlu0 %3629 }
 0x831   :  { %6161 = vpow2.f32 %v3687_v5  ;;  %v3670_v37 = vsub.f32 %v8385_v15, %v3630_v48 }
 0x832   :  { %v8443_v43 = vpop.eup %6157 }
 0x833   :  { %v8445_v3 = vpop.eup %6159  ;;  %v3689_v59 = vmul.f32 1.442695, %v3670_v37  ;;  %v3718_v34 = vsel %vm164_vm1, %v8443_v43, 0.0 }
 0x834   :  { %v3633_v54 = vpop.xlane.xlu1 %3632  ;;  %v3636_v7 = vpop.xlane.xlu0 %3635  ;;  %3719 = vadd.xlane.f32.xlu0 %v3718_v34  ;;  %v3715_v0 = vsel %vm164_vm1, %v8445_v3, 0.0 }
 0x835   :  { %6163 = vpow2.f32 %v3689_v59  ;;  %v3671_v52 = vsub.f32 %v8393_v61, %v3633_v54  ;;  %v3672_v12 = vsub.f32 %v8391_v25, %v3636_v7  ;;  %3716 = vadd.xlane.f32.xlu1 %v3715_v0 }
 0x837   :  { %v3691_v15 = vmul.f32 1.442695, %v3671_v52  ;;  %v3693_v21 = vmul.f32 1.442695, %v3672_v12 }
 0x839   :  { %6165 = vpow2.f32 %v3691_v15 }
 0x83a   :  { %6167 = vpow2.f32 %v3693_v21 }
 0x83b   :  { %v8453_v27 = vpop.eup %6161  ;;  %v3642_v62 = vpop.xlane.xlu0 %3641 }
 0x83c   :  { %v3674_v45 = vsub.f32 %v8399_v51, %v3642_v62  ;;  %v3639_v47 = vpop.xlane.xlu1 %3638  ;;  %v3721_v10 = vsel %vm164_vm1, %v8453_v27, 0.0 }
 0x83d   :  { %v3673_v17 = vsub.f32 %v8401_v26, %v3639_v47  ;;  %3722 = vadd.xlane.f32.xlu1 %v3721_v10 }
 0x83e   :  { %v3697_v61 = vmul.f32 1.442695, %v3674_v45 }
 0x83f   :  { %v8459_v5 = vpop.eup %6163  ;;  %v3695_v25 = vmul.f32 1.442695, %v3673_v17 }
 0x840   :  { %6169 = vpow2.f32 %v3697_v61  ;;  %v3724_v48 = vsel %vm164_vm1, %v8459_v5, 0.0 }
 0x841   :  { %6171 = vpow2.f32 %v3695_v25  ;;  %3725 = vadd.xlane.f32.xlu0 %v3724_v48 }
 0x843   :  { %v8463_v37 = vpop.eup %6165  ;;  %v3648_v51 = vpop.xlane.xlu0 %3647 }
 0x844   :  { %v8465_v59 = vpop.eup %6167  ;;  %v3676_v34 = vsub.f32 %v8407_v20, %v3648_v51  ;;  %v3645_v54 = vpop.xlane.xlu1 %3644  ;;  %v3727_v26 = vsel %vm164_vm1, %v8463_v37, 0.0 }
 0x845   :  { %v3675_v7 = vsub.f32 %v8409_v40, %v3645_v54  ;;  %v3730_v0 = vsel %vm164_vm1, %v8465_v59, 0.0  ;;  %3728 = vadd.xlane.f32.xlu1 %v3727_v26 }
 0x846   :  { %v3701_v52 = vmul.f32 1.442695, %v3676_v34  ;;  %3731 = vadd.xlane.f32.xlu0 %v3730_v0 }
 0x847   :  { %v3699_v12 = vmul.f32 1.442695, %v3675_v7 }
 0x848   :  { %6173 = vpow2.f32 %v3701_v52 }
 0x849   :  { %6175 = vpow2.f32 %v3699_v12 }
 0x84a   :  { %v8473_v15 = vpop.eup %6169 }
 0x84b   :  { %v8475_v21 = vpop.eup %6171  ;;  %v3654_v20 = vpop.xlane.xlu0 %3653  ;;  %v3736_v62 = vsel %vm164_vm1, %v8473_v15, 0.0 }
 0x84c   :  { %v3678_v45 = vsub.f32 %v8415_v42, %v3654_v20  ;;  %v3651_v40 = vpop.xlane.xlu1 %3650  ;;  %3737 = vadd.xlane.f32.xlu0 %v3736_v62  ;;  %v3733_v47 = vsel %vm164_vm1, %v8475_v21, 0.0 }
 0x84d   :  { %v3677_v10 = vsub.f32 %v8417_v13, %v3651_v40  ;;  %3734 = vadd.xlane.f32.xlu1 %v3733_v47 }
 0x84e   :  { %v3705_v17 = vmul.f32 1.442695, %v3678_v45 }
 0x84f   :  { %v3703_v61 = vmul.f32 1.442695, %v3677_v10 }
 0x850   :  { %6177 = vpow2.f32 %v3705_v17 }
 0x851   :  { %6179 = vpow2.f32 %v3703_v61 }
 0x852   :  { %v8483_v25 = vpop.eup %6173 }
 0x853   :  { %v8485_v48 = vpop.eup %6175  ;;  %v3660_v51 = vpop.xlane.xlu0 %3659  ;;  %v3742_v42 = vsel %vm164_vm1, %v8483_v25, 0.0 }
 0x854   :  { %v3680_v34 = vsub.f32 %v8423_v53, %v3660_v51  ;;  %v3657_v54 = vpop.xlane.xlu1 %3656  ;;  %3743 = vadd.xlane.f32.xlu0 %v3742_v42  ;;  %v3739_v13 = vsel %vm164_vm1, %v8485_v48, 0.0 }
 0x855   :  { %v3679_v26 = vsub.f32 %v8425_v63, %v3657_v54  ;;  %3740 = vadd.xlane.f32.xlu1 %v3739_v13 }
 0x856   :  { %v3709_v7 = vmul.f32 1.442695, %v3680_v34 }
 0x857   :  { %v3707_v0 = vmul.f32 1.442695, %v3679_v26 }
 0x858   :  { %6181 = vpow2.f32 %v3709_v7 }
 0x859   :  { %6183 = vpow2.f32 %v3707_v0 }
 0x85a   :  { %v8493_v52 = vpop.eup %6177 }
 0x85b   :  { %v8495_v12 = vpop.eup %6179  ;;  %v3666_v20 = vpop.xlane.xlu0 %3665  ;;  %v3748_v53 = vsel %vm164_vm1, %v8493_v52, 0.0 }
 0x85c   :  { %v3682_v62 = vsub.f32 %v8431_v18, %v3666_v20  ;;  %3749 = vadd.xlane.f32.xlu0 %v3748_v53  ;;  %v3663_v45 = vpop.xlane.xlu1 %3662  ;;  %v3745_v63 = vsel %vm164_vm1, %v8495_v12, 0.0 }
 0x85d   :  { %v3681_v40 = vsub.f32 %v8433_v46, %v3663_v45  ;;  %3746 = vadd.xlane.f32.xlu1 %v3745_v63 }
 0x85e   :  { %v3713_v47 = vmul.f32 1.442695, %v3682_v62 }
 0x85f   :  { %v3711_v10 = vmul.f32 1.442695, %v3681_v40  ;;  %v8950_v40 = vmov 1  }
 0x860   :  { %6185 = vpow2.f32 %v3713_v47  ;;  %v8951_v47 = vmov 2  }
 0x861   :  { %6187 = vpow2.f32 %v3711_v10 }
 0x862   :  { %v8503_v17 = vpop.eup %6181 }
 0x863   :  { %v8505_v61 = vpop.eup %6183  ;;  %v3754_v51 = vsel %vm164_vm1, %v8503_v17, 0.0 }
 0x864   :  { %3755 = vadd.xlane.f32.xlu0 %v3754_v51  ;;  %v3751_v18 = vsel %vm164_vm1, %v8505_v61, 0.0 }
 0x865   :  { %3752 = vadd.xlane.f32.xlu1 %v3751_v18 }
 0x86a   :  { %v8511_v42 = vpop.eup %6185 }
 0x86b   :  { %v8513_v46 = vpop.eup %6187  ;;  %v3760_v34 = vsel %vm164_vm1, %v8511_v42, 0.0 }
 0x86c   :  { %3761 = vadd.xlane.f32.xlu0 %v3760_v34  ;;  %v3757_v54 = vsel %vm164_vm1, %v8513_v46, 0.0 }
 0x86d   :  { %3758 = vadd.xlane.f32.xlu1 %v3757_v54 }
 0x8c1   :  { %v3720_v13 = vpop.xlane.xlu0 %3719 }
 0x8c2   :  { %6189 = vrcp.f32 %v3720_v13  ;;  %v3717_v26 = vpop.xlane.xlu1 %3716  ;;  %v8952_v13 = vmov 0  }
 0x8c3   :  { %6191 = vrcp.f32 %v3717_v26  ;;  %v4085_v26 = vld [vmem:[%s8777_s19 + $0x10] sm:$0xff] }
 0x8ca   :  { %v3723_v7 = vpop.xlane.xlu1 %3722 }
 0x8cb   :  { %6193 = vrcp.f32 %v3723_v7  ;;  %v4086_v7 = vld [vmem:[%s8777_s19 + $0x18] sm:$0xff] }
 0x8cc   :  { %v6190_v0 = vpop.eup %6189 }
 0x8cd   :  { %v6192_v20 = vpop.eup %6191  ;;  %v3766_v53 = vmul.f32 %v6190_v0, %v8443_v43  ;;  %v4083_v43 = vld [vmem:[%s8777_s19] sm:$0xff] }
 0x8ce   :  { %v3764_v62 = vmul.f32 %v6192_v20, %v8445_v3  ;;  %v3726_v45 = vpop.xlane.xlu0 %3725  ;;  %v4084_v3 = vld [vmem:[%s8777_s19 + $0x8] sm:$0xff]  ;;  %v6033_v20 = vpack.c.bf16 %v4086_v7, %v4085_v26 }
 0x8cf   :  { %3802 = vperm.xlu1 %6083, %v3766_v53   ;;  %6195 = vrcp.f32 %v3726_v45  ;;  %v6029_v34 = vpack.c.bf16 %v4084_v3, %v4083_v43 }
 0x8d0   :  { %3892 = vperm.xlu0 %6082, %v3764_v62  }
 0x8d1   :  { %6030 = vmatprep.subr.bf16.mxu1 %v6029_v34 }
 0x8d2   :  { %v3729_v63 = vpop.xlane.xlu1 %3728  ;;  %6032 = vmatpush3.bf16.msra.mxu1 %v6029_v34 }
 0x8d3   :  { %6084 = vset.pattern.permute.xlu1 %v8950_v40  ;;  %6197 = vrcp.f32 %v3729_v63  ;;  %6034 = vmatprep.subr.bf16.mxu1 %v6033_v20 }
 0x8d4   :  { %3896 = vperm.xlu1 %6084, %v3766_v53   ;;  %6087 = vset.pattern.permute.xlu0 %v8951_v47 }
 0x8d5   :  { %v6194_v10 = vpop.eup %6193  ;;  %3988 = vperm.xlu0 %6087, %v3764_v62  }
 0x8d6   :  { %v3768_v51 = vmul.f32 %v6194_v10, %v8453_v27  ;;  %6036 = vmatpush3.bf16.msra.mxu1 %v6033_v20 }
 0x8d8   :  { %6085 = vset.pattern.permute.xlu1 %v8951_v47 }
 0x8d9   :  { %3992 = vperm.xlu1 %6085, %v3766_v53   ;;  %6091 = vset.pattern.permute.xlu0 %v8950_v40  ;;  %v6196_v54 = vpop.eup %6195 }
 0x8da   :  { %3900 = vperm.xlu0 %6091, %v3768_v51   ;;  %v3735_v18 = vpop.xlane.xlu1 %3734  ;;  %v3770_v0 = vmul.f32 %v6196_v54, %v8459_v5 }
 0x8db   :  { %6199 = vrcp.f32 %v3735_v18 }
 0x8dd   :  { %6086 = vset.pattern.permute.xlu1 %v8952_v13  ;;  %v6198_v27 = vpop.eup %6197 }
 0x8de   :  { %3797 = vperm.xlu1 %6086, %v3764_v62   ;;  %6092 = vset.pattern.permute.xlu0 %v8951_v47  ;;  %v3772_v53 = vmul.f32 %v6198_v27, %v8463_v37  ;;  %v3732_v62 = vpop.xlane.xlu0 %3731 }
 0x8df   :  { %3996 = vperm.xlu0 %6092, %v3768_v51   ;;  %6201 = vrcp.f32 %v3732_v62 }
 0x8e2   :  { %3812 = vperm.xlu1 %6086, %v3770_v0   ;;  %v3741_v45 = vpop.xlane.xlu1 %3740  ;;  %v3738_v18 = vpop.xlane.xlu0 %3737 }
 0x8e3   :  { %6096 = vset.pattern.permute.xlu0 %v8950_v40  ;;  %6203 = vrcp.f32 %v3741_v45 }
 0x8e4   :  { %3908 = vperm.xlu0 %6096, %v3772_v53  }
 0x8e5   :  { %v6200_v63 = vpop.eup %6199 }
 0x8e6   :  { %6088 = vset.pattern.permute.xlu1 %v8950_v40  ;;  %v3776_v5 = vmul.f32 %v6200_v63, %v8475_v21  ;;  %v3744_v7 = vpop.xlane.xlu0 %3743 }
 0x8e7   :  { %3904 = vperm.xlu1 %6088, %v3770_v0  }
 0x8e8   :  { %6097 = vset.pattern.permute.xlu0 %v8951_v47 }
 0x8e9   :  { %4004 = vperm.xlu0 %6097, %v3772_v53   ;;  %v6202_v37 = vpop.eup %6201 }
 0x8ea   :  { %v3747_v10 = vpop.xlane.xlu1 %3746  ;;  %v3774_v3 = vmul.f32 %v6202_v37, %v8465_v59 }
 0x8eb   :  { %6089 = vset.pattern.permute.xlu1 %v8951_v47  ;;  %6205 = vrcp.f32 %v3747_v10  ;;  %v8590_v10 = vld [vmem:[%s8769_s10] ss:$0 sm:$0xff] }
 0x8ec   :  { %4000 = vperm.xlu1 %6089, %v3770_v0   ;;  %6207 = vrcp.f32 %v3738_v18 }
 0x8ed   :  { %6101 = vset.pattern.permute.xlu0 %v8950_v40  ;;  %v6204_v43 = vpop.eup %6203 }
 0x8ee   :  { %3916 = vperm.xlu0 %6101, %v3776_v5   ;;  %v3780_v34 = vmul.f32 %v6204_v43, %v8485_v48 }
 0x8f0   :  { %6090 = vset.pattern.permute.xlu1 %v8952_v13 }
 0x8f1   :  { %3807 = vperm.xlu1 %6090, %v3768_v51  }
 0x8f2   :  { %6102 = vset.pattern.permute.xlu0 %v8951_v47  ;;  %v3753_v21 = vpop.xlane.xlu1 %3752 }
 0x8f3   :  { %4012 = vperm.xlu0 %6102, %v3776_v5   ;;  %6209 = vrcp.f32 %v3753_v21 }
 0x8f5   :  { %3822 = vperm.xlu1 %6090, %v3774_v3   ;;  %v6206_v51 = vpop.eup %6205 }
 0x8f6   :  { %v3784_v59 = vmul.f32 %v6206_v51, %v8495_v12  ;;  %v6208_v48 = vpop.eup %6207 }
 0x8f7   :  { %6106 = vset.pattern.permute.xlu0 %v8950_v40  ;;  %v3778_v27 = vmul.f32 %v6208_v48, %v8473_v15 }
 0x8f8   :  { %3924 = vperm.xlu0 %6106, %v3780_v34  }
 0x8f9   :  { %6093 = vset.pattern.permute.xlu1 %v8950_v40 }
 0x8fa   :  { %3912 = vperm.xlu1 %6093, %v3774_v3   ;;  %v3759_v54 = vpop.xlane.xlu1 %3758 }
 0x8fb   :  { %6211 = vrcp.f32 %v3759_v54  ;;  %v8605_v54 = vld [vmem:[%s8773_s12] ss:$0 sm:$0xff] }
 0x8fc   :  { %6107 = vset.pattern.permute.xlu0 %v8951_v47  ;;  %6213 = vrcp.f32 %v3744_v7 }
 0x8fd   :  { %4020 = vperm.xlu0 %6107, %v3780_v34   ;;  %v6210_v26 = vpop.eup %6209 }
 0x8fe   :  { %6094 = vset.pattern.permute.xlu1 %v8951_v47  ;;  %v3788_v0 = vmul.f32 %v6210_v26, %v8505_v61 }
 0x8ff   :  { %4008 = vperm.xlu1 %6094, %v3774_v3   ;;  %v8597_v3 = vld [vmem:[%s8774_s14] ss:$0 sm:$0xff] }
 0x900   :  { %v2601_v18 = vadd.f32 %v8597_v3, %v8230_v6 }
 0x901   :  { %6111 = vset.pattern.permute.xlu0 %v8950_v40 }
 0x902   :  { %3932 = vperm.xlu0 %6111, %v3784_v59  }
 0x903   :  { %6095 = vset.pattern.permute.xlu1 %v8952_v13 }
 0x904   :  { %3817 = vperm.xlu1 %6095, %v3772_v53   ;;  %v3750_v53 = vpop.xlane.xlu0 %3749 }
 0x905   :  { %v6212_v12 = vpop.eup %6211  ;;  %6215 = vrcp.f32 %v3750_v53 }
 0x906   :  { %6112 = vset.pattern.permute.xlu0 %v8951_v47  ;;  %v8567_v15 = vmul.f32 %v6212_v12, %v8513_v46  ;;  %v6214_v61 = vpop.eup %6213 }
 0x907   :  { %4028 = vperm.xlu0 %6112, %v3784_v59   ;;  %v3782_v20 = vmul.f32 %v6214_v61, %v8483_v25  ;;  %v2596_v61 = vadd.f32 %v8597_v3, %v8232_v58  ;;  %v8955_v58 = vld [vmem:[#allocation15_spill] sm:$0xff] }
 0x908   :  { %3832 = vperm.xlu1 %6095, %v3778_v27   ;;  %v3756_v62 = vpop.xlane.xlu0 %3755 }
 0x909   :  { %6217 = vrcp.f32 %v3756_v62 }
 0x90b   :  { %6116 = vset.pattern.permute.xlu0 %v8950_v40 }
 0x90c   :  { %6098 = vset.pattern.permute.xlu1 %v8950_v40  ;;  %3940 = vperm.xlu0 %6116, %v3788_v0  }
 0x90d   :  { %3920 = vperm.xlu1 %6098, %v3778_v27  }
 0x90f   :  { %v6216_v46 = vpop.eup %6215 }
 0x910   :  { %6117 = vset.pattern.permute.xlu0 %v8951_v47  ;;  %v3786_v25 = vmul.f32 %v6216_v46, %v8493_v52 }
 0x911   :  { %6099 = vset.pattern.permute.xlu1 %v8951_v47  ;;  %4036 = vperm.xlu0 %6117, %v3788_v0  }
 0x912   :  { %4016 = vperm.xlu1 %6099, %v3778_v27   ;;  %v2397_v27 = vadd.f32 %v8605_v54, %v8195_v49  ;;  %v2392_v49 = vadd.f32 %v8605_v54, %v8197_v39 }
 0x913   :  { %v6218_v45 = vpop.eup %6217 }
 0x914   :  { %v3790_v63 = vmul.f32 %v6218_v45, %v8503_v17  ;;  %v8953_v17 = vld [vmem:[#allocation13_spill] sm:$0xff] }
 0x915   :  { %6120 = vset.pattern.permute.xlu0 %v8950_v40  ;;  %v1800_v43 = vadd.f32 %v8590_v10, %v8953_v17 }
 0x916   :  { %6100 = vset.pattern.permute.xlu1 %v8952_v13  ;;  %3948 = vperm.xlu0 %6120, %v8567_v15  }
 0x917   :  { %3827 = vperm.xlu1 %6100, %v3776_v5   ;;  %v3762_v5 = vpop.xlane.xlu0 %3761 }
 0x918   :  { %6219 = vrcp.f32 %v3762_v5  ;;  %v1810_v5 = vadd.f32 %v8590_v10, %v8955_v58 }
 0x91a   :  { %6121 = vset.pattern.permute.xlu0 %v8951_v47 }
 0x91b   :  { %3842 = vperm.xlu1 %6100, %v3782_v20   ;;  %4044 = vperm.xlu0 %6121, %v8567_v15  }
 0x91f   :  { %6103 = vset.pattern.permute.xlu1 %v8950_v40  ;;  %6124 = vset.pattern.permute.xlu0 %v8952_v13 }
 0x920   :  { %3928 = vperm.xlu1 %6103, %v3782_v20  }
 0x922   :  { %v6220_v37 = vpop.eup %6219 }
 0x924   :  { %6104 = vset.pattern.permute.xlu1 %v8951_v47 }
 0x925   :  { %4024 = vperm.xlu1 %6104, %v3782_v20  }
 0x929   :  { %6105 = vset.pattern.permute.xlu1 %v8952_v13 }
 0x92a   :  { %3837 = vperm.xlu1 %6105, %v3780_v34   ;;  %v3794_v34 = vmul.f32 %v6220_v37, %v8511_v42 }
 0x92e   :  { %3852 = vperm.xlu1 %6105, %v3786_v25  }
 0x932   :  { %6108 = vset.pattern.permute.xlu1 %v8950_v40 }
 0x933   :  { %3936 = vperm.xlu1 %6108, %v3786_v25  }
 0x937   :  { %6109 = vset.pattern.permute.xlu1 %v8951_v47 }
 0x938   :  { %4032 = vperm.xlu1 %6109, %v3786_v25  }
 0x93c   :  { %6110 = vset.pattern.permute.xlu1 %v8952_v13 }
 0x93d   :  { %3847 = vperm.xlu1 %6110, %v3784_v59  }
 0x941   :  { %3862 = vperm.xlu1 %6110, %v3790_v63  }
 0x945   :  { %6113 = vset.pattern.permute.xlu1 %v8950_v40 }
 0x946   :  { %3944 = vperm.xlu1 %6113, %v3790_v63  }
 0x94a   :  { %6114 = vset.pattern.permute.xlu1 %v8951_v47 }
 0x94b   :  { %4040 = vperm.xlu1 %6114, %v3790_v63  }
 0x94e   :  { %v3803_v52 = vpop.permute.xlu1 %3802 }
 0x94f   :  { %6115 = vset.pattern.permute.xlu1 %v8952_v13  ;;  %v3876_v51 = vmul.f32 %v3803_v52, %v1800_v43  ;;  %v3893_v26 = vpop.permute.xlu0 %3892  ;;  %v2611_v52 = vadd.f32 %v8597_v3, %v8234_v29  ;;  %v2606_v29 = vadd.f32 %v8597_v3, %v8236_v2 }
 0x950   :  { %3857 = vperm.xlu1 %6115, %v3788_v0   ;;  %v8954_v0 = vld [vmem:[#allocation14_spill] sm:$0xff]  ;;  %v3955_v46 = vmul.f32 %v3893_v26, %v2596_v61  ;;  %v2402_v26 = vadd.f32 %v8605_v54, %v8201_v60 }
 0x951   :  { %v1795_v12 = vadd.f32 %v8590_v10, %v8954_v0 }
 0x953   :  { %v3897_v21 = vpop.permute.xlu1 %3896 }
 0x954   :  { %v3956_v59 = vmul.f32 %v3897_v21, %v2601_v18  ;;  %3872 = vperm.xlu1 %6115, %v3794_v34   ;;  %v3989_v20 = vpop.permute.xlu0 %3988 }
 0x956   :  { %v3972_v48 = vadd.f32 %v3956_v59, %v3876_v51  ;;  %v8956_v51 = vld [vmem:[#allocation16_spill] sm:$0xff] }
 0x957   :  { %v1805_v59 = vadd.f32 %v8590_v10, %v8956_v51 }
 0x958   :  { %6118 = vset.pattern.permute.xlu1 %v8950_v40  ;;  %v3993_v7 = vpop.permute.xlu1 %3992  ;;  %v4051_v40 = vmul.f32 %v3989_v20, %v2392_v49  ;;  %v2621_v20 = vadd.f32 %v8597_v3, %v8238_v56 }
 0x959   :  { %v4052_v6 = vmul.f32 %v3993_v7, %v2397_v27  ;;  %3952 = vperm.xlu1 %6118, %v3794_v34   ;;  %v3901_v43 = vpop.permute.xlu0 %3900 }
 0x95b   :  { %v4068_v42 = vadd.f32 %v4052_v6, %v3972_v48 }
 0x95d   :  { %6119 = vset.pattern.permute.xlu1 %v8952_v13  ;;  %v3798_v53 = vpop.permute.xlu1 %3797 }
 0x95e   :  { %v3875_v25 = vmul.f32 %v3798_v53, %v1795_v12  ;;  %3867 = vperm.xlu1 %6119, %v8567_v15   ;;  %v3997_v48 = vpop.permute.xlu0 %3996  ;;  %v8957_v12 = vld [vmem:[#allocation17_spill] sm:$0xff] }
 0x95f   :  { %v4053_v6 = vmul.f32 %v3997_v48, %v2402_v26  ;;  %v1820_v61 = vadd.f32 %v8590_v10, %v8957_v12 }
 0x960   :  { %v3971_v62 = vadd.f32 %v3955_v46, %v3875_v25  ;;  %v2417_v46 = vadd.f32 %v8605_v54, %v8203_v30 }
 0x961   :  { %v3813_v45 = vpop.permute.xlu1 %3812 }
 0x962   :  { %v4067_v63 = vadd.f32 %v4051_v40, %v3971_v62  ;;  %6122 = vset.pattern.permute.xlu1 %v8951_v47  ;;  %v3878_v37 = vmul.f32 %v3813_v45, %v1810_v5  ;;  %v2407_v47 = vadd.f32 %v8605_v54, %v8199_v35  ;;  %v2616_v5 = vadd.f32 %v8597_v3, %v8240_v28 }
 0x963   :  { %4048 = vperm.xlu1 %6122, %v3794_v34   ;;  %v3909_v25 = vpop.permute.xlu0 %3908 }
 0x964   :  { %5730 = vmatprep.mubr.msk.f32.mxu1 %vm715_vm2, %v4067_v63  ;;  %v8958_v63 = vld [vmem:[#allocation18_spill] sm:$0xff] }
 0x965   :  { %5731 = vmatmul.mubr.msk.f32.vlgmr.msra.gmra.mrb[128].mxu1 %vm715_vm2, %v4068_v42  ;;  %v1815_v58 = vadd.f32 %v8590_v10, %v8958_v63  ;;  %v8962_v63 = vld [vmem:[#allocation22_spill] sm:$0xff] }
 0x966   :  { %v3905_v39 = vpop.permute.xlu1 %3904 }
 0x967   :  { %v3958_v15 = vmul.f32 %v3905_v39, %v2611_v52  ;;  %6123 = vset.pattern.permute.xlu1 %v8952_v13  ;;  %v3957_v13 = vmul.f32 %v3901_v43, %v2606_v29  ;;  %v2412_v39 = vadd.f32 %v8605_v54, %v8205_v23  ;;  %v2427_v29 = vadd.f32 %v8605_v54, %v8207_v9 }
 0x968   :  { %v4005_v56 = vpop.permute.xlu0 %4004 }
 0x969   :  { %v3974_v17 = vadd.f32 %v3958_v15, %v3878_v37  ;;  %v3959_v37 = vmul.f32 %v3909_v25, %v2616_v5 }
 0x96b   :  { %v4001_v18 = vpop.permute.xlu1 %4000 }
 0x96c   :  { %v4054_v34 = vmul.f32 %v4001_v18, %v2407_v47  ;;  %v8959_v18 = vld [vmem:[#allocation19_spill] sm:$0xff] }
 0x96d   :  { %v3917_v48 = vpop.permute.xlu0 %3916 }
 0x96e   :  { %v4070_v21 = vadd.f32 %v4054_v34, %v3974_v17  ;;  %v4055_v17 = vmul.f32 %v4005_v56, %v2412_v39  ;;  %v1830_v34 = vadd.f32 %v8590_v10, %v8959_v18 }
 0x970   :  { %v3808_v27 = vpop.permute.xlu1 %3807 }
 0x971   :  { %v3877_v7 = vmul.f32 %v3808_v27, %v1805_v59 }
 0x973   :  { %v3973_v42 = vadd.f32 %v3957_v13, %v3877_v7  ;;  %v8960_v7 = vld [vmem:[#allocation20_spill] sm:$0xff] }
 0x974   :  { %v3823_v35 = vpop.permute.xlu1 %3822 }
 0x975   :  { %v4069_v0 = vadd.f32 %v4053_v6, %v3973_v42  ;;  %v3880_v53 = vmul.f32 %v3823_v35, %v1820_v61  ;;  %v1825_v6 = vadd.f32 %v8590_v10, %v8960_v7  ;;  %v2626_v42 = vadd.f32 %v8597_v3, %v8244_v38  ;;  %v8961_v10 = vld [vmem:[#allocation21_spill] sm:$0xff] }
 0x977   :  { %5733 = vmatprep.mubr.msk.f32.mxu1 %vm715_vm2, %v4069_v0  ;;  %v2422_v0 = vadd.f32 %v8605_v54, %v8209_v36  ;;  %v3961_v12 = vmul.f32 %v3917_v48, %v2626_v42  ;;  %v8965_v48 = vld [vmem:[#allocation25_spill] sm:$0xff] }
 0x978   :  { %5734 = vmatmul.mubr.msk.f32.gmra.mrb[130].mxu1 %vm715_vm2, %v4070_v21  ;;  %v2631_v21 = vadd.f32 %v8597_v3, %v8242_v55  ;;  %v4013_v55 = vpop.permute.xlu0 %4012 }
 0x979   :  { %v3913_v2 = vpop.permute.xlu1 %3912 }
 0x97a   :  { %v3960_v49 = vmul.f32 %v3913_v2, %v2621_v20  ;;  %v4057_v20 = vmul.f32 %v4013_v55, %v2422_v0 }
 0x97c   :  { %v3976_v60 = vadd.f32 %v3960_v49, %v3880_v53 }
 0x97e   :  { %v4009_v40 = vpop.permute.xlu1 %4008 }
 0x97f   :  { %v4056_v62 = vmul.f32 %v4009_v40, %v2417_v46  ;;  %v3925_v46 = vpop.permute.xlu0 %3924 }
 0x981   :  { %v4072_v45 = vadd.f32 %v4056_v62, %v3976_v60 }
 0x983   :  { %v3818_v52 = vpop.permute.xlu1 %3817  ;;  %v4021_v40 = vpop.permute.xlu0 %4020 }
 0x984   :  { %v3879_v15 = vmul.f32 %v3818_v52, %v1815_v58  ;;  %v4059_v5 = vmul.f32 %v4021_v40, %v8216_v4 }
 0x986   :  { %v3975_v47 = vadd.f32 %v3959_v37, %v3879_v15  ;;  %v8963_v37 = vld [vmem:[#allocation23_spill] sm:$0xff] }
 0x987   :  { %v3833_v30 = vpop.permute.xlu1 %3832 }
 0x988   :  { %v4071_v43 = vadd.f32 %v4055_v17, %v3975_v47  ;;  %v3882_v51 = vmul.f32 %v3833_v30, %v1830_v34  ;;  %v3933_v47 = vpop.permute.xlu0 %3932 }
 0x989   :  { %v3965_v34 = vmul.f32 %v3933_v47, %v8255_v19 }
 0x98a   :  { %5736 = vmatprep.mubr.msk.f32.mxu1 %vm715_vm2, %v4071_v43 }
 0x98b   :  { %5737 = vmatmul.mubr.msk.f32.gmra.mrb[132].mxu1 %vm715_vm2, %v4072_v45  ;;  %v3963_v45 = vmul.f32 %v3925_v46, %v8251_v8 }
 0x98c   :  { %v3921_v28 = vpop.permute.xlu1 %3920  ;;  %v4029_v18 = vpop.permute.xlu0 %4028 }
 0x98d   :  { %v3962_v59 = vmul.f32 %v3921_v28, %v2631_v21  ;;  %v8964_v21 = vld [vmem:[#allocation24_spill] sm:$0xff] }
 0x98f   :  { %v3978_v23 = vadd.f32 %v3962_v59, %v3882_v51  ;;  %v4061_v51 = vmul.f32 %v4029_v18, %v8220_v1 }
 0x991   :  { %v4017_v27 = vpop.permute.xlu1 %4016 }
 0x992   :  { %v4058_v26 = vmul.f32 %v4017_v27, %v2427_v29 }
 0x994   :  { %v4074_v13 = vadd.f32 %v4058_v26, %v3978_v23 }
 0x996   :  { %v3828_v35 = vpop.permute.xlu1 %3827 }
 0x997   :  { %v3881_v61 = vmul.f32 %v3828_v35, %v1825_v6  ;;  %v8966_v35 = vld [vmem:[#allocation26_spill] sm:$0xff] }
 0x999   :  { %v3977_v2 = vadd.f32 %v3961_v12, %v3881_v61 }
 0x99a   :  { %v3843_v9 = vpop.permute.xlu1 %3842 }
 0x99b   :  { %v4073_v53 = vadd.f32 %v4057_v20, %v3977_v2  ;;  %v3884_v60 = vmul.f32 %v3843_v9, %v8961_v10  ;;  %v6311_v9 = vmov 0.0|0.0  }
 0x99c   :  { %6037 = vmatprep.subr.bf16.mxu0 %v6311_v9 }
 0x99d   :  { %5739 = vmatprep.mubr.msk.f32.mxu1 %vm715_vm2, %v4073_v53  ;;  %v8967_v53 = vld [vmem:[#allocation27_spill] sm:$0xff] }
 0x99e   :  { %5740 = vmatmul.mubr.msk.f32.gmra.mrb[134].mxu1 %vm715_vm2, %v4074_v13  ;;  %v3941_v13 = vpop.permute.xlu0 %3940 }
 0x99f   :  { %v3929_v49 = vpop.permute.xlu1 %3928  ;;  %v3967_v55 = vmul.f32 %v3941_v13, %v8259_v11 }
 0x9a0   :  { %v3964_v38 = vmul.f32 %v3929_v49, %v8249_v44 }
 0x9a2   :  { %v3980_v3 = vadd.f32 %v3964_v38, %v3884_v60  ;;  %v4037_v42 = vpop.permute.xlu0 %4036 }
 0x9a3   :  { %v4063_v12 = vmul.f32 %v4037_v42, %v8224_v16 }
 0x9a4   :  { %v4025_v25 = vpop.permute.xlu1 %4024 }
 0x9a5   :  { %v4060_v36 = vmul.f32 %v4025_v25, %v8214_v31 }
 0x9a7   :  { %v4076_v54 = vadd.f32 %v4060_v36, %v3980_v3  ;;  %v8968_v3 = vld [vmem:[#allocation28_spill] sm:$0xff] }
 0x9a9   :  { %v3838_v62 = vpop.permute.xlu1 %3837 }
 0x9aa   :  { %v3883_v58 = vmul.f32 %v3838_v62, %v8962_v63 }
 0x9ac   :  { %v3979_v56 = vadd.f32 %v3963_v45, %v3883_v58 }
 0x9ad   :  { %v3853_v52 = vpop.permute.xlu1 %3852 }
 0x9ae   :  { %v4075_v39 = vadd.f32 %v4059_v5, %v3979_v56  ;;  %v3886_v15 = vmul.f32 %v3853_v52, %v8963_v37 }
 0x9b0   :  { %5742 = vmatprep.mubr.msk.f32.mxu1 %vm715_vm2, %v4075_v39 }
 0x9b1   :  { %5743 = vmatmul.mubr.msk.f32.gmra.mrb[136].mxu1 %vm715_vm2, %v4076_v54 }
 0x9b2   :  { %v3937_v44 = vpop.permute.xlu1 %3936 }
 0x9b3   :  { %v3966_v31 = vmul.f32 %v3937_v44, %v8253_v14 }
 0x9b5   :  { %v3982_v17 = vadd.f32 %v3966_v31, %v3886_v15 }
 0x9b7   :  { %v4033_v30 = vpop.permute.xlu1 %4032 }
 0x9b8   :  { %v4062_v8 = vmul.f32 %v4033_v30, %v8218_v33 }
 0x9ba   :  { %v4078_v43 = vadd.f32 %v4062_v8, %v3982_v17 }
 0x9bc   :  { %v3848_v4 = vpop.permute.xlu1 %3847 }
 0x9bd   :  { %v3885_v28 = vmul.f32 %v3848_v4, %v8964_v21 }
 0x9bf   :  { %v3981_v59 = vadd.f32 %v3965_v34, %v3885_v28 }
 0x9c0   :  { %v3863_v23 = vpop.permute.xlu1 %3862 }
 0x9c1   :  { %v4077_v29 = vadd.f32 %v4061_v51, %v3981_v59  ;;  %v3888_v27 = vmul.f32 %v3863_v23, %v8965_v48 }
 0x9c3   :  { %5745 = vmatprep.mubr.msk.f32.mxu1 %vm715_vm2, %v4077_v29 }
 0x9c4   :  { %5746 = vmatmul.mubr.msk.f32.gmra.mrb[138].mxu1 %vm715_vm2, %v4078_v43 }
 0x9c5   :  { %v3945_v14 = vpop.permute.xlu1 %3944 }
 0x9c6   :  { %v3968_v33 = vmul.f32 %v3945_v14, %v8257_v50  ;;  %v3949_v50 = vpop.permute.xlu0 %3948 }
 0x9c7   :  { %v3969_v16 = vmul.f32 %v3949_v50, %v8263_v22 }
 0x9c8   :  { %v3984_v26 = vadd.f32 %v3968_v33, %v3888_v27 }
 0x9ca   :  { %v4041_v7 = vpop.permute.xlu1 %4040  ;;  %v4045_v60 = vpop.permute.xlu0 %4044 }
 0x9cb   :  { %v4064_v19 = vmul.f32 %v4041_v7, %v8222_v57  ;;  %v4065_v25 = vmul.f32 %v4045_v60, %v8228_v24 }
 0x9cd   :  { %v4080_v6 = vadd.f32 %v4064_v19, %v3984_v26 }
 0x9cf   :  { %v3858_v1 = vpop.permute.xlu1 %3857 }
 0x9d0   :  { %v3887_v0 = vmul.f32 %v3858_v1, %v8966_v35 }
 0x9d2   :  { %v3983_v61 = vadd.f32 %v3967_v55, %v3887_v0  ;;  %v6313_v55 = vmov 0.0  }
 0x9d3   :  { %v3873_v20 = vpop.permute.xlu1 %3872  ;;  %5786 = vmatprep.mubr.msk.f32.mxu0 %vm6312_vm6, %v6313_v55 }
 0x9d4   :  { %v4079_v2 = vadd.f32 %v4063_v12, %v3983_v61  ;;  %v3890_v49 = vmul.f32 %v3873_v20, %v8967_v53 }
 0x9d6   :  { %5748 = vmatprep.mubr.msk.f32.mxu1 %vm715_vm2, %v4079_v2  ;;  %v28_v2 = vstv %s8779_s22 }
 0x9d7   :  { %5749 = vmatmul.mubr.msk.f32.gmra.mrb[140].mxu1 %vm715_vm2, %v4080_v6  ;;  %29 = vst [vmem:[#allocation2] sm:$0x1] %v28_v2 }
 0x9d8   :  { %v3953_v57 = vpop.permute.xlu1 %3952 }
 0x9d9   :  { %v3970_v11 = vmul.f32 %v3953_v57, %v8261_v41  ;;  %v8700_v41 = vld [vmem:[%s8778_s20] ss:$0 sm:$0xff] }
 0x9db   :  { %v3986_v10 = vadd.f32 %v3970_v11, %v3890_v49 }
 0x9dd   :  { %v3868_v38 = vpop.permute.xlu1 %3867 }
 0x9de   :  { %v3889_v46 = vmul.f32 %v3868_v38, %v8968_v3 }
 0x9e0   :  { %v3985_v36 = vadd.f32 %v3969_v16, %v3889_v46 }
 0x9e2   :  { %v4081_v54 = vadd.f32 %v4065_v25, %v3985_v36  ;;  %v4049_v40 = vpop.permute.xlu1 %4048 }
 0x9e3   :  { %v4066_v62 = vmul.f32 %v4049_v40, %v8226_v32 }
 0x9e4   :  { %5751 = vmatprep.mubr.msk.f32.mxu1 %vm715_vm2, %v4081_v54 }
 0x9e5   :  { %v4082_v45 = vadd.f32 %v4066_v62, %v3986_v10 }
 0x9e7   :  { %5752 = vmatmul.mubr.msk.f32.gmra.mrb[142].mxu1 %vm715_vm2, %v4082_v45 }
 0xa38   :  { %v5732_v22 = vpop.f32.mrb[128].mxu1 }
 0xa39   :  { %v4214_v63 = vadd.f32 %v5732_v22, %v8700_v41  ;;  %v4208_v58 = vpop.f32.mrb[129].mxu1  ;;  %v4432_v22 = vld [vmem:[#allocation2] sm:$0x1] }
 0xa3a   :  { %v4209_v24 = vadd.f32 %v8700_v41, %v4208_v58  ;;  %4435 = vperm.xlu1 %6123, %v4432_v22  }
 0xa3b   :  { %v4304_v5 = vmul.f32 0.044715, %v4214_v63  ;;  %v4288_v28 = vmul.f32 0.5, %v4214_v63 }
 0xa3c   :  { %v4303_v56 = vmul.f32 0.044715, %v4209_v24  ;;  %v4287_v23 = vmul.f32 0.5, %v4209_v24 }
 0xa3d   :  { %v4320_v52 = vmul.f32 %v4304_v5, %v4214_v63 }
 0xa3e   :  { %v4319_v32 = vmul.f32 %v4303_v56, %v4209_v24 }
 0xa3f   :  { %v4336_v39 = vmul.f32 %v4320_v52, %v4214_v63 }
 0xa40   :  { %v4335_v44 = vmul.f32 %v4319_v32, %v4209_v24 }
 0xa41   :  { %v4352_v37 = vadd.f32 %v4336_v39, %v4214_v63 }
 0xa42   :  { %v4351_v15 = vadd.f32 %v4335_v44, %v4209_v24 }
 0xa43   :  { %v4368_v31 = vmul.f32 0.7978846, %v4352_v37 }
 0xa44   :  { %v4367_v17 = vmul.f32 0.7978846, %v4351_v15 }
 0xa45   :  { %6221 = vtanh.f32 %v4368_v31 }
 0xa46   :  { %6223 = vtanh.f32 %v4367_v17 }
 0xa4b   :  { %v5735_v47 = vpop.f32.mrb[130].mxu1 }
 0xa4c   :  { %v4224_v30 = vadd.f32 %v5735_v47, %v8700_v41  ;;  %v4218_v8 = vpop.f32.mrb[131].mxu1 }
 0xa4d   :  { %v4219_v43 = vadd.f32 %v8700_v41, %v4218_v8 }
 0xa4e   :  { %v4306_v18 = vmul.f32 0.044715, %v4224_v30  ;;  %v4290_v49 = vmul.f32 0.5, %v4224_v30 }
 0xa4f   :  { %v6222_v4 = vpop.eup %6221  ;;  %v4305_v34 = vmul.f32 0.044715, %v4219_v43  ;;  %v4289_v60 = vmul.f32 0.5, %v4219_v43 }
 0xa50   :  { %v6224_v21 = vpop.eup %6223  ;;  %v4322_v51 = vmul.f32 %v4306_v18, %v4224_v30  ;;  %v4400_v59 = vadd.f32 1.0, %v6222_v4 }
 0xa51   :  { %v4321_v29 = vmul.f32 %v4305_v34, %v4219_v43  ;;  %v4399_v14 = vadd.f32 1.0, %v6224_v21 }
 0xa52   :  { %v4338_v48 = vmul.f32 %v4322_v51, %v4224_v30  ;;  %v4416_v27 = vmul.f32 %v4400_v59, %v4288_v28 }
 0xa53   :  { %v4337_v33 = vmul.f32 %v4321_v29, %v4219_v43  ;;  %v4415_v26 = vmul.f32 %v4399_v14, %v4287_v23 }
 0xa54   :  { %v4354_v13 = vadd.f32 %v4338_v48, %v4224_v30 }
 0xa55   :  { %v4353_v19 = vadd.f32 %v4337_v33, %v4219_v43  ;;  %v6038_v6 = vpack.c.bf16 %v4416_v27, %v4415_v26 }
 0xa56   :  { %v4370_v42 = vmul.f32 0.7978846, %v4354_v13 }
 0xa57   :  { %v4369_v1 = vmul.f32 0.7978846, %v4353_v19  ;;  %6040 = vmatpush3.bf16.xpose.msk.msra.mxu0 %vm8708_vm5, %v6038_v6 }
 0xa58   :  { %6225 = vtanh.f32 %v4370_v42  ;;  %6041 = vmatprep.subr.bf16.mxu0 %v6311_v9 }
 0xa59   :  { %6227 = vtanh.f32 %v4369_v1 }
 0xa5e   :  { %v5738_v35 = vpop.f32.mrb[132].mxu1 }
 0xa5f   :  { %v4234_v0 = vadd.f32 %v5738_v35, %v8700_v41  ;;  %v4228_v12 = vpop.f32.mrb[133].mxu1 }
 0xa60   :  { %v4229_v61 = vadd.f32 %v8700_v41, %v4228_v12 }
 0xa61   :  { %v4308_v20 = vmul.f32 0.044715, %v4234_v0  ;;  %v4292_v37 = vmul.f32 0.5, %v4234_v0 }
 0xa62   :  { %v6226_v50 = vpop.eup %6225  ;;  %v4307_v57 = vmul.f32 0.044715, %v4229_v61  ;;  %v4291_v17 = vmul.f32 0.5, %v4229_v61 }
 0xa63   :  { %v6228_v53 = vpop.eup %6227  ;;  %v4324_v11 = vmul.f32 %v4308_v20, %v4234_v0  ;;  %v4402_v10 = vadd.f32 1.0, %v6226_v50 }
 0xa64   :  { %v4323_v38 = vmul.f32 %v4307_v57, %v4229_v61  ;;  %v4401_v16 = vadd.f32 1.0, %v6228_v53 }
 0xa65   :  { %v4340_v3 = vmul.f32 %v4324_v11, %v4234_v0  ;;  %v4418_v46 = vmul.f32 %v4402_v10, %v4290_v49 }
 0xa66   :  { %v4339_v25 = vmul.f32 %v4323_v38, %v4229_v61  ;;  %v4417_v36 = vmul.f32 %v4401_v16, %v4289_v60 }
 0xa67   :  { %v4356_v54 = vadd.f32 %v4340_v3, %v4234_v0 }
 0xa68   :  { %v4355_v40 = vadd.f32 %v4339_v25, %v4229_v61  ;;  %v6042_v62 = vpack.c.bf16 %v4418_v46, %v4417_v36 }
 0xa69   :  { %v4372_v45 = vmul.f32 0.7978846, %v4356_v54 }
 0xa6a   :  { %v4371_v63 = vmul.f32 0.7978846, %v4355_v40  ;;  %6044 = vmatpush3.bf16.xpose.msk.msra.mxu0 %vm8708_vm5, %v6042_v62 }
 0xa6b   :  { %6229 = vtanh.f32 %v4372_v45  ;;  %6045 = vmatprep.subr.bf16.mxu0 %v6311_v9 }
 0xa6c   :  { %6231 = vtanh.f32 %v4371_v63 }
 0xa71   :  { %v5741_v58 = vpop.f32.mrb[134].mxu1 }
 0xa72   :  { %v4244_v24 = vadd.f32 %v5741_v58, %v8700_v41  ;;  %v4238_v5 = vpop.f32.mrb[135].mxu1 }
 0xa73   :  { %v4239_v56 = vadd.f32 %v8700_v41, %v4238_v5 }
 0xa74   :  { %v4310_v52 = vmul.f32 0.044715, %v4244_v24  ;;  %v4294_v19 = vmul.f32 0.5, %v4244_v24 }
 0xa75   :  { %v6230_v32 = vpop.eup %6229  ;;  %v4309_v39 = vmul.f32 0.044715, %v4239_v56  ;;  %v4293_v1 = vmul.f32 0.5, %v4239_v56 }
 0xa76   :  { %v6232_v44 = vpop.eup %6231  ;;  %v4326_v15 = vmul.f32 %v4310_v52, %v4244_v24  ;;  %v4404_v31 = vadd.f32 1.0, %v6230_v32 }
 0xa77   :  { %v4325_v47 = vmul.f32 %v4309_v39, %v4239_v56  ;;  %v4403_v30 = vadd.f32 1.0, %v6232_v44 }
 0xa78   :  { %v4342_v8 = vmul.f32 %v4326_v15, %v4244_v24  ;;  %v4420_v43 = vmul.f32 %v4404_v31, %v4292_v37 }
 0xa79   :  { %v4341_v18 = vmul.f32 %v4325_v47, %v4239_v56  ;;  %v4419_v4 = vmul.f32 %v4403_v30, %v4291_v17 }
 0xa7a   :  { %v4358_v34 = vadd.f32 %v4342_v8, %v4244_v24 }
 0xa7b   :  { %v4357_v21 = vadd.f32 %v4341_v18, %v4239_v56  ;;  %v6046_v28 = vpack.c.bf16 %v4420_v43, %v4419_v4 }
 0xa7c   :  { %v4374_v51 = vmul.f32 0.7978846, %v4358_v34 }
 0xa7d   :  { %v4373_v59 = vmul.f32 0.7978846, %v4357_v21  ;;  %6048 = vmatpush3.bf16.xpose.msk.msra.mxu0 %vm8708_vm5, %v6046_v28 }
 0xa7e   :  { %6233 = vtanh.f32 %v4374_v51  ;;  %6049 = vmatprep.subr.bf16.mxu0 %v6311_v9 }
 0xa7f   :  { %6235 = vtanh.f32 %v4373_v59 }
 0xa84   :  { %v5744_v23 = vpop.f32.mrb[136].mxu1 }
 0xa85   :  { %v4254_v29 = vadd.f32 %v5744_v23, %v8700_v41  ;;  %v4248_v14 = vpop.f32.mrb[137].mxu1 }
 0xa86   :  { %v4249_v48 = vadd.f32 %v8700_v41, %v4248_v14 }
 0xa87   :  { %v4312_v27 = vmul.f32 0.044715, %v4254_v29  ;;  %v4296_v36 = vmul.f32 0.5, %v4254_v29 }
 0xa88   :  { %v6234_v33 = vpop.eup %6233  ;;  %v4311_v26 = vmul.f32 0.044715, %v4249_v48  ;;  %v4295_v62 = vmul.f32 0.5, %v4249_v48 }
 0xa89   :  { %v6236_v13 = vpop.eup %6235  ;;  %v4328_v6 = vmul.f32 %v4312_v27, %v4254_v29  ;;  %v4406_v42 = vadd.f32 1.0, %v6234_v33 }
 0xa8a   :  { %v4327_v55 = vmul.f32 %v4311_v26, %v4249_v48  ;;  %v4405_v35 = vadd.f32 1.0, %v6236_v13 }
 0xa8b   :  { %v4344_v0 = vmul.f32 %v4328_v6, %v4254_v29  ;;  %v4422_v12 = vmul.f32 %v4406_v42, %v4294_v19 }
 0xa8c   :  { %v4343_v61 = vmul.f32 %v4327_v55, %v4249_v48  ;;  %v4421_v20 = vmul.f32 %v4405_v35, %v4293_v1 }
 0xa8d   :  { %v4360_v2 = vadd.f32 %v4344_v0, %v4254_v29 }
 0xa8e   :  { %v4359_v50 = vadd.f32 %v4343_v61, %v4249_v48  ;;  %v6050_v57 = vpack.c.bf16 %v4422_v12, %v4421_v20 }
 0xa8f   :  { %v4376_v53 = vmul.f32 0.7978846, %v4360_v2 }
 0xa90   :  { %v4375_v49 = vmul.f32 0.7978846, %v4359_v50  ;;  %6052 = vmatpush3.bf16.xpose.msk.msra.mxu0 %vm8708_vm5, %v6050_v57 }
 0xa91   :  { %6237 = vtanh.f32 %v4376_v53  ;;  %6053 = vmatprep.subr.bf16.mxu0 %v6311_v9 }
 0xa92   :  { %6239 = vtanh.f32 %v4375_v49 }
 0xa97   :  { %v5747_v11 = vpop.f32.mrb[138].mxu1 }
 0xa98   :  { %v4264_v10 = vadd.f32 %v5747_v11, %v8700_v41  ;;  %v4258_v60 = vpop.f32.mrb[139].mxu1 }
 0xa99   :  { %v4259_v38 = vadd.f32 %v8700_v41, %v4258_v60 }
 0xa9a   :  { %v4314_v16 = vmul.f32 0.044715, %v4264_v10  ;;  %v4298_v18 = vmul.f32 0.5, %v4264_v10 }
 0xa9b   :  { %v6238_v3 = vpop.eup %6237  ;;  %v4313_v46 = vmul.f32 0.044715, %v4259_v38  ;;  %v4297_v21 = vmul.f32 0.5, %v4259_v38 }
 0xa9c   :  { %v6240_v25 = vpop.eup %6239  ;;  %v4330_v54 = vmul.f32 %v4314_v16, %v4264_v10  ;;  %v4408_v40 = vadd.f32 1.0, %v6238_v3 }
 0xa9d   :  { %v4329_v45 = vmul.f32 %v4313_v46, %v4259_v38  ;;  %v4407_v22 = vadd.f32 1.0, %v6240_v25 }
 0xa9e   :  { %v4346_v63 = vmul.f32 %v4330_v54, %v4264_v10  ;;  %v4424_v58 = vmul.f32 %v4408_v40, %v4296_v36 }
 0xa9f   :  { %v4345_v24 = vmul.f32 %v4329_v45, %v4259_v38  ;;  %v4423_v5 = vmul.f32 %v4407_v22, %v4295_v62 }
 0xaa0   :  { %v4362_v56 = vadd.f32 %v4346_v63, %v4264_v10 }
 0xaa1   :  { %v4361_v52 = vadd.f32 %v4345_v24, %v4259_v38  ;;  %v6054_v32 = vpack.c.bf16 %v4424_v58, %v4423_v5  ;;  %v4431_v24 = vld [vmem:[%s8780_s21] sm:$0x1] }
 0xaa2   :  { %v4378_v39 = vmul.f32 0.7978846, %v4362_v56 }
 0xaa3   :  { %v4377_v44 = vmul.f32 0.7978846, %v4361_v52  ;;  %6056 = vmatpush3.bf16.xpose.msk.msra.mxu0 %vm8708_vm5, %v6054_v32 }
 0xaa4   :  { %6241 = vtanh.f32 %v4378_v39  ;;  %6057 = vmatprep.subr.bf16.mxu0 %v6311_v9 }
 0xaa5   :  { %6243 = vtanh.f32 %v4377_v44 }
 0xaaa   :  { %v5750_v37 = vpop.f32.mrb[140].mxu1 }
 0xaab   :  { %v4274_v15 = vadd.f32 %v5750_v37, %v8700_v41  ;;  %v4268_v31 = vpop.f32.mrb[141].mxu1 }
 0xaac   :  { %v4269_v17 = vadd.f32 %v8700_v41, %v4268_v31 }
 0xaad   :  { %v4316_v47 = vmul.f32 0.044715, %v4274_v15  ;;  %v4300_v50 = vmul.f32 0.5, %v4274_v15 }
 0xaae   :  { %v6242_v30 = vpop.eup %6241  ;;  %v4315_v8 = vmul.f32 0.044715, %v4269_v17  ;;  %v4299_v49 = vmul.f32 0.5, %v4269_v17 }
 0xaaf   :  { %v6244_v43 = vpop.eup %6243  ;;  %v4332_v4 = vmul.f32 %v4316_v47, %v4274_v15  ;;  %v4410_v34 = vadd.f32 1.0, %v6242_v30 }
 0xab0   :  { %v4331_v28 = vmul.f32 %v4315_v8, %v4269_v17  ;;  %v4409_v51 = vadd.f32 1.0, %v6244_v43 }
 0xab1   :  { %v4348_v59 = vmul.f32 %v4332_v4, %v4274_v15  ;;  %v4426_v23 = vmul.f32 %v4410_v34, %v4298_v18 }
 0xab2   :  { %v4347_v29 = vmul.f32 %v4331_v28, %v4269_v17  ;;  %v4425_v14 = vmul.f32 %v4409_v51, %v4297_v21 }
 0xab3   :  { %v4364_v48 = vadd.f32 %v4348_v59, %v4274_v15 }
 0xab4   :  { %v4363_v27 = vadd.f32 %v4347_v29, %v4269_v17  ;;  %v6058_v33 = vpack.c.bf16 %v4426_v23, %v4425_v14 }
 0xab5   :  { %v4380_v26 = vmul.f32 0.7978846, %v4364_v48 }
 0xab6   :  { %v4379_v13 = vmul.f32 0.7978846, %v4363_v27  ;;  %6060 = vmatpush3.bf16.xpose.msk.msra.mxu0 %vm8708_vm5, %v6058_v33 }
 0xab7   :  { %6245 = vtanh.f32 %v4380_v26  ;;  %6061 = vmatprep.subr.bf16.mxu0 %v6311_v9 }
 0xab8   :  { %6247 = vtanh.f32 %v4379_v13 }
 0xab9   :  { %v4436_v5 = vpop.permute.xlu1 %4435 }
 0xaba   :  { %v5753_v19 = vpop.f32.mrb[142].mxu1 }
 0xabb   :  { %v4284_v6 = vadd.f32 %v5753_v19, %v8700_v41  ;;  %v4278_v42 = vpop.f32.mrb[143].mxu1 }
 0xabc   :  { %v4279_v1 = vadd.f32 %v8700_v41, %v4278_v42 }
 0xabd   :  { %v4318_v55 = vmul.f32 0.044715, %v4284_v6  ;;  %v4302_v54 = vmul.f32 0.5, %v4284_v6 }
 0xabe   :  { %v4317_v35 = vmul.f32 0.044715, %v4279_v1  ;;  %v4301_v62 = vmul.f32 0.5, %v4279_v1 }
 0xabf   :  { %v4334_v0 = vmul.f32 %v4318_v55, %v4284_v6 }
 0xac0   :  { %v4333_v12 = vmul.f32 %v4317_v35, %v4279_v1 }
 0xac1   :  { %v6246_v61 = vpop.eup %6245  ;;  %v4350_v20 = vmul.f32 %v4334_v0, %v4284_v6 }
 0xac2   :  { %v6248_v2 = vpop.eup %6247  ;;  %v4349_v57 = vmul.f32 %v4333_v12, %v4279_v1  ;;  %v4412_v53 = vadd.f32 1.0, %v6246_v61 }
 0xac3   :  { %v4366_v11 = vadd.f32 %v4350_v20, %v4284_v6  ;;  %v4411_v10 = vadd.f32 1.0, %v6248_v2 }
 0xac4   :  { %v4365_v60 = vadd.f32 %v4349_v57, %v4279_v1  ;;  %v4428_v38 = vmul.f32 %v4412_v53, %v4300_v50 }
 0xac5   :  { %v4382_v16 = vmul.f32 0.7978846, %v4366_v11  ;;  %v4427_v3 = vmul.f32 %v4411_v10, %v4299_v49 }
 0xac6   :  { %v4381_v46 = vmul.f32 0.7978846, %v4365_v60 }
 0xac7   :  { %6249 = vtanh.f32 %v4382_v16  ;;  %v6062_v41 = vpack.c.bf16 %v4428_v38, %v4427_v3 }
 0xac8   :  { %6251 = vtanh.f32 %v4381_v46 }
 0xac9   :  { %6064 = vmatpush3.bf16.xpose.msk.msra.mxu0 %vm8708_vm5, %v6062_v41 }
 0xaca   :  { %6065 = vmatprep.subr.bf16.mxu0 %v6311_v9  ;;  %v8971_v9 = vld [vmem:[#allocation34_spill] sm:$0xff] }
 0xacb   :  { %v4441_v56 = vrot.slane %v4436_v5, %v8971_v9 }
 0xad1   :  { %v6250_v25 = vpop.eup %6249 }
 0xad2   :  { %v6252_v36 = vpop.eup %6251  ;;  %v4414_v40 = vadd.f32 1.0, %v6250_v25 }
 0xad3   :  { %v4413_v45 = vadd.f32 1.0, %v6252_v36 }
 0xad4   :  { %v4430_v22 = vmul.f32 %v4414_v40, %v4302_v54 }
 0xad5   :  { %v4429_v63 = vmul.f32 %v4413_v45, %v4301_v62 }
 0xad7   :  { %v6066_v58 = vpack.c.bf16 %v4430_v22, %v4429_v63 }
 0xad9   :  { %6068 = vmatpush3.bf16.xpose.msk.msra.mxu0 %vm8708_vm5, %v6066_v58 }
 0xae0   :  { %5787 = vmatmul.mubr.msk.f32.vlgmr.msra.gmra.mrb[112].mxu0 %vm715_vm2, %v4431_v24 }
 0xbb3   :  { %v4559_v52 = vpop.f32.mrb[112].mxu0 }
 0xbb4   :  { %v4560_v32 = vadd.f32 %v4559_v52, %v4441_v56  ;;  %v5788_v39 = vpop.f32.mrb[113].mxu0 }
 0xbb6   :  { %4563 = vst [vmem:[%s8781_s23] sm:$0x1] %v4560_v32 }

</bundles_post_ra>
